<compile_context>
chip_gen: v5e
topology: v5e:2x2
jax: 0.10.0
libtpu: 0.0.40
codegen_flags: <defaults>
</compile_context>

<pallas_src>
import math

import jax
import jax.numpy as jnp
from jax.experimental import pallas as pl
from jax.experimental.pallas import tpu as pltpu


def _round_up(x, m):
    return (x + m - 1) // m * m


def _num_tensorcores():
    """2 only on generations where the 'parallel' grid axis is actually split
    across TensorCores (v7x); on v5e/v6e it is a serial outer loop."""
    try:
        kind = jax.devices()[0].device_kind.lower()
    except Exception:  # no devices visible: be conservative
        return 1
    return 2 if "v7" in kind else 1


def _vmem_capacity_bytes():
    """Per-core VMEM capacity; conservative 64 MiB (v7x) fallback."""
    try:
        info = pltpu.get_tpu_info()
        cap = int(getattr(info, "vmem_capacity_bytes", 0))
        if cap > 0:
            return cap
    except Exception:
        pass
    return 64 << 20


def _pick_time_chunk(seq_len, b_blk, h_pad, d_in, fused):
    """Timesteps per grid step: amortize ~0.35us/step overhead, bound VMEM."""
    if h_pad <= 256:
        max_chunk = 64
    elif h_pad <= 512:
        max_chunk = 32
    else:
        max_chunk = 16
    if fused:
        per_step = b_blk * (d_in * 2 + 4 * h_pad * 4)  # bf16 x + f32 gx scratch
    else:
        per_step = b_blk * 4 * h_pad * 2               # bf16 gx stream
    budget = 4 << 20
    tt = max(1, min(max_chunk, budget // max(per_step, 1)))
    return int(min(tt, seq_len))


def _state_bytes(b_blk, h_pad):
    s = b_blk * h_pad * 4
    # h0/c0 in (2x buffered) + hN/cN out (2x buffered) + h_sc(bf16) + c_sc(f32)
    return 4 * s + 4 * s + s // 2 + s


def _fused_vmem_bytes(tt, b_blk, h_pad, d_in, out_itemsize):
    x_blk = tt * b_blk * d_in * 2
    bias = 4 * h_pad * 4
    w_ih = d_in * 4 * h_pad * 2          # single resident copy
    w_hh = 4 * h_pad * h_pad * 2         # single resident copy
    gx_sc = tt * b_blk * 4 * h_pad * 4
    y_blk = tt * b_blk * h_pad * out_itemsize
    return (2 * x_blk + 2 * bias + w_ih + w_hh + gx_sc + 2 * y_blk
            + _state_bytes(b_blk, h_pad))


def _hoisted_vmem_bytes(tt, b_blk, h_pad, out_itemsize):
    gx_blk = tt * b_blk * 4 * h_pad * 2
    w_hh = 4 * h_pad * h_pad * 2         # single resident copy
    y_blk = tt * b_blk * h_pad * out_itemsize
    return 2 * gx_blk + w_hh + 2 * y_blk + _state_bytes(b_blk, h_pad)


def _make_lstm_kernel(t_chunk, seq_len, h_pad, b_blk, mask_tail, unroll,
                      fuse_proj, d_in):
    """Kernel for one LSTM layer. Grid = (batch_blocks, time_chunks)."""
    H = h_pad

    def recurrence(t, read_gate, w_hh_vmem, h0_ref, c0_ref,
                   y_ref, hN_ref, cN_ref, h_sc, c_sc):
        @pl.when(t == 0)
        def _init():
            h_sc[...] = h0_ref[...].astype(jnp.bfloat16)
            c_sc[...] = c0_ref[...]

        def step(s, carry):
            h_bf, c = carry

            # Per-gate striping: never materialize the (Bb, 4H) f32 tensor.
            # PyTorch gate order i, f, g, o; slices are lane-aligned (H%128==0).
            def gate(gi):
                return (jnp.dot(h_bf, w_hh_vmem[gi],
                                preferred_element_type=jnp.float32)
                        + read_gate(s, gi))

            i = jax.nn.sigmoid(gate(0))
            f = jax.nn.sigmoid(gate(1))
            g = jnp.tanh(gate(2))
            o = jax.nn.sigmoid(gate(3))
            c_new = f * c + i * g
            h_new = o * jnp.tanh(c_new)
            if mask_tail:
                valid = (t * t_chunk + s) < seq_len
                h_new = jnp.where(valid, h_new, h_bf.astype(jnp.float32))
                c_new = jnp.where(valid, c_new, c)
            y_ref[s] = h_new.astype(y_ref.dtype)
            # h is carried bf16 (matmul operand dtype); c stays f32.
            return h_new.astype(jnp.bfloat16), c_new

        h_bf, c = jax.lax.fori_loop(0, t_chunk, step,
                                    (h_sc[...], c_sc[...]), unroll=unroll)
        h_sc[...] = h_bf
        c_sc[...] = c

        @pl.when(t == pl.num_programs(1) - 1)
        def _finalize():
            hN_ref[...] = h_bf.astype(jnp.float32)
            cN_ref[...] = c

    if fuse_proj:
        def kernel(x_ref, b_ref, w_ih_hbm, w_hh_hbm, h0_ref, c0_ref,
                   y_ref, hN_ref, cN_ref,
                   w_ih_vmem, w_hh_vmem, gx_sc, h_sc, c_sc):
            t = pl.program_id(1)

            # Deterministic single-buffering of the weights: one DMA per
            # batch block (scratch persists across the time-chunk loop).
            @pl.when(t == 0)
            def _load_weights():
                pltpu.sync_copy(w_ih_hbm, w_ih_vmem)
                pltpu.sync_copy(w_hh_hbm, w_hh_vmem)

            # Chunk-level input projection: big-M MXU matmul, independent of
            # the recurrence so it overlaps the serial chain.
            xm = x_ref[...].reshape(t_chunk * b_blk, d_in)
            gx_sc[...] = (jnp.dot(xm, w_ih_vmem[...],
                                  preferred_element_type=jnp.float32)
                          + b_ref[...])

            def read_gate(s, gi):
                row = pl.multiple_of(s * b_blk, b_blk)
                return gx_sc[pl.ds(row, b_blk), gi * H:(gi + 1) * H]

            recurrence(t, read_gate, w_hh_vmem, h0_ref, c0_ref,
                       y_ref, hN_ref, cN_ref, h_sc, c_sc)

        return kernel

    def kernel(gx_ref, w_hh_hbm, h0_ref, c0_ref,
               y_ref, hN_ref, cN_ref,
               w_hh_vmem, h_sc, c_sc):
        t = pl.program_id(1)

        @pl.when(t == 0)
        def _load_weights():
            pltpu.sync_copy(w_hh_hbm, w_hh_vmem)

        def read_gate(s, gi):
            return gx_ref[s, :, gi * H:(gi + 1) * H].astype(jnp.float32)

        recurrence(t, read_gate, w_hh_vmem, h0_ref, c0_ref,
                   y_ref, hN_ref, cN_ref, h_sc, c_sc)

    return kernel


def lstm_layer(x, w_ih, w_hh_g, b, h0, c0, *, hidden_pad, out_dtype,
               num_tc, vmem_cap):
    """One LSTM layer over the full sequence.

    x: (T, B_pad, D) bf16 activations, B_pad % 16 == 0.
    w_ih: (D, 4*H_pad) bf16.  w_hh_g: (4, H_pad, H_pad) bf16.  b: (1, 4*H_pad) f32.
    Returns y (T, B_pad, H_pad) in out_dtype, hN/cN (B_pad, H_pad) f32.
    """
    T, B_pad, D = x.shape
    H = hidden_pad
    out_itemsize = jnp.dtype(out_dtype).itemsize

    # Batch split only when a second TensorCore exists AND the split blocks
    # stay bf16-sublane dense (Bb % 16 == 0).  v5e/v6e always keep n_b = 1.
    n_b = 2 if (num_tc >= 2 and B_pad % 32 == 0) else 1
    Bb = B_pad // n_b

    budget = max(min(int(vmem_cap * 0.75), vmem_cap - (12 << 20)), 16 << 20)

    # Prefer the fused in-kernel projection; fall back to the hoisted XLA
    # projection when resident weights + scratch would not fit VMEM.
    fused = True
    Tt = _pick_time_chunk(T, Bb, H, D, fused=True)
    need = _fused_vmem_bytes(Tt, Bb, H, D, out_itemsize)
    if int(need * 1.25) + (4 << 20) > budget:
        fused = False
        Tt = _pick_time_chunk(T, Bb, H, D, fused=False)
        need = _hoisted_vmem_bytes(Tt, Bb, H, out_itemsize)
        while Tt > 1 and int(need * 1.25) + (4 << 20) > budget:
            Tt = max(1, Tt // 2)
            need = _hoisted_vmem_bytes(Tt, Bb, H, out_itemsize)

    vmem_limit = int(max(16 << 20, min(budget, int(need * 1.25) + (4 << 20))))

    T_pad = _round_up(T, Tt)
    n_t = T_pad // Tt
    mask_tail = (T_pad != T)
    # Full unroll for small H; capped for large H to limit live ranges.
    unroll = Tt if H <= 512 else min(Tt, 8)

    kernel = _make_lstm_kernel(Tt, T, H, Bb, mask_tail, unroll,
                               fuse_proj=fused, d_in=D)

    out_shape = (
        jax.ShapeDtypeStruct((T_pad, B_pad, H), out_dtype),
        jax.ShapeDtypeStruct((B_pad, H), jnp.float32),
        jax.ShapeDtypeStruct((B_pad, H), jnp.float32),
    )
    out_specs = (
        pl.BlockSpec((Tt, Bb, H), lambda bi, ti: (ti, bi, 0)),
        pl.BlockSpec((Bb, H), lambda bi, ti: (bi, 0)),
        pl.BlockSpec((Bb, H), lambda bi, ti: (bi, 0)),
    )
    compiler_params = pltpu.CompilerParams(
        dimension_semantics=("parallel", "arbitrary"),
        vmem_limit_bytes=vmem_limit)

    if fused:
        xp = x if T_pad == T else jnp.pad(x, ((0, T_pad - T), (0, 0), (0, 0)))
        grid_spec = pltpu.PrefetchScalarGridSpec(
            num_scalar_prefetch=0,
            grid=(n_b, n_t),
            in_specs=[
                pl.BlockSpec((Tt, Bb, D), lambda bi, ti: (ti, bi, 0)),   # x
                pl.BlockSpec((1, 4 * H), lambda bi, ti: (0, 0)),         # bias
                pl.BlockSpec(memory_space=pl.ANY),                        # W_ih
                pl.BlockSpec(memory_space=pl.ANY),                        # W_hh
                pl.BlockSpec((Bb, H), lambda bi, ti: (bi, 0)),            # h0
                pl.BlockSpec((Bb, H), lambda bi, ti: (bi, 0)),            # c0
            ],
            out_specs=out_specs,
            scratch_shapes=[
                pltpu.VMEM((D, 4 * H), jnp.bfloat16),          # W_ih resident
                pltpu.VMEM((4, H, H), jnp.bfloat16),           # W_hh resident
                pltpu.VMEM((Tt * Bb, 4 * H), jnp.float32),     # chunk gx
                pltpu.VMEM((Bb, H), jnp.bfloat16),             # h carry
                pltpu.VMEM((Bb, H), jnp.float32),              # c carry
            ],
        )
        y, hN, cN = pl.pallas_call(
            kernel, out_shape=out_shape, grid_spec=grid_spec,
            compiler_params=compiler_params,
        )(xp, b, w_ih, w_hh_g, h0, c0)
    else:
        # Hoisted projection: one big MXU matmul over all timesteps in XLA.
        gx = jnp.dot(x.reshape(T * B_pad, D), w_ih,
                     preferred_element_type=jnp.float32) + b
        gx = gx.astype(jnp.bfloat16).reshape(T, B_pad, 4 * H)
        if T_pad != T:
            gx = jnp.pad(gx, ((0, T_pad - T), (0, 0), (0, 0)))
        grid_spec = pltpu.PrefetchScalarGridSpec(
            num_scalar_prefetch=0,
            grid=(n_b, n_t),
            in_specs=[
                pl.BlockSpec((Tt, Bb, 4 * H), lambda bi, ti: (ti, bi, 0)),  # gx
                pl.BlockSpec(memory_space=pl.ANY),                           # W_hh
                pl.BlockSpec((Bb, H), lambda bi, ti: (bi, 0)),               # h0
                pl.BlockSpec((Bb, H), lambda bi, ti: (bi, 0)),               # c0
            ],
            out_specs=out_specs,
            scratch_shapes=[
                pltpu.VMEM((4, H, H), jnp.bfloat16),
                pltpu.VMEM((Bb, H), jnp.bfloat16),
                pltpu.VMEM((Bb, H), jnp.float32),
            ],
        )
        y, hN, cN = pl.pallas_call(
            kernel, out_shape=out_shape, grid_spec=grid_spec,
            compiler_params=compiler_params,
        )(gx, w_hh_g, h0, c0)

    return y[:T], hN, cN


def init_lstm_params(key, input_size, hidden_size, num_layers,
                     forget_gate_bias, weights_init_scale,
                     hidden_hidden_bias_scale):
    """Deterministic init mirroring torch.nn.LSTM + the module's __init__ tweaks."""
    params = []
    bound = 1.0 / math.sqrt(hidden_size)
    for layer in range(num_layers):
        d_in = input_size if layer == 0 else hidden_size
        key, k1, k2, k3, k4 = jax.random.split(key, 5)
        w_ih = jax.random.uniform(k1, (4 * hidden_size, d_in),
                                  jnp.float32, -bound, bound)
        w_hh = jax.random.uniform(k2, (4 * hidden_size, hidden_size),
                                  jnp.float32, -bound, bound)
        b_ih = jax.random.uniform(k3, (4 * hidden_size,),
                                  jnp.float32, -bound, bound)
        b_hh = jax.random.uniform(k4, (4 * hidden_size,),
                                  jnp.float32, -bound, bound)
        if forget_gate_bias is not None:
            b_ih = b_ih.at[hidden_size:2 * hidden_size].set(
                jnp.float32(forget_gate_bias))
            b_hh = b_hh.at[hidden_size:2 * hidden_size].multiply(
                jnp.float32(hidden_hidden_bias_scale))
        s = jnp.float32(weights_init_scale)
        params.append((w_ih * s, w_hh * s, b_ih * s, b_hh * s))
    return params


def prepare_lstm_params(raw_params, input_size, hidden_size):
    """One-time glue (NOT per forward call): transpose weights, fuse biases,
    pad hidden to a multiple of 128 (zero pad => exact), reorder W_hh per-gate
    to (4, H_pad, H_pad), and cast matmul operands to bf16."""
    H = hidden_size
    H_pad = _round_up(H, 128)
    prepared = []
    for layer, (w_ih, w_hh, b_ih, b_hh) in enumerate(raw_params):
        d_in = input_size if layer == 0 else H
        d_in_pad = d_in if layer == 0 else H_pad

        w_ih_t = jnp.transpose(w_ih).reshape(d_in, 4, H)
        w_ih_t = jnp.pad(w_ih_t, ((0, d_in_pad - d_in), (0, 0), (0, H_pad - H)))
        w_ih_t = w_ih_t.reshape(d_in_pad, 4 * H_pad).astype(jnp.bfloat16)

        w_hh_t = jnp.transpose(w_hh).reshape(H, 4, H)
        w_hh_t = jnp.pad(w_hh_t, ((0, H_pad - H), (0, 0), (0, H_pad - H)))
        w_hh_g = jnp.transpose(w_hh_t, (1, 0, 2)).astype(jnp.bfloat16)  # (4,H,H)

        b = (b_ih + b_hh).reshape(4, H)
        b = jnp.pad(b, ((0, 0), (0, H_pad - H))).reshape(1, 4 * H_pad)
        prepared.append((w_ih_t, w_hh_g, b.astype(jnp.float32)))
    return prepared


def lstm_forward(x, prepared_params, hidden_size, h=None):
    """Multi-layer LSTM forward. Returns (y, (h_n, c_n)) like torch.nn.LSTM."""
    num_layers = len(prepared_params)
    T, B, _ = x.shape
    H = hidden_size
    H_pad = prepared_params[0][1].shape[1]
    # bf16 activations pack 16 rows/sublane-tile: pad batch to 16 so streamed
    # x / y blocks are sublane-dense (no masked partial stores on the per-step
    # output path).
    B_pad = _round_up(max(B, 16), 16)

    num_tc = _num_tensorcores()
    vmem_cap = _vmem_capacity_bytes()

    if h is None:
        h0 = jnp.zeros((num_layers, B_pad, H_pad), jnp.float32)
        c0 = jnp.zeros((num_layers, B_pad, H_pad), jnp.float32)
    else:
        h0_in, c0_in = h
        pad = ((0, 0), (0, B_pad - B), (0, H_pad - H))
        h0 = jnp.pad(h0_in.astype(jnp.float32), pad)
        c0 = jnp.pad(c0_in.astype(jnp.float32), pad)

    out = jnp.pad(x, ((0, 0), (0, B_pad - B), (0, 0))).astype(jnp.bfloat16)
    hs, cs = [], []
    for layer, (w_ih, w_hh_g, b) in enumerate(prepared_params):
        last = layer == num_layers - 1
        # Intermediate activations in bf16 to halve the per-layer HBM round
        # trip; the final layer emits f32 to match the module's output dtype.
        out, hN, cN = lstm_layer(
            out, w_ih, w_hh_g, b, h0[layer], c0[layer],
            hidden_pad=H_pad,
            out_dtype=jnp.float32 if last else jnp.bfloat16,
            num_tc=num_tc, vmem_cap=vmem_cap)
        hs.append(hN)
        cs.append(cN)
        # TODO(synk): inter-layer LSTM dropout + the module-level output Dropout
        # are training-time stochastic ops; inference (identity) semantics here.
        # TODO(synk): v7x small-batch layer-wavefront pipelining across the two
        # TensorCores (core_map + shared-memory handoff) not implemented.

    y = out[:, :B, :H].astype(jnp.float32)
    h_n = jnp.stack(hs, 0)[:, :B, :H]
    c_n = jnp.stack(cs, 0)[:, :B, :H]
    return y, (h_n, c_n)


def _lstm_reference(x, raw_params, hidden_size):
    """Pure-JAX f32 reference matching torch.nn.LSTM semantics (zero init state)."""
    L = len(raw_params)
    B = x.shape[1]
    H = hidden_size
    out = x
    hs, cs = [], []
    for w_ih, w_hh, b_ih, b_hh in raw_params:
        def step(carry, xt):
            hh, cc = carry
            gates = xt @ w_ih.T + hh @ w_hh.T + b_ih + b_hh
            i, f, g, o = jnp.split(gates, 4, axis=-1)
            i, f, o = jax.nn.sigmoid(i), jax.nn.sigmoid(f), jax.nn.sigmoid(o)
            g = jnp.tanh(g)
            cc = f * cc + i * g
            hh = o * jnp.tanh(cc)
            return (hh, cc), hh
        (hT, cT), ys = jax.lax.scan(step, (jnp.zeros((B, H)), jnp.zeros((B, H))), out)
        out = ys
        hs.append(hT)
        cs.append(cT)
    return out, (jnp.stack(hs, 0), jnp.stack(cs, 0))


if __name__ == "__main__":
    # Small shapes consistent with the module's forward:
    # x: (seq=8, batch=2, input_size=16), hidden_size=32, num_layers=2.
    T, B, D_IN, H, NUM_LAYERS = 8, 2, 16, 32, 2

    key = jax.random.PRNGKey(0)
    key, kx = jax.random.split(key)
    x = jax.random.normal(kx, (T, B, D_IN), jnp.float32)

    raw_params = init_lstm_params(
        key, D_IN, H, NUM_LAYERS,
        forget_gate_bias=1.0,
        weights_init_scale=1.0,
        hidden_hidden_bias_scale=0.0)
    params = prepare_lstm_params(raw_params, D_IN, H)

    y, (h_n, c_n) = lstm_forward(x, params, H, h=None)
    jax.block_until_ready((y, h_n, c_n))

    assert y.shape == (T, B, H)
    assert h_n.shape == (NUM_LAYERS, B, H)
    assert c_n.shape == (NUM_LAYERS, B, H)

    # Loose tolerance check vs an f32 reference (kernel uses bf16 weights /
    # intermediate activations).
    y_ref, (h_ref, c_ref) = _lstm_reference(x, raw_params, H)
    for got, ref in ((y, y_ref), (h_n, h_ref), (c_n, c_ref)):
        err = float(jnp.max(jnp.abs(got - ref)))
        tol = 0.05 + 0.02 * float(jnp.max(jnp.abs(ref)))
        assert err <= tol, f"mismatch: max|err|={err} > tol={tol}"

    print("KERNEL_OK")
</pallas_src>

<mosaic_0001>
module attributes {stable_mosaic.version = 11 : i64} {
  func.func @kernel(%arg0: i32, %arg1: i32, %arg2: memref<8x16x16xbf16, #tpu.memory_space<vmem>>, %arg3: memref<1x512xf32, #tpu.memory_space<vmem>>, %arg4: memref<16x512xbf16, #tpu.memory_space<any>>, %arg5: memref<4x128x128xbf16, #tpu.memory_space<any>>, %arg6: memref<16x128xf32, #tpu.memory_space<vmem>>, %arg7: memref<16x128xf32, #tpu.memory_space<vmem>>, %arg8: memref<8x16x128xbf16, #tpu.memory_space<vmem>>, %arg9: memref<16x128xf32, #tpu.memory_space<vmem>>, %arg10: memref<16x128xf32, #tpu.memory_space<vmem>>, %arg11: memref<16x512xbf16, #tpu.memory_space<vmem>>, %arg12: memref<4x128x128xbf16, #tpu.memory_space<vmem>>, %arg13: memref<128x512xf32, #tpu.memory_space<vmem>>, %arg14: memref<16x128xbf16, #tpu.memory_space<vmem>>, %arg15: memref<16x128xf32, #tpu.memory_space<vmem>>) attributes {dimension_semantics = [#tpu.dimension_semantics<parallel>, #tpu.dimension_semantics<arbitrary>], iteration_bounds = array<i64: 1, 1>, scalar_prefetch = 0 : i64, scratch_operands = 5 : i64, tpu.core_type = #tpu.core_type<tc>, window_params = [{transform_indices = @transform_0, window_bounds = array<i64: 8, 16, 16>}, {pipeline_mode = #tpu.pipeline_mode<synchronous>, transform_indices = @transform_1, window_bounds = array<i64: 1, 512>}, {}, {}, {transform_indices = @transform_4, window_bounds = array<i64: 16, 128>}, {transform_indices = @transform_5, window_bounds = array<i64: 16, 128>}, {transform_indices = @transform_6, window_bounds = array<i64: 8, 16, 128>}, {transform_indices = @transform_7, window_bounds = array<i64: 16, 128>}, {transform_indices = @transform_8, window_bounds = array<i64: 16, 128>}]} {
    %c0_i32 = arith.constant 0 : i32
    %0 = arith.cmpi eq, %arg1, %c0_i32 : i32
    %1 = arith.extui %0 : i1 to i32
    %c0_i32_0 = arith.constant 0 : i32
    %2 = arith.cmpi ne, %1, %c0_i32_0 : i32
    scf.if %2 {
      "tpu.region"() ({
        %493 = tpu.sem_alloc : memref<!tpu.dma_semaphore, #tpu.memory_space<semaphore_mem>>
        tpu.enqueue_dma source(%arg4 : memref<16x512xbf16, #tpu.memory_space<any>>) target(%arg11 : memref<16x512xbf16, #tpu.memory_space<vmem>>) target_semaphore(%493 : memref<!tpu.dma_semaphore, #tpu.memory_space<semaphore_mem>>)
        tpu.wait_dma2 semaphore(%493 : memref<!tpu.dma_semaphore, #tpu.memory_space<semaphore_mem>>) src(%arg4 : memref<16x512xbf16, #tpu.memory_space<any>>) dst(%arg11 : memref<16x512xbf16, #tpu.memory_space<vmem>>)
        tpu.yield
      }) : () -> ()
      "tpu.region"() ({
        %493 = tpu.sem_alloc : memref<!tpu.dma_semaphore, #tpu.memory_space<semaphore_mem>>
        tpu.enqueue_dma source(%arg5 : memref<4x128x128xbf16, #tpu.memory_space<any>>) target(%arg12 : memref<4x128x128xbf16, #tpu.memory_space<vmem>>) target_semaphore(%493 : memref<!tpu.dma_semaphore, #tpu.memory_space<semaphore_mem>>)
        tpu.wait_dma2 semaphore(%493 : memref<!tpu.dma_semaphore, #tpu.memory_space<semaphore_mem>>) src(%arg5 : memref<4x128x128xbf16, #tpu.memory_space<any>>) dst(%arg12 : memref<4x128x128xbf16, #tpu.memory_space<vmem>>)
        tpu.yield
      }) : () -> ()
    } else {
    }
    %c0 = arith.constant 0 : index
    %c0_1 = arith.constant 0 : index
    %c0_2 = arith.constant 0 : index
    %3 = vector.load %arg2[%c0, %c0_1, %c0_2] : memref<8x16x16xbf16, #tpu.memory_space<vmem>>, vector<8x16x16xbf16>
    %4 = vector.shape_cast %3 : vector<8x16x16xbf16> to vector<128x16xbf16>
    %c0_3 = arith.constant 0 : index
    %c0_4 = arith.constant 0 : index
    %5 = vector.load %arg11[%c0_3, %c0_4] : memref<16x512xbf16, #tpu.memory_space<vmem>>, vector<16x512xbf16>
    %cst = arith.constant dense<0.000000e+00> : vector<128x512xf32>
    %6 = tpu.matmul %4, %5, %cst {dimension_numbers = #tpu.dot_dimension_numbers<[1], [0], [0], [1], [0, 0, 1, 1], [], []>} : vector<128x16xbf16>, vector<16x512xbf16>, vector<128x512xf32> -> vector<128x512xf32>
    %c0_5 = arith.constant 0 : index
    %c0_6 = arith.constant 0 : index
    %7 = vector.load %arg3[%c0_5, %c0_6] : memref<1x512xf32, #tpu.memory_space<vmem>>, vector<1x512xf32>
    %8 = vector.broadcast %7 : vector<1x512xf32> to vector<128x512xf32>
    %9 = arith.addf %6, %8 : vector<128x512xf32>
    %c0_7 = arith.constant 0 : index
    %c0_8 = arith.constant 0 : index
    %10 = vector.load %arg13[%c0_7, %c0_8] : memref<128x512xf32, #tpu.memory_space<vmem>>, vector<128x512xf32>
    tpu.vector_store %arg13[%c0_7, %c0_8], %9 {strides = array<i32>} : memref<128x512xf32, #tpu.memory_space<vmem>>, vector<128x512xf32>,
    %c0_i32_9 = arith.constant 0 : i32
    %11 = arith.cmpi eq, %arg1, %c0_i32_9 : i32
    %12 = arith.extui %11 : i1 to i32
    %c0_i32_10 = arith.constant 0 : i32
    %13 = arith.cmpi ne, %12, %c0_i32_10 : i32
    scf.if %13 {
      %c0_247 = arith.constant 0 : index
      %c0_248 = arith.constant 0 : index
      %493 = vector.load %arg6[%c0_247, %c0_248] : memref<16x128xf32, #tpu.memory_space<vmem>>, vector<16x128xf32>
      %494 = arith.truncf %493 : vector<16x128xf32> to vector<16x128xbf16>
      %c0_249 = arith.constant 0 : index
      %c0_250 = arith.constant 0 : index
      %495 = vector.load %arg14[%c0_249, %c0_250] : memref<16x128xbf16, #tpu.memory_space<vmem>>, vector<16x128xbf16>
      tpu.vector_store %arg14[%c0_249, %c0_250], %494 {strides = array<i32>} : memref<16x128xbf16, #tpu.memory_space<vmem>>, vector<16x128xbf16>,
      %c0_251 = arith.constant 0 : index
      %c0_252 = arith.constant 0 : index
      %496 = vector.load %arg7[%c0_251, %c0_252] : memref<16x128xf32, #tpu.memory_space<vmem>>, vector<16x128xf32>
      %c0_253 = arith.constant 0 : index
      %c0_254 = arith.constant 0 : index
      %497 = vector.load %arg15[%c0_253, %c0_254] : memref<16x128xf32, #tpu.memory_space<vmem>>, vector<16x128xf32>
      tpu.vector_store %arg15[%c0_253, %c0_254], %496 {strides = array<i32>} : memref<16x128xf32, #tpu.memory_space<vmem>>, vector<16x128xf32>,
    } else {
    }
    %c0_11 = arith.constant 0 : index
    %c0_12 = arith.constant 0 : index
    %14 = vector.load %arg14[%c0_11, %c0_12] : memref<16x128xbf16, #tpu.memory_space<vmem>>, vector<16x128xbf16>
    %c0_13 = arith.constant 0 : index
    %c0_14 = arith.constant 0 : index
    %15 = vector.load %arg15[%c0_13, %c0_14] : memref<16x128xf32, #tpu.memory_space<vmem>>, vector<16x128xf32>
    %c0_i32_15 = arith.constant 0 : i32
    %c0_16 = arith.constant 0 : index
    %c0_17 = arith.constant 0 : index
    %c0_18 = arith.constant 0 : index
    %16 = vector.load %arg12[%c0_16, %c0_17, %c0_18] : memref<4x128x128xbf16, #tpu.memory_space<vmem>>, vector<1x128x128xbf16>
    %17 = vector.shape_cast %16 : vector<1x128x128xbf16> to vector<128x128xbf16>
    %cst_19 = arith.constant dense<0.000000e+00> : vector<16x128xf32>
    %18 = tpu.matmul %14, %17, %cst_19 {dimension_numbers = #tpu.dot_dimension_numbers<[1], [0], [0], [1], [0, 0, 1, 1], [], []>} : vector<16x128xbf16>, vector<128x128xbf16>, vector<16x128xf32> -> vector<16x128xf32>
    %c16_i32 = arith.constant 16 : i32
    %19 = arith.muli %c0_i32_15, %c16_i32 : i32
    %20 = tpu.assume_multiple %19, 16 : i32
    %21 = arith.index_cast %20 : i32 to index
    %c0_20 = arith.constant 0 : index
    %22 = vector.load %arg13[%21, %c0_20] : memref<128x512xf32, #tpu.memory_space<vmem>>, vector<16x128xf32>
    %23 = arith.addf %18, %22 : vector<16x128xf32>
    %24 = arith.negf %23 : vector<16x128xf32>
    %25 = math.exp %24 : vector<16x128xf32>
    %cst_21 = arith.constant 1.000000e+00 : f32
    %26 = vector.broadcast %cst_21 : f32 to vector<16x128xf32>
    %27 = arith.addf %26, %25 : vector<16x128xf32>
    %28 = arith.divf %26, %27 : vector<16x128xf32>
    %c1 = arith.constant 1 : index
    %c0_22 = arith.constant 0 : index
    %c0_23 = arith.constant 0 : index
    %29 = vector.load %arg12[%c1, %c0_22, %c0_23] : memref<4x128x128xbf16, #tpu.memory_space<vmem>>, vector<1x128x128xbf16>
    %30 = vector.shape_cast %29 : vector<1x128x128xbf16> to vector<128x128xbf16>
    %cst_24 = arith.constant dense<0.000000e+00> : vector<16x128xf32>
    %31 = tpu.matmul %14, %30, %cst_24 {dimension_numbers = #tpu.dot_dimension_numbers<[1], [0], [0], [1], [0, 0, 1, 1], [], []>} : vector<16x128xbf16>, vector<128x128xbf16>, vector<16x128xf32> -> vector<16x128xf32>
    %c16_i32_25 = arith.constant 16 : i32
    %32 = arith.muli %c0_i32_15, %c16_i32_25 : i32
    %33 = tpu.assume_multiple %32, 16 : i32
    %34 = arith.index_cast %33 : i32 to index
    %c128 = arith.constant 128 : index
    %35 = vector.load %arg13[%34, %c128] : memref<128x512xf32, #tpu.memory_space<vmem>>, vector<16x128xf32>
    %36 = arith.addf %31, %35 : vector<16x128xf32>
    %37 = arith.negf %36 : vector<16x128xf32>
    %38 = math.exp %37 : vector<16x128xf32>
    %cst_26 = arith.constant 1.000000e+00 : f32
    %39 = vector.broadcast %cst_26 : f32 to vector<16x128xf32>
    %40 = arith.addf %39, %38 : vector<16x128xf32>
    %41 = arith.divf %39, %40 : vector<16x128xf32>
    %c2 = arith.constant 2 : index
    %c0_27 = arith.constant 0 : index
    %c0_28 = arith.constant 0 : index
    %42 = vector.load %arg12[%c2, %c0_27, %c0_28] : memref<4x128x128xbf16, #tpu.memory_space<vmem>>, vector<1x128x128xbf16>
    %43 = vector.shape_cast %42 : vector<1x128x128xbf16> to vector<128x128xbf16>
    %cst_29 = arith.constant dense<0.000000e+00> : vector<16x128xf32>
    %44 = tpu.matmul %14, %43, %cst_29 {dimension_numbers = #tpu.dot_dimension_numbers<[1], [0], [0], [1], [0, 0, 1, 1], [], []>} : vector<16x128xbf16>, vector<128x128xbf16>, vector<16x128xf32> -> vector<16x128xf32>
    %c16_i32_30 = arith.constant 16 : i32
    %45 = arith.muli %c0_i32_15, %c16_i32_30 : i32
    %46 = tpu.assume_multiple %45, 16 : i32
    %47 = arith.index_cast %46 : i32 to index
    %c256 = arith.constant 256 : index
    %48 = vector.load %arg13[%47, %c256] : memref<128x512xf32, #tpu.memory_space<vmem>>, vector<16x128xf32>
    %49 = arith.addf %44, %48 : vector<16x128xf32>
    %50 = math.tanh %49 : vector<16x128xf32>
    %c3 = arith.constant 3 : index
    %c0_31 = arith.constant 0 : index
    %c0_32 = arith.constant 0 : index
    %51 = vector.load %arg12[%c3, %c0_31, %c0_32] : memref<4x128x128xbf16, #tpu.memory_space<vmem>>, vector<1x128x128xbf16>
    %52 = vector.shape_cast %51 : vector<1x128x128xbf16> to vector<128x128xbf16>
    %cst_33 = arith.constant dense<0.000000e+00> : vector<16x128xf32>
    %53 = tpu.matmul %14, %52, %cst_33 {dimension_numbers = #tpu.dot_dimension_numbers<[1], [0], [0], [1], [0, 0, 1, 1], [], []>} : vector<16x128xbf16>, vector<128x128xbf16>, vector<16x128xf32> -> vector<16x128xf32>
    %c16_i32_34 = arith.constant 16 : i32
    %54 = arith.muli %c0_i32_15, %c16_i32_34 : i32
    %55 = tpu.assume_multiple %54, 16 : i32
    %56 = arith.index_cast %55 : i32 to index
    %c384 = arith.constant 384 : index
    %57 = vector.load %arg13[%56, %c384] : memref<128x512xf32, #tpu.memory_space<vmem>>, vector<16x128xf32>
    %58 = arith.addf %53, %57 : vector<16x128xf32>
    %59 = arith.negf %58 : vector<16x128xf32>
    %60 = math.exp %59 : vector<16x128xf32>
    %cst_35 = arith.constant 1.000000e+00 : f32
    %61 = vector.broadcast %cst_35 : f32 to vector<16x128xf32>
    %62 = arith.addf %61, %60 : vector<16x128xf32>
    %63 = arith.divf %61, %62 : vector<16x128xf32>
    %64 = arith.mulf %41, %15 : vector<16x128xf32>
    %65 = arith.mulf %28, %50 : vector<16x128xf32>
    %66 = arith.addf %64, %65 : vector<16x128xf32>
    %67 = math.tanh %66 : vector<16x128xf32>
    %68 = arith.mulf %63, %67 : vector<16x128xf32>
    %69 = arith.truncf %68 : vector<16x128xf32> to vector<16x128xbf16>
    %70 = arith.index_cast %c0_i32_15 : i32 to index
    %c0_36 = arith.constant 0 : index
    %c0_37 = arith.constant 0 : index
    %71 = vector.load %arg8[%70, %c0_36, %c0_37] : memref<8x16x128xbf16, #tpu.memory_space<vmem>>, vector<1x16x128xbf16>
    %72 = vector.shape_cast %71 : vector<1x16x128xbf16> to vector<16x128xbf16>
    %73 = vector.shape_cast %69 : vector<16x128xbf16> to vector<1x16x128xbf16>
    tpu.vector_store %arg8[%70, %c0_36, %c0_37], %73 {strides = array<i32>} : memref<8x16x128xbf16, #tpu.memory_space<vmem>>, vector<1x16x128xbf16>,
    %74 = arith.truncf %68 : vector<16x128xf32> to vector<16x128xbf16>
    %c1_i32 = arith.constant 1 : i32
    %c0_38 = arith.constant 0 : index
    %c0_39 = arith.constant 0 : index
    %c0_40 = arith.constant 0 : index
    %75 = vector.load %arg12[%c0_38, %c0_39, %c0_40] : memref<4x128x128xbf16, #tpu.memory_space<vmem>>, vector<1x128x128xbf16>
    %76 = vector.shape_cast %75 : vector<1x128x128xbf16> to vector<128x128xbf16>
    %cst_41 = arith.constant dense<0.000000e+00> : vector<16x128xf32>
    %77 = tpu.matmul %74, %76, %cst_41 {dimension_numbers = #tpu.dot_dimension_numbers<[1], [0], [0], [1], [0, 0, 1, 1], [], []>} : vector<16x128xbf16>, vector<128x128xbf16>, vector<16x128xf32> -> vector<16x128xf32>
    %c16_i32_42 = arith.constant 16 : i32
    %78 = arith.muli %c1_i32, %c16_i32_42 : i32
    %79 = tpu.assume_multiple %78, 16 : i32
    %80 = arith.index_cast %79 : i32 to index
    %c0_43 = arith.constant 0 : index
    %81 = vector.load %arg13[%80, %c0_43] : memref<128x512xf32, #tpu.memory_space<vmem>>, vector<16x128xf32>
    %82 = arith.addf %77, %81 : vector<16x128xf32>
    %83 = arith.negf %82 : vector<16x128xf32>
    %84 = math.exp %83 : vector<16x128xf32>
    %cst_44 = arith.constant 1.000000e+00 : f32
    %85 = vector.broadcast %cst_44 : f32 to vector<16x128xf32>
    %86 = arith.addf %85, %84 : vector<16x128xf32>
    %87 = arith.divf %85, %86 : vector<16x128xf32>
    %c1_45 = arith.constant 1 : index
    %c0_46 = arith.constant 0 : index
    %c0_47 = arith.constant 0 : index
    %88 = vector.load %arg12[%c1_45, %c0_46, %c0_47] : memref<4x128x128xbf16, #tpu.memory_space<vmem>>, vector<1x128x128xbf16>
    %89 = vector.shape_cast %88 : vector<1x128x128xbf16> to vector<128x128xbf16>
    %cst_48 = arith.constant dense<0.000000e+00> : vector<16x128xf32>
    %90 = tpu.matmul %74, %89, %cst_48 {dimension_numbers = #tpu.dot_dimension_numbers<[1], [0], [0], [1], [0, 0, 1, 1], [], []>} : vector<16x128xbf16>, vector<128x128xbf16>, vector<16x128xf32> -> vector<16x128xf32>
    %c16_i32_49 = arith.constant 16 : i32
    %91 = arith.muli %c1_i32, %c16_i32_49 : i32
    %92 = tpu.assume_multiple %91, 16 : i32
    %93 = arith.index_cast %92 : i32 to index
    %c128_50 = arith.constant 128 : index
    %94 = vector.load %arg13[%93, %c128_50] : memref<128x512xf32, #tpu.memory_space<vmem>>, vector<16x128xf32>
    %95 = arith.addf %90, %94 : vector<16x128xf32>
    %96 = arith.negf %95 : vector<16x128xf32>
    %97 = math.exp %96 : vector<16x128xf32>
    %cst_51 = arith.constant 1.000000e+00 : f32
    %98 = vector.broadcast %cst_51 : f32 to vector<16x128xf32>
    %99 = arith.addf %98, %97 : vector<16x128xf32>
    %100 = arith.divf %98, %99 : vector<16x128xf32>
    %c2_52 = arith.constant 2 : index
    %c0_53 = arith.constant 0 : index
    %c0_54 = arith.constant 0 : index
    %101 = vector.load %arg12[%c2_52, %c0_53, %c0_54] : memref<4x128x128xbf16, #tpu.memory_space<vmem>>, vector<1x128x128xbf16>
    %102 = vector.shape_cast %101 : vector<1x128x128xbf16> to vector<128x128xbf16>
    %cst_55 = arith.constant dense<0.000000e+00> : vector<16x128xf32>
    %103 = tpu.matmul %74, %102, %cst_55 {dimension_numbers = #tpu.dot_dimension_numbers<[1], [0], [0], [1], [0, 0, 1, 1], [], []>} : vector<16x128xbf16>, vector<128x128xbf16>, vector<16x128xf32> -> vector<16x128xf32>
    %c16_i32_56 = arith.constant 16 : i32
    %104 = arith.muli %c1_i32, %c16_i32_56 : i32
    %105 = tpu.assume_multiple %104, 16 : i32
    %106 = arith.index_cast %105 : i32 to index
    %c256_57 = arith.constant 256 : index
    %107 = vector.load %arg13[%106, %c256_57] : memref<128x512xf32, #tpu.memory_space<vmem>>, vector<16x128xf32>
    %108 = arith.addf %103, %107 : vector<16x128xf32>
    %109 = math.tanh %108 : vector<16x128xf32>
    %c3_58 = arith.constant 3 : index
    %c0_59 = arith.constant 0 : index
    %c0_60 = arith.constant 0 : index
    %110 = vector.load %arg12[%c3_58, %c0_59, %c0_60] : memref<4x128x128xbf16, #tpu.memory_space<vmem>>, vector<1x128x128xbf16>
    %111 = vector.shape_cast %110 : vector<1x128x128xbf16> to vector<128x128xbf16>
    %cst_61 = arith.constant dense<0.000000e+00> : vector<16x128xf32>
    %112 = tpu.matmul %74, %111, %cst_61 {dimension_numbers = #tpu.dot_dimension_numbers<[1], [0], [0], [1], [0, 0, 1, 1], [], []>} : vector<16x128xbf16>, vector<128x128xbf16>, vector<16x128xf32> -> vector<16x128xf32>
    %c16_i32_62 = arith.constant 16 : i32
    %113 = arith.muli %c1_i32, %c16_i32_62 : i32
    %114 = tpu.assume_multiple %113, 16 : i32
    %115 = arith.index_cast %114 : i32 to index
    %c384_63 = arith.constant 384 : index
    %116 = vector.load %arg13[%115, %c384_63] : memref<128x512xf32, #tpu.memory_space<vmem>>, vector<16x128xf32>
    %117 = arith.addf %112, %116 : vector<16x128xf32>
    %118 = arith.negf %117 : vector<16x128xf32>
    %119 = math.exp %118 : vector<16x128xf32>
    %cst_64 = arith.constant 1.000000e+00 : f32
    %120 = vector.broadcast %cst_64 : f32 to vector<16x128xf32>
    %121 = arith.addf %120, %119 : vector<16x128xf32>
    %122 = arith.divf %120, %121 : vector<16x128xf32>
    %123 = arith.mulf %100, %66 : vector<16x128xf32>
    %124 = arith.mulf %87, %109 : vector<16x128xf32>
    %125 = arith.addf %123, %124 : vector<16x128xf32>
    %126 = math.tanh %125 : vector<16x128xf32>
    %127 = arith.mulf %122, %126 : vector<16x128xf32>
    %128 = arith.truncf %127 : vector<16x128xf32> to vector<16x128xbf16>
    %129 = arith.index_cast %c1_i32 : i32 to index
    %c0_65 = arith.constant 0 : index
    %c0_66 = arith.constant 0 : index
    %130 = vector.load %arg8[%129, %c0_65, %c0_66] : memref<8x16x128xbf16, #tpu.memory_space<vmem>>, vector<1x16x128xbf16>
    %131 = vector.shape_cast %130 : vector<1x16x128xbf16> to vector<16x128xbf16>
    %132 = vector.shape_cast %128 : vector<16x128xbf16> to vector<1x16x128xbf16>
    tpu.vector_store %arg8[%129, %c0_65, %c0_66], %132 {strides = array<i32>} : memref<8x16x128xbf16, #tpu.memory_space<vmem>>, vector<1x16x128xbf16>,
    %133 = arith.truncf %127 : vector<16x128xf32> to vector<16x128xbf16>
    %c2_i32 = arith.constant 2 : i32
    %c0_67 = arith.constant 0 : index
    %c0_68 = arith.constant 0 : index
    %c0_69 = arith.constant 0 : index
    %134 = vector.load %arg12[%c0_67, %c0_68, %c0_69] : memref<4x128x128xbf16, #tpu.memory_space<vmem>>, vector<1x128x128xbf16>
    %135 = vector.shape_cast %134 : vector<1x128x128xbf16> to vector<128x128xbf16>
    %cst_70 = arith.constant dense<0.000000e+00> : vector<16x128xf32>
    %136 = tpu.matmul %133, %135, %cst_70 {dimension_numbers = #tpu.dot_dimension_numbers<[1], [0], [0], [1], [0, 0, 1, 1], [], []>} : vector<16x128xbf16>, vector<128x128xbf16>, vector<16x128xf32> -> vector<16x128xf32>
    %c16_i32_71 = arith.constant 16 : i32
    %137 = arith.muli %c2_i32, %c16_i32_71 : i32
    %138 = tpu.assume_multiple %137, 16 : i32
    %139 = arith.index_cast %138 : i32 to index
    %c0_72 = arith.constant 0 : index
    %140 = vector.load %arg13[%139, %c0_72] : memref<128x512xf32, #tpu.memory_space<vmem>>, vector<16x128xf32>
    %141 = arith.addf %136, %140 : vector<16x128xf32>
    %142 = arith.negf %141 : vector<16x128xf32>
    %143 = math.exp %142 : vector<16x128xf32>
    %cst_73 = arith.constant 1.000000e+00 : f32
    %144 = vector.broadcast %cst_73 : f32 to vector<16x128xf32>
    %145 = arith.addf %144, %143 : vector<16x128xf32>
    %146 = arith.divf %144, %145 : vector<16x128xf32>
    %c1_74 = arith.constant 1 : index
    %c0_75 = arith.constant 0 : index
    %c0_76 = arith.constant 0 : index
    %147 = vector.load %arg12[%c1_74, %c0_75, %c0_76] : memref<4x128x128xbf16, #tpu.memory_space<vmem>>, vector<1x128x128xbf16>
    %148 = vector.shape_cast %147 : vector<1x128x128xbf16> to vector<128x128xbf16>
    %cst_77 = arith.constant dense<0.000000e+00> : vector<16x128xf32>
    %149 = tpu.matmul %133, %148, %cst_77 {dimension_numbers = #tpu.dot_dimension_numbers<[1], [0], [0], [1], [0, 0, 1, 1], [], []>} : vector<16x128xbf16>, vector<128x128xbf16>, vector<16x128xf32> -> vector<16x128xf32>
    %c16_i32_78 = arith.constant 16 : i32
    %150 = arith.muli %c2_i32, %c16_i32_78 : i32
    %151 = tpu.assume_multiple %150, 16 : i32
    %152 = arith.index_cast %151 : i32 to index
    %c128_79 = arith.constant 128 : index
    %153 = vector.load %arg13[%152, %c128_79] : memref<128x512xf32, #tpu.memory_space<vmem>>, vector<16x128xf32>
    %154 = arith.addf %149, %153 : vector<16x128xf32>
    %155 = arith.negf %154 : vector<16x128xf32>
    %156 = math.exp %155 : vector<16x128xf32>
    %cst_80 = arith.constant 1.000000e+00 : f32
    %157 = vector.broadcast %cst_80 : f32 to vector<16x128xf32>
    %158 = arith.addf %157, %156 : vector<16x128xf32>
    %159 = arith.divf %157, %158 : vector<16x128xf32>
    %c2_81 = arith.constant 2 : index
    %c0_82 = arith.constant 0 : index
    %c0_83 = arith.constant 0 : index
    %160 = vector.load %arg12[%c2_81, %c0_82, %c0_83] : memref<4x128x128xbf16, #tpu.memory_space<vmem>>, vector<1x128x128xbf16>
    %161 = vector.shape_cast %160 : vector<1x128x128xbf16> to vector<128x128xbf16>
    %cst_84 = arith.constant dense<0.000000e+00> : vector<16x128xf32>
    %162 = tpu.matmul %133, %161, %cst_84 {dimension_numbers = #tpu.dot_dimension_numbers<[1], [0], [0], [1], [0, 0, 1, 1], [], []>} : vector<16x128xbf16>, vector<128x128xbf16>, vector<16x128xf32> -> vector<16x128xf32>
    %c16_i32_85 = arith.constant 16 : i32
    %163 = arith.muli %c2_i32, %c16_i32_85 : i32
    %164 = tpu.assume_multiple %163, 16 : i32
    %165 = arith.index_cast %164 : i32 to index
    %c256_86 = arith.constant 256 : index
    %166 = vector.load %arg13[%165, %c256_86] : memref<128x512xf32, #tpu.memory_space<vmem>>, vector<16x128xf32>
    %167 = arith.addf %162, %166 : vector<16x128xf32>
    %168 = math.tanh %167 : vector<16x128xf32>
    %c3_87 = arith.constant 3 : index
    %c0_88 = arith.constant 0 : index
    %c0_89 = arith.constant 0 : index
    %169 = vector.load %arg12[%c3_87, %c0_88, %c0_89] : memref<4x128x128xbf16, #tpu.memory_space<vmem>>, vector<1x128x128xbf16>
    %170 = vector.shape_cast %169 : vector<1x128x128xbf16> to vector<128x128xbf16>
    %cst_90 = arith.constant dense<0.000000e+00> : vector<16x128xf32>
    %171 = tpu.matmul %133, %170, %cst_90 {dimension_numbers = #tpu.dot_dimension_numbers<[1], [0], [0], [1], [0, 0, 1, 1], [], []>} : vector<16x128xbf16>, vector<128x128xbf16>, vector<16x128xf32> -> vector<16x128xf32>
    %c16_i32_91 = arith.constant 16 : i32
    %172 = arith.muli %c2_i32, %c16_i32_91 : i32
    %173 = tpu.assume_multiple %172, 16 : i32
    %174 = arith.index_cast %173 : i32 to index
    %c384_92 = arith.constant 384 : index
    %175 = vector.load %arg13[%174, %c384_92] : memref<128x512xf32, #tpu.memory_space<vmem>>, vector<16x128xf32>
    %176 = arith.addf %171, %175 : vector<16x128xf32>
    %177 = arith.negf %176 : vector<16x128xf32>
    %178 = math.exp %177 : vector<16x128xf32>
    %cst_93 = arith.constant 1.000000e+00 : f32
    %179 = vector.broadcast %cst_93 : f32 to vector<16x128xf32>
    %180 = arith.addf %179, %178 : vector<16x128xf32>
    %181 = arith.divf %179, %180 : vector<16x128xf32>
    %182 = arith.mulf %159, %125 : vector<16x128xf32>
    %183 = arith.mulf %146, %168 : vector<16x128xf32>
    %184 = arith.addf %182, %183 : vector<16x128xf32>
    %185 = math.tanh %184 : vector<16x128xf32>
    %186 = arith.mulf %181, %185 : vector<16x128xf32>
    %187 = arith.truncf %186 : vector<16x128xf32> to vector<16x128xbf16>
    %188 = arith.index_cast %c2_i32 : i32 to index
    %c0_94 = arith.constant 0 : index
    %c0_95 = arith.constant 0 : index
    %189 = vector.load %arg8[%188, %c0_94, %c0_95] : memref<8x16x128xbf16, #tpu.memory_space<vmem>>, vector<1x16x128xbf16>
    %190 = vector.shape_cast %189 : vector<1x16x128xbf16> to vector<16x128xbf16>
    %191 = vector.shape_cast %187 : vector<16x128xbf16> to vector<1x16x128xbf16>
    tpu.vector_store %arg8[%188, %c0_94, %c0_95], %191 {strides = array<i32>} : memref<8x16x128xbf16, #tpu.memory_space<vmem>>, vector<1x16x128xbf16>,
    %192 = arith.truncf %186 : vector<16x128xf32> to vector<16x128xbf16>
    %c3_i32 = arith.constant 3 : i32
    %c0_96 = arith.constant 0 : index
    %c0_97 = arith.constant 0 : index
    %c0_98 = arith.constant 0 : index
    %193 = vector.load %arg12[%c0_96, %c0_97, %c0_98] : memref<4x128x128xbf16, #tpu.memory_space<vmem>>, vector<1x128x128xbf16>
    %194 = vector.shape_cast %193 : vector<1x128x128xbf16> to vector<128x128xbf16>
    %cst_99 = arith.constant dense<0.000000e+00> : vector<16x128xf32>
    %195 = tpu.matmul %192, %194, %cst_99 {dimension_numbers = #tpu.dot_dimension_numbers<[1], [0], [0], [1], [0, 0, 1, 1], [], []>} : vector<16x128xbf16>, vector<128x128xbf16>, vector<16x128xf32> -> vector<16x128xf32>
    %c16_i32_100 = arith.constant 16 : i32
    %196 = arith.muli %c3_i32, %c16_i32_100 : i32
    %197 = tpu.assume_multiple %196, 16 : i32
    %198 = arith.index_cast %197 : i32 to index
    %c0_101 = arith.constant 0 : index
    %199 = vector.load %arg13[%198, %c0_101] : memref<128x512xf32, #tpu.memory_space<vmem>>, vector<16x128xf32>
    %200 = arith.addf %195, %199 : vector<16x128xf32>
    %201 = arith.negf %200 : vector<16x128xf32>
    %202 = math.exp %201 : vector<16x128xf32>
    %cst_102 = arith.constant 1.000000e+00 : f32
    %203 = vector.broadcast %cst_102 : f32 to vector<16x128xf32>
    %204 = arith.addf %203, %202 : vector<16x128xf32>
    %205 = arith.divf %203, %204 : vector<16x128xf32>
    %c1_103 = arith.constant 1 : index
    %c0_104 = arith.constant 0 : index
    %c0_105 = arith.constant 0 : index
    %206 = vector.load %arg12[%c1_103, %c0_104, %c0_105] : memref<4x128x128xbf16, #tpu.memory_space<vmem>>, vector<1x128x128xbf16>
    %207 = vector.shape_cast %206 : vector<1x128x128xbf16> to vector<128x128xbf16>
    %cst_106 = arith.constant dense<0.000000e+00> : vector<16x128xf32>
    %208 = tpu.matmul %192, %207, %cst_106 {dimension_numbers = #tpu.dot_dimension_numbers<[1], [0], [0], [1], [0, 0, 1, 1], [], []>} : vector<16x128xbf16>, vector<128x128xbf16>, vector<16x128xf32> -> vector<16x128xf32>
    %c16_i32_107 = arith.constant 16 : i32
    %209 = arith.muli %c3_i32, %c16_i32_107 : i32
    %210 = tpu.assume_multiple %209, 16 : i32
    %211 = arith.index_cast %210 : i32 to index
    %c128_108 = arith.constant 128 : index
    %212 = vector.load %arg13[%211, %c128_108] : memref<128x512xf32, #tpu.memory_space<vmem>>, vector<16x128xf32>
    %213 = arith.addf %208, %212 : vector<16x128xf32>
    %214 = arith.negf %213 : vector<16x128xf32>
    %215 = math.exp %214 : vector<16x128xf32>
    %cst_109 = arith.constant 1.000000e+00 : f32
    %216 = vector.broadcast %cst_109 : f32 to vector<16x128xf32>
    %217 = arith.addf %216, %215 : vector<16x128xf32>
    %218 = arith.divf %216, %217 : vector<16x128xf32>
    %c2_110 = arith.constant 2 : index
    %c0_111 = arith.constant 0 : index
    %c0_112 = arith.constant 0 : index
    %219 = vector.load %arg12[%c2_110, %c0_111, %c0_112] : memref<4x128x128xbf16, #tpu.memory_space<vmem>>, vector<1x128x128xbf16>
    %220 = vector.shape_cast %219 : vector<1x128x128xbf16> to vector<128x128xbf16>
    %cst_113 = arith.constant dense<0.000000e+00> : vector<16x128xf32>
    %221 = tpu.matmul %192, %220, %cst_113 {dimension_numbers = #tpu.dot_dimension_numbers<[1], [0], [0], [1], [0, 0, 1, 1], [], []>} : vector<16x128xbf16>, vector<128x128xbf16>, vector<16x128xf32> -> vector<16x128xf32>
    %c16_i32_114 = arith.constant 16 : i32
    %222 = arith.muli %c3_i32, %c16_i32_114 : i32
    %223 = tpu.assume_multiple %222, 16 : i32
    %224 = arith.index_cast %223 : i32 to index
    %c256_115 = arith.constant 256 : index
    %225 = vector.load %arg13[%224, %c256_115] : memref<128x512xf32, #tpu.memory_space<vmem>>, vector<16x128xf32>
    %226 = arith.addf %221, %225 : vector<16x128xf32>
    %227 = math.tanh %226 : vector<16x128xf32>
    %c3_116 = arith.constant 3 : index
    %c0_117 = arith.constant 0 : index
    %c0_118 = arith.constant 0 : index
    %228 = vector.load %arg12[%c3_116, %c0_117, %c0_118] : memref<4x128x128xbf16, #tpu.memory_space<vmem>>, vector<1x128x128xbf16>
    %229 = vector.shape_cast %228 : vector<1x128x128xbf16> to vector<128x128xbf16>
    %cst_119 = arith.constant dense<0.000000e+00> : vector<16x128xf32>
    %230 = tpu.matmul %192, %229, %cst_119 {dimension_numbers = #tpu.dot_dimension_numbers<[1], [0], [0], [1], [0, 0, 1, 1], [], []>} : vector<16x128xbf16>, vector<128x128xbf16>, vector<16x128xf32> -> vector<16x128xf32>
    %c16_i32_120 = arith.constant 16 : i32
    %231 = arith.muli %c3_i32, %c16_i32_120 : i32
    %232 = tpu.assume_multiple %231, 16 : i32
    %233 = arith.index_cast %232 : i32 to index
    %c384_121 = arith.constant 384 : index
    %234 = vector.load %arg13[%233, %c384_121] : memref<128x512xf32, #tpu.memory_space<vmem>>, vector<16x128xf32>
    %235 = arith.addf %230, %234 : vector<16x128xf32>
    %236 = arith.negf %235 : vector<16x128xf32>
    %237 = math.exp %236 : vector<16x128xf32>
    %cst_122 = arith.constant 1.000000e+00 : f32
    %238 = vector.broadcast %cst_122 : f32 to vector<16x128xf32>
    %239 = arith.addf %238, %237 : vector<16x128xf32>
    %240 = arith.divf %238, %239 : vector<16x128xf32>
    %241 = arith.mulf %218, %184 : vector<16x128xf32>
    %242 = arith.mulf %205, %227 : vector<16x128xf32>
    %243 = arith.addf %241, %242 : vector<16x128xf32>
    %244 = math.tanh %243 : vector<16x128xf32>
    %245 = arith.mulf %240, %244 : vector<16x128xf32>
    %246 = arith.truncf %245 : vector<16x128xf32> to vector<16x128xbf16>
    %247 = arith.index_cast %c3_i32 : i32 to index
    %c0_123 = arith.constant 0 : index
    %c0_124 = arith.constant 0 : index
    %248 = vector.load %arg8[%247, %c0_123, %c0_124] : memref<8x16x128xbf16, #tpu.memory_space<vmem>>, vector<1x16x128xbf16>
    %249 = vector.shape_cast %248 : vector<1x16x128xbf16> to vector<16x128xbf16>
    %250 = vector.shape_cast %246 : vector<16x128xbf16> to vector<1x16x128xbf16>
    tpu.vector_store %arg8[%247, %c0_123, %c0_124], %250 {strides = array<i32>} : memref<8x16x128xbf16, #tpu.memory_space<vmem>>, vector<1x16x128xbf16>,
    %251 = arith.truncf %245 : vector<16x128xf32> to vector<16x128xbf16>
    %c4_i32 = arith.constant 4 : i32
    %c0_125 = arith.constant 0 : index
    %c0_126 = arith.constant 0 : index
    %c0_127 = arith.constant 0 : index
    %252 = vector.load %arg12[%c0_125, %c0_126, %c0_127] : memref<4x128x128xbf16, #tpu.memory_space<vmem>>, vector<1x128x128xbf16>
    %253 = vector.shape_cast %252 : vector<1x128x128xbf16> to vector<128x128xbf16>
    %cst_128 = arith.constant dense<0.000000e+00> : vector<16x128xf32>
    %254 = tpu.matmul %251, %253, %cst_128 {dimension_numbers = #tpu.dot_dimension_numbers<[1], [0], [0], [1], [0, 0, 1, 1], [], []>} : vector<16x128xbf16>, vector<128x128xbf16>, vector<16x128xf32> -> vector<16x128xf32>
    %c16_i32_129 = arith.constant 16 : i32
    %255 = arith.muli %c4_i32, %c16_i32_129 : i32
    %256 = tpu.assume_multiple %255, 16 : i32
    %257 = arith.index_cast %256 : i32 to index
    %c0_130 = arith.constant 0 : index
    %258 = vector.load %arg13[%257, %c0_130] : memref<128x512xf32, #tpu.memory_space<vmem>>, vector<16x128xf32>
    %259 = arith.addf %254, %258 : vector<16x128xf32>
    %260 = arith.negf %259 : vector<16x128xf32>
    %261 = math.exp %260 : vector<16x128xf32>
    %cst_131 = arith.constant 1.000000e+00 : f32
    %262 = vector.broadcast %cst_131 : f32 to vector<16x128xf32>
    %263 = arith.addf %262, %261 : vector<16x128xf32>
    %264 = arith.divf %262, %263 : vector<16x128xf32>
    %c1_132 = arith.constant 1 : index
    %c0_133 = arith.constant 0 : index
    %c0_134 = arith.constant 0 : index
    %265 = vector.load %arg12[%c1_132, %c0_133, %c0_134] : memref<4x128x128xbf16, #tpu.memory_space<vmem>>, vector<1x128x128xbf16>
    %266 = vector.shape_cast %265 : vector<1x128x128xbf16> to vector<128x128xbf16>
    %cst_135 = arith.constant dense<0.000000e+00> : vector<16x128xf32>
    %267 = tpu.matmul %251, %266, %cst_135 {dimension_numbers = #tpu.dot_dimension_numbers<[1], [0], [0], [1], [0, 0, 1, 1], [], []>} : vector<16x128xbf16>, vector<128x128xbf16>, vector<16x128xf32> -> vector<16x128xf32>
    %c16_i32_136 = arith.constant 16 : i32
    %268 = arith.muli %c4_i32, %c16_i32_136 : i32
    %269 = tpu.assume_multiple %268, 16 : i32
    %270 = arith.index_cast %269 : i32 to index
    %c128_137 = arith.constant 128 : index
    %271 = vector.load %arg13[%270, %c128_137] : memref<128x512xf32, #tpu.memory_space<vmem>>, vector<16x128xf32>
    %272 = arith.addf %267, %271 : vector<16x128xf32>
    %273 = arith.negf %272 : vector<16x128xf32>
    %274 = math.exp %273 : vector<16x128xf32>
    %cst_138 = arith.constant 1.000000e+00 : f32
    %275 = vector.broadcast %cst_138 : f32 to vector<16x128xf32>
    %276 = arith.addf %275, %274 : vector<16x128xf32>
    %277 = arith.divf %275, %276 : vector<16x128xf32>
    %c2_139 = arith.constant 2 : index
    %c0_140 = arith.constant 0 : index
    %c0_141 = arith.constant 0 : index
    %278 = vector.load %arg12[%c2_139, %c0_140, %c0_141] : memref<4x128x128xbf16, #tpu.memory_space<vmem>>, vector<1x128x128xbf16>
    %279 = vector.shape_cast %278 : vector<1x128x128xbf16> to vector<128x128xbf16>
    %cst_142 = arith.constant dense<0.000000e+00> : vector<16x128xf32>
    %280 = tpu.matmul %251, %279, %cst_142 {dimension_numbers = #tpu.dot_dimension_numbers<[1], [0], [0], [1], [0, 0, 1, 1], [], []>} : vector<16x128xbf16>, vector<128x128xbf16>, vector<16x128xf32> -> vector<16x128xf32>
    %c16_i32_143 = arith.constant 16 : i32
    %281 = arith.muli %c4_i32, %c16_i32_143 : i32
    %282 = tpu.assume_multiple %281, 16 : i32
    %283 = arith.index_cast %282 : i32 to index
    %c256_144 = arith.constant 256 : index
    %284 = vector.load %arg13[%283, %c256_144] : memref<128x512xf32, #tpu.memory_space<vmem>>, vector<16x128xf32>
    %285 = arith.addf %280, %284 : vector<16x128xf32>
    %286 = math.tanh %285 : vector<16x128xf32>
    %c3_145 = arith.constant 3 : index
    %c0_146 = arith.constant 0 : index
    %c0_147 = arith.constant 0 : index
    %287 = vector.load %arg12[%c3_145, %c0_146, %c0_147] : memref<4x128x128xbf16, #tpu.memory_space<vmem>>, vector<1x128x128xbf16>
    %288 = vector.shape_cast %287 : vector<1x128x128xbf16> to vector<128x128xbf16>
    %cst_148 = arith.constant dense<0.000000e+00> : vector<16x128xf32>
    %289 = tpu.matmul %251, %288, %cst_148 {dimension_numbers = #tpu.dot_dimension_numbers<[1], [0], [0], [1], [0, 0, 1, 1], [], []>} : vector<16x128xbf16>, vector<128x128xbf16>, vector<16x128xf32> -> vector<16x128xf32>
    %c16_i32_149 = arith.constant 16 : i32
    %290 = arith.muli %c4_i32, %c16_i32_149 : i32
    %291 = tpu.assume_multiple %290, 16 : i32
    %292 = arith.index_cast %291 : i32 to index
    %c384_150 = arith.constant 384 : index
    %293 = vector.load %arg13[%292, %c384_150] : memref<128x512xf32, #tpu.memory_space<vmem>>, vector<16x128xf32>
    %294 = arith.addf %289, %293 : vector<16x128xf32>
    %295 = arith.negf %294 : vector<16x128xf32>
    %296 = math.exp %295 : vector<16x128xf32>
    %cst_151 = arith.constant 1.000000e+00 : f32
    %297 = vector.broadcast %cst_151 : f32 to vector<16x128xf32>
    %298 = arith.addf %297, %296 : vector<16x128xf32>
    %299 = arith.divf %297, %298 : vector<16x128xf32>
    %300 = arith.mulf %277, %243 : vector<16x128xf32>
    %301 = arith.mulf %264, %286 : vector<16x128xf32>
    %302 = arith.addf %300, %301 : vector<16x128xf32>
    %303 = math.tanh %302 : vector<16x128xf32>
    %304 = arith.mulf %299, %303 : vector<16x128xf32>
    %305 = arith.truncf %304 : vector<16x128xf32> to vector<16x128xbf16>
    %306 = arith.index_cast %c4_i32 : i32 to index
    %c0_152 = arith.constant 0 : index
    %c0_153 = arith.constant 0 : index
    %307 = vector.load %arg8[%306, %c0_152, %c0_153] : memref<8x16x128xbf16, #tpu.memory_space<vmem>>, vector<1x16x128xbf16>
    %308 = vector.shape_cast %307 : vector<1x16x128xbf16> to vector<16x128xbf16>
    %309 = vector.shape_cast %305 : vector<16x128xbf16> to vector<1x16x128xbf16>
    tpu.vector_store %arg8[%306, %c0_152, %c0_153], %309 {strides = array<i32>} : memref<8x16x128xbf16, #tpu.memory_space<vmem>>, vector<1x16x128xbf16>,
    %310 = arith.truncf %304 : vector<16x128xf32> to vector<16x128xbf16>
    %c5_i32 = arith.constant 5 : i32
    %c0_154 = arith.constant 0 : index
    %c0_155 = arith.constant 0 : index
    %c0_156 = arith.constant 0 : index
    %311 = vector.load %arg12[%c0_154, %c0_155, %c0_156] : memref<4x128x128xbf16, #tpu.memory_space<vmem>>, vector<1x128x128xbf16>
    %312 = vector.shape_cast %311 : vector<1x128x128xbf16> to vector<128x128xbf16>
    %cst_157 = arith.constant dense<0.000000e+00> : vector<16x128xf32>
    %313 = tpu.matmul %310, %312, %cst_157 {dimension_numbers = #tpu.dot_dimension_numbers<[1], [0], [0], [1], [0, 0, 1, 1], [], []>} : vector<16x128xbf16>, vector<128x128xbf16>, vector<16x128xf32> -> vector<16x128xf32>
    %c16_i32_158 = arith.constant 16 : i32
    %314 = arith.muli %c5_i32, %c16_i32_158 : i32
    %315 = tpu.assume_multiple %314, 16 : i32
    %316 = arith.index_cast %315 : i32 to index
    %c0_159 = arith.constant 0 : index
    %317 = vector.load %arg13[%316, %c0_159] : memref<128x512xf32, #tpu.memory_space<vmem>>, vector<16x128xf32>
    %318 = arith.addf %313, %317 : vector<16x128xf32>
    %319 = arith.negf %318 : vector<16x128xf32>
    %320 = math.exp %319 : vector<16x128xf32>
    %cst_160 = arith.constant 1.000000e+00 : f32
    %321 = vector.broadcast %cst_160 : f32 to vector<16x128xf32>
    %322 = arith.addf %321, %320 : vector<16x128xf32>
    %323 = arith.divf %321, %322 : vector<16x128xf32>
    %c1_161 = arith.constant 1 : index
    %c0_162 = arith.constant 0 : index
    %c0_163 = arith.constant 0 : index
    %324 = vector.load %arg12[%c1_161, %c0_162, %c0_163] : memref<4x128x128xbf16, #tpu.memory_space<vmem>>, vector<1x128x128xbf16>
    %325 = vector.shape_cast %324 : vector<1x128x128xbf16> to vector<128x128xbf16>
    %cst_164 = arith.constant dense<0.000000e+00> : vector<16x128xf32>
    %326 = tpu.matmul %310, %325, %cst_164 {dimension_numbers = #tpu.dot_dimension_numbers<[1], [0], [0], [1], [0, 0, 1, 1], [], []>} : vector<16x128xbf16>, vector<128x128xbf16>, vector<16x128xf32> -> vector<16x128xf32>
    %c16_i32_165 = arith.constant 16 : i32
    %327 = arith.muli %c5_i32, %c16_i32_165 : i32
    %328 = tpu.assume_multiple %327, 16 : i32
    %329 = arith.index_cast %328 : i32 to index
    %c128_166 = arith.constant 128 : index
    %330 = vector.load %arg13[%329, %c128_166] : memref<128x512xf32, #tpu.memory_space<vmem>>, vector<16x128xf32>
    %331 = arith.addf %326, %330 : vector<16x128xf32>
    %332 = arith.negf %331 : vector<16x128xf32>
    %333 = math.exp %332 : vector<16x128xf32>
    %cst_167 = arith.constant 1.000000e+00 : f32
    %334 = vector.broadcast %cst_167 : f32 to vector<16x128xf32>
    %335 = arith.addf %334, %333 : vector<16x128xf32>
    %336 = arith.divf %334, %335 : vector<16x128xf32>
    %c2_168 = arith.constant 2 : index
    %c0_169 = arith.constant 0 : index
    %c0_170 = arith.constant 0 : index
    %337 = vector.load %arg12[%c2_168, %c0_169, %c0_170] : memref<4x128x128xbf16, #tpu.memory_space<vmem>>, vector<1x128x128xbf16>
    %338 = vector.shape_cast %337 : vector<1x128x128xbf16> to vector<128x128xbf16>
    %cst_171 = arith.constant dense<0.000000e+00> : vector<16x128xf32>
    %339 = tpu.matmul %310, %338, %cst_171 {dimension_numbers = #tpu.dot_dimension_numbers<[1], [0], [0], [1], [0, 0, 1, 1], [], []>} : vector<16x128xbf16>, vector<128x128xbf16>, vector<16x128xf32> -> vector<16x128xf32>
    %c16_i32_172 = arith.constant 16 : i32
    %340 = arith.muli %c5_i32, %c16_i32_172 : i32
    %341 = tpu.assume_multiple %340, 16 : i32
    %342 = arith.index_cast %341 : i32 to index
    %c256_173 = arith.constant 256 : index
    %343 = vector.load %arg13[%342, %c256_173] : memref<128x512xf32, #tpu.memory_space<vmem>>, vector<16x128xf32>
    %344 = arith.addf %339, %343 : vector<16x128xf32>
    %345 = math.tanh %344 : vector<16x128xf32>
    %c3_174 = arith.constant 3 : index
    %c0_175 = arith.constant 0 : index
    %c0_176 = arith.constant 0 : index
    %346 = vector.load %arg12[%c3_174, %c0_175, %c0_176] : memref<4x128x128xbf16, #tpu.memory_space<vmem>>, vector<1x128x128xbf16>
    %347 = vector.shape_cast %346 : vector<1x128x128xbf16> to vector<128x128xbf16>
    %cst_177 = arith.constant dense<0.000000e+00> : vector<16x128xf32>
    %348 = tpu.matmul %310, %347, %cst_177 {dimension_numbers = #tpu.dot_dimension_numbers<[1], [0], [0], [1], [0, 0, 1, 1], [], []>} : vector<16x128xbf16>, vector<128x128xbf16>, vector<16x128xf32> -> vector<16x128xf32>
    %c16_i32_178 = arith.constant 16 : i32
    %349 = arith.muli %c5_i32, %c16_i32_178 : i32
    %350 = tpu.assume_multiple %349, 16 : i32
    %351 = arith.index_cast %350 : i32 to index
    %c384_179 = arith.constant 384 : index
    %352 = vector.load %arg13[%351, %c384_179] : memref<128x512xf32, #tpu.memory_space<vmem>>, vector<16x128xf32>
    %353 = arith.addf %348, %352 : vector<16x128xf32>
    %354 = arith.negf %353 : vector<16x128xf32>
    %355 = math.exp %354 : vector<16x128xf32>
    %cst_180 = arith.constant 1.000000e+00 : f32
    %356 = vector.broadcast %cst_180 : f32 to vector<16x128xf32>
    %357 = arith.addf %356, %355 : vector<16x128xf32>
    %358 = arith.divf %356, %357 : vector<16x128xf32>
    %359 = arith.mulf %336, %302 : vector<16x128xf32>
    %360 = arith.mulf %323, %345 : vector<16x128xf32>
    %361 = arith.addf %359, %360 : vector<16x128xf32>
    %362 = math.tanh %361 : vector<16x128xf32>
    %363 = arith.mulf %358, %362 : vector<16x128xf32>
    %364 = arith.truncf %363 : vector<16x128xf32> to vector<16x128xbf16>
    %365 = arith.index_cast %c5_i32 : i32 to index
    %c0_181 = arith.constant 0 : index
    %c0_182 = arith.constant 0 : index
    %366 = vector.load %arg8[%365, %c0_181, %c0_182] : memref<8x16x128xbf16, #tpu.memory_space<vmem>>, vector<1x16x128xbf16>
    %367 = vector.shape_cast %366 : vector<1x16x128xbf16> to vector<16x128xbf16>
    %368 = vector.shape_cast %364 : vector<16x128xbf16> to vector<1x16x128xbf16>
    tpu.vector_store %arg8[%365, %c0_181, %c0_182], %368 {strides = array<i32>} : memref<8x16x128xbf16, #tpu.memory_space<vmem>>, vector<1x16x128xbf16>,
    %369 = arith.truncf %363 : vector<16x128xf32> to vector<16x128xbf16>
    %c6_i32 = arith.constant 6 : i32
    %c0_183 = arith.constant 0 : index
    %c0_184 = arith.constant 0 : index
    %c0_185 = arith.constant 0 : index
    %370 = vector.load %arg12[%c0_183, %c0_184, %c0_185] : memref<4x128x128xbf16, #tpu.memory_space<vmem>>, vector<1x128x128xbf16>
    %371 = vector.shape_cast %370 : vector<1x128x128xbf16> to vector<128x128xbf16>
    %cst_186 = arith.constant dense<0.000000e+00> : vector<16x128xf32>
    %372 = tpu.matmul %369, %371, %cst_186 {dimension_numbers = #tpu.dot_dimension_numbers<[1], [0], [0], [1], [0, 0, 1, 1], [], []>} : vector<16x128xbf16>, vector<128x128xbf16>, vector<16x128xf32> -> vector<16x128xf32>
    %c16_i32_187 = arith.constant 16 : i32
    %373 = arith.muli %c6_i32, %c16_i32_187 : i32
    %374 = tpu.assume_multiple %373, 16 : i32
    %375 = arith.index_cast %374 : i32 to index
    %c0_188 = arith.constant 0 : index
    %376 = vector.load %arg13[%375, %c0_188] : memref<128x512xf32, #tpu.memory_space<vmem>>, vector<16x128xf32>
    %377 = arith.addf %372, %376 : vector<16x128xf32>
    %378 = arith.negf %377 : vector<16x128xf32>
    %379 = math.exp %378 : vector<16x128xf32>
    %cst_189 = arith.constant 1.000000e+00 : f32
    %380 = vector.broadcast %cst_189 : f32 to vector<16x128xf32>
    %381 = arith.addf %380, %379 : vector<16x128xf32>
    %382 = arith.divf %380, %381 : vector<16x128xf32>
    %c1_190 = arith.constant 1 : index
    %c0_191 = arith.constant 0 : index
    %c0_192 = arith.constant 0 : index
    %383 = vector.load %arg12[%c1_190, %c0_191, %c0_192] : memref<4x128x128xbf16, #tpu.memory_space<vmem>>, vector<1x128x128xbf16>
    %384 = vector.shape_cast %383 : vector<1x128x128xbf16> to vector<128x128xbf16>
    %cst_193 = arith.constant dense<0.000000e+00> : vector<16x128xf32>
    %385 = tpu.matmul %369, %384, %cst_193 {dimension_numbers = #tpu.dot_dimension_numbers<[1], [0], [0], [1], [0, 0, 1, 1], [], []>} : vector<16x128xbf16>, vector<128x128xbf16>, vector<16x128xf32> -> vector<16x128xf32>
    %c16_i32_194 = arith.constant 16 : i32
    %386 = arith.muli %c6_i32, %c16_i32_194 : i32
    %387 = tpu.assume_multiple %386, 16 : i32
    %388 = arith.index_cast %387 : i32 to index
    %c128_195 = arith.constant 128 : index
    %389 = vector.load %arg13[%388, %c128_195] : memref<128x512xf32, #tpu.memory_space<vmem>>, vector<16x128xf32>
    %390 = arith.addf %385, %389 : vector<16x128xf32>
    %391 = arith.negf %390 : vector<16x128xf32>
    %392 = math.exp %391 : vector<16x128xf32>
    %cst_196 = arith.constant 1.000000e+00 : f32
    %393 = vector.broadcast %cst_196 : f32 to vector<16x128xf32>
    %394 = arith.addf %393, %392 : vector<16x128xf32>
    %395 = arith.divf %393, %394 : vector<16x128xf32>
    %c2_197 = arith.constant 2 : index
    %c0_198 = arith.constant 0 : index
    %c0_199 = arith.constant 0 : index
    %396 = vector.load %arg12[%c2_197, %c0_198, %c0_199] : memref<4x128x128xbf16, #tpu.memory_space<vmem>>, vector<1x128x128xbf16>
    %397 = vector.shape_cast %396 : vector<1x128x128xbf16> to vector<128x128xbf16>
    %cst_200 = arith.constant dense<0.000000e+00> : vector<16x128xf32>
    %398 = tpu.matmul %369, %397, %cst_200 {dimension_numbers = #tpu.dot_dimension_numbers<[1], [0], [0], [1], [0, 0, 1, 1], [], []>} : vector<16x128xbf16>, vector<128x128xbf16>, vector<16x128xf32> -> vector<16x128xf32>
    %c16_i32_201 = arith.constant 16 : i32
    %399 = arith.muli %c6_i32, %c16_i32_201 : i32
    %400 = tpu.assume_multiple %399, 16 : i32
    %401 = arith.index_cast %400 : i32 to index
    %c256_202 = arith.constant 256 : index
    %402 = vector.load %arg13[%401, %c256_202] : memref<128x512xf32, #tpu.memory_space<vmem>>, vector<16x128xf32>
    %403 = arith.addf %398, %402 : vector<16x128xf32>
    %404 = math.tanh %403 : vector<16x128xf32>
    %c3_203 = arith.constant 3 : index
    %c0_204 = arith.constant 0 : index
    %c0_205 = arith.constant 0 : index
    %405 = vector.load %arg12[%c3_203, %c0_204, %c0_205] : memref<4x128x128xbf16, #tpu.memory_space<vmem>>, vector<1x128x128xbf16>
    %406 = vector.shape_cast %405 : vector<1x128x128xbf16> to vector<128x128xbf16>
    %cst_206 = arith.constant dense<0.000000e+00> : vector<16x128xf32>
    %407 = tpu.matmul %369, %406, %cst_206 {dimension_numbers = #tpu.dot_dimension_numbers<[1], [0], [0], [1], [0, 0, 1, 1], [], []>} : vector<16x128xbf16>, vector<128x128xbf16>, vector<16x128xf32> -> vector<16x128xf32>
    %c16_i32_207 = arith.constant 16 : i32
    %408 = arith.muli %c6_i32, %c16_i32_207 : i32
    %409 = tpu.assume_multiple %408, 16 : i32
    %410 = arith.index_cast %409 : i32 to index
    %c384_208 = arith.constant 384 : index
    %411 = vector.load %arg13[%410, %c384_208] : memref<128x512xf32, #tpu.memory_space<vmem>>, vector<16x128xf32>
    %412 = arith.addf %407, %411 : vector<16x128xf32>
    %413 = arith.negf %412 : vector<16x128xf32>
    %414 = math.exp %413 : vector<16x128xf32>
    %cst_209 = arith.constant 1.000000e+00 : f32
    %415 = vector.broadcast %cst_209 : f32 to vector<16x128xf32>
    %416 = arith.addf %415, %414 : vector<16x128xf32>
    %417 = arith.divf %415, %416 : vector<16x128xf32>
    %418 = arith.mulf %395, %361 : vector<16x128xf32>
    %419 = arith.mulf %382, %404 : vector<16x128xf32>
    %420 = arith.addf %418, %419 : vector<16x128xf32>
    %421 = math.tanh %420 : vector<16x128xf32>
    %422 = arith.mulf %417, %421 : vector<16x128xf32>
    %423 = arith.truncf %422 : vector<16x128xf32> to vector<16x128xbf16>
    %424 = arith.index_cast %c6_i32 : i32 to index
    %c0_210 = arith.constant 0 : index
    %c0_211 = arith.constant 0 : index
    %425 = vector.load %arg8[%424, %c0_210, %c0_211] : memref<8x16x128xbf16, #tpu.memory_space<vmem>>, vector<1x16x128xbf16>
    %426 = vector.shape_cast %425 : vector<1x16x128xbf16> to vector<16x128xbf16>
    %427 = vector.shape_cast %423 : vector<16x128xbf16> to vector<1x16x128xbf16>
    tpu.vector_store %arg8[%424, %c0_210, %c0_211], %427 {strides = array<i32>} : memref<8x16x128xbf16, #tpu.memory_space<vmem>>, vector<1x16x128xbf16>,
    %428 = arith.truncf %422 : vector<16x128xf32> to vector<16x128xbf16>
    %c7_i32 = arith.constant 7 : i32
    %c0_212 = arith.constant 0 : index
    %c0_213 = arith.constant 0 : index
    %c0_214 = arith.constant 0 : index
    %429 = vector.load %arg12[%c0_212, %c0_213, %c0_214] : memref<4x128x128xbf16, #tpu.memory_space<vmem>>, vector<1x128x128xbf16>
    %430 = vector.shape_cast %429 : vector<1x128x128xbf16> to vector<128x128xbf16>
    %cst_215 = arith.constant dense<0.000000e+00> : vector<16x128xf32>
    %431 = tpu.matmul %428, %430, %cst_215 {dimension_numbers = #tpu.dot_dimension_numbers<[1], [0], [0], [1], [0, 0, 1, 1], [], []>} : vector<16x128xbf16>, vector<128x128xbf16>, vector<16x128xf32> -> vector<16x128xf32>
    %c16_i32_216 = arith.constant 16 : i32
    %432 = arith.muli %c7_i32, %c16_i32_216 : i32
    %433 = tpu.assume_multiple %432, 16 : i32
    %434 = arith.index_cast %433 : i32 to index
    %c0_217 = arith.constant 0 : index
    %435 = vector.load %arg13[%434, %c0_217] : memref<128x512xf32, #tpu.memory_space<vmem>>, vector<16x128xf32>
    %436 = arith.addf %431, %435 : vector<16x128xf32>
    %437 = arith.negf %436 : vector<16x128xf32>
    %438 = math.exp %437 : vector<16x128xf32>
    %cst_218 = arith.constant 1.000000e+00 : f32
    %439 = vector.broadcast %cst_218 : f32 to vector<16x128xf32>
    %440 = arith.addf %439, %438 : vector<16x128xf32>
    %441 = arith.divf %439, %440 : vector<16x128xf32>
    %c1_219 = arith.constant 1 : index
    %c0_220 = arith.constant 0 : index
    %c0_221 = arith.constant 0 : index
    %442 = vector.load %arg12[%c1_219, %c0_220, %c0_221] : memref<4x128x128xbf16, #tpu.memory_space<vmem>>, vector<1x128x128xbf16>
    %443 = vector.shape_cast %442 : vector<1x128x128xbf16> to vector<128x128xbf16>
    %cst_222 = arith.constant dense<0.000000e+00> : vector<16x128xf32>
    %444 = tpu.matmul %428, %443, %cst_222 {dimension_numbers = #tpu.dot_dimension_numbers<[1], [0], [0], [1], [0, 0, 1, 1], [], []>} : vector<16x128xbf16>, vector<128x128xbf16>, vector<16x128xf32> -> vector<16x128xf32>
    %c16_i32_223 = arith.constant 16 : i32
    %445 = arith.muli %c7_i32, %c16_i32_223 : i32
    %446 = tpu.assume_multiple %445, 16 : i32
    %447 = arith.index_cast %446 : i32 to index
    %c128_224 = arith.constant 128 : index
    %448 = vector.load %arg13[%447, %c128_224] : memref<128x512xf32, #tpu.memory_space<vmem>>, vector<16x128xf32>
    %449 = arith.addf %444, %448 : vector<16x128xf32>
    %450 = arith.negf %449 : vector<16x128xf32>
    %451 = math.exp %450 : vector<16x128xf32>
    %cst_225 = arith.constant 1.000000e+00 : f32
    %452 = vector.broadcast %cst_225 : f32 to vector<16x128xf32>
    %453 = arith.addf %452, %451 : vector<16x128xf32>
    %454 = arith.divf %452, %453 : vector<16x128xf32>
    %c2_226 = arith.constant 2 : index
    %c0_227 = arith.constant 0 : index
    %c0_228 = arith.constant 0 : index
    %455 = vector.load %arg12[%c2_226, %c0_227, %c0_228] : memref<4x128x128xbf16, #tpu.memory_space<vmem>>, vector<1x128x128xbf16>
    %456 = vector.shape_cast %455 : vector<1x128x128xbf16> to vector<128x128xbf16>
    %cst_229 = arith.constant dense<0.000000e+00> : vector<16x128xf32>
    %457 = tpu.matmul %428, %456, %cst_229 {dimension_numbers = #tpu.dot_dimension_numbers<[1], [0], [0], [1], [0, 0, 1, 1], [], []>} : vector<16x128xbf16>, vector<128x128xbf16>, vector<16x128xf32> -> vector<16x128xf32>
    %c16_i32_230 = arith.constant 16 : i32
    %458 = arith.muli %c7_i32, %c16_i32_230 : i32
    %459 = tpu.assume_multiple %458, 16 : i32
    %460 = arith.index_cast %459 : i32 to index
    %c256_231 = arith.constant 256 : index
    %461 = vector.load %arg13[%460, %c256_231] : memref<128x512xf32, #tpu.memory_space<vmem>>, vector<16x128xf32>
    %462 = arith.addf %457, %461 : vector<16x128xf32>
    %463 = math.tanh %462 : vector<16x128xf32>
    %c3_232 = arith.constant 3 : index
    %c0_233 = arith.constant 0 : index
    %c0_234 = arith.constant 0 : index
    %464 = vector.load %arg12[%c3_232, %c0_233, %c0_234] : memref<4x128x128xbf16, #tpu.memory_space<vmem>>, vector<1x128x128xbf16>
    %465 = vector.shape_cast %464 : vector<1x128x128xbf16> to vector<128x128xbf16>
    %cst_235 = arith.constant dense<0.000000e+00> : vector<16x128xf32>
    %466 = tpu.matmul %428, %465, %cst_235 {dimension_numbers = #tpu.dot_dimension_numbers<[1], [0], [0], [1], [0, 0, 1, 1], [], []>} : vector<16x128xbf16>, vector<128x128xbf16>, vector<16x128xf32> -> vector<16x128xf32>
    %c16_i32_236 = arith.constant 16 : i32
    %467 = arith.muli %c7_i32, %c16_i32_236 : i32
    %468 = tpu.assume_multiple %467, 16 : i32
    %469 = arith.index_cast %468 : i32 to index
    %c384_237 = arith.constant 384 : index
    %470 = vector.load %arg13[%469, %c384_237] : memref<128x512xf32, #tpu.memory_space<vmem>>, vector<16x128xf32>
    %471 = arith.addf %466, %470 : vector<16x128xf32>
    %472 = arith.negf %471 : vector<16x128xf32>
    %473 = math.exp %472 : vector<16x128xf32>
    %cst_238 = arith.constant 1.000000e+00 : f32
    %474 = vector.broadcast %cst_238 : f32 to vector<16x128xf32>
    %475 = arith.addf %474, %473 : vector<16x128xf32>
    %476 = arith.divf %474, %475 : vector<16x128xf32>
    %477 = arith.mulf %454, %420 : vector<16x128xf32>
    %478 = arith.mulf %441, %463 : vector<16x128xf32>
    %479 = arith.addf %477, %478 : vector<16x128xf32>
    %480 = math.tanh %479 : vector<16x128xf32>
    %481 = arith.mulf %476, %480 : vector<16x128xf32>
    %482 = arith.truncf %481 : vector<16x128xf32> to vector<16x128xbf16>
    %483 = arith.index_cast %c7_i32 : i32 to index
    %c0_239 = arith.constant 0 : index
    %c0_240 = arith.constant 0 : index
    %484 = vector.load %arg8[%483, %c0_239, %c0_240] : memref<8x16x128xbf16, #tpu.memory_space<vmem>>, vector<1x16x128xbf16>
    %485 = vector.shape_cast %484 : vector<1x16x128xbf16> to vector<16x128xbf16>
    %486 = vector.shape_cast %482 : vector<16x128xbf16> to vector<1x16x128xbf16>
    tpu.vector_store %arg8[%483, %c0_239, %c0_240], %486 {strides = array<i32>} : memref<8x16x128xbf16, #tpu.memory_space<vmem>>, vector<1x16x128xbf16>,
    %487 = arith.truncf %481 : vector<16x128xf32> to vector<16x128xbf16>
    %c8_i32 = arith.constant 8 : i32
    %c0_241 = arith.constant 0 : index
    %c0_242 = arith.constant 0 : index
    %488 = vector.load %arg14[%c0_241, %c0_242] : memref<16x128xbf16, #tpu.memory_space<vmem>>, vector<16x128xbf16>
    tpu.vector_store %arg14[%c0_241, %c0_242], %487 {strides = array<i32>} : memref<16x128xbf16, #tpu.memory_space<vmem>>, vector<16x128xbf16>,
    %c0_243 = arith.constant 0 : index
    %c0_244 = arith.constant 0 : index
    %489 = vector.load %arg15[%c0_243, %c0_244] : memref<16x128xf32, #tpu.memory_space<vmem>>, vector<16x128xf32>
    tpu.vector_store %arg15[%c0_243, %c0_244], %479 {strides = array<i32>} : memref<16x128xf32, #tpu.memory_space<vmem>>, vector<16x128xf32>,
    %c0_i32_245 = arith.constant 0 : i32
    %490 = arith.cmpi eq, %arg1, %c0_i32_245 : i32
    %491 = arith.extui %490 : i1 to i32
    %c0_i32_246 = arith.constant 0 : i32
    %492 = arith.cmpi ne, %491, %c0_i32_246 : i32
    scf.if %492 {
      %493 = arith.extf %487 : vector<16x128xbf16> to vector<16x128xf32>
      %c0_247 = arith.constant 0 : index
      %c0_248 = arith.constant 0 : index
      %494 = vector.load %arg9[%c0_247, %c0_248] : memref<16x128xf32, #tpu.memory_space<vmem>>, vector<16x128xf32>
      tpu.vector_store %arg9[%c0_247, %c0_248], %493 {strides = array<i32>} : memref<16x128xf32, #tpu.memory_space<vmem>>, vector<16x128xf32>,
      %c0_249 = arith.constant 0 : index
      %c0_250 = arith.constant 0 : index
      %495 = vector.load %arg10[%c0_249, %c0_250] : memref<16x128xf32, #tpu.memory_space<vmem>>, vector<16x128xf32>
      tpu.vector_store %arg10[%c0_249, %c0_250], %479 {strides = array<i32>} : memref<16x128xf32, #tpu.memory_space<vmem>>, vector<16x128xf32>,
    } else {
    }
    return
  }
  func.func @transform_0(%arg0: i32, %arg1: i32) -> (i32, i32, i32) {
    %c0_i32 = arith.constant 0 : i32
    %c0_i32_0 = arith.constant 0 : i32
    return %arg1, %arg0, %c0_i32 : i32, i32, i32
  }
  func.func @transform_1(%arg0: i32, %arg1: i32) -> (i32, i32) {
    %c0_i32 = arith.constant 0 : i32
    %c0_i32_0 = arith.constant 0 : i32
    %c0_i32_1 = arith.constant 0 : i32
    return %c0_i32, %c0_i32_0 : i32, i32
  }
  func.func @transform_4(%arg0: i32, %arg1: i32) -> (i32, i32) {
    %c0_i32 = arith.constant 0 : i32
    %c0_i32_0 = arith.constant 0 : i32
    return %arg0, %c0_i32 : i32, i32
  }
  func.func @transform_5(%arg0: i32, %arg1: i32) -> (i32, i32) {
    %c0_i32 = arith.constant 0 : i32
    %c0_i32_0 = arith.constant 0 : i32
    return %arg0, %c0_i32 : i32, i32
  }
  func.func @transform_6(%arg0: i32, %arg1: i32) -> (i32, i32, i32) {
    %c0_i32 = arith.constant 0 : i32
    %c0_i32_0 = arith.constant 0 : i32
    return %arg1, %arg0, %c0_i32 : i32, i32, i32
  }
  func.func @transform_7(%arg0: i32, %arg1: i32) -> (i32, i32) {
    %c0_i32 = arith.constant 0 : i32
    %c0_i32_0 = arith.constant 0 : i32
    return %arg0, %c0_i32 : i32, i32
  }
  func.func @transform_8(%arg0: i32, %arg1: i32) -> (i32, i32) {
    %c0_i32 = arith.constant 0 : i32
    %c0_i32_0 = arith.constant 0 : i32
    return %arg0, %c0_i32 : i32, i32
  }
}

</mosaic_0001>

<bundles_post_ra>
// kernel: tpu_custom_call.1
= control target key start
LH: loop header
LB: loop body
LE: loop exit
PB: predicated region body
PF: predicated region fallthrough
CT: control target
= control target key end

     0   :  { %14 = vsyncpa [#allocation8], 0  ;;  %s7237_s0 = inlined_call_operand.hbm [shape: bf16[8,16,16], index: 0, kind: input, shape index: {}]   ;;  %s7238_s1 = inlined_call_operand.hbm [shape: f32[1,512], index: 1, kind: input, shape index: {}]   ;;  %s7239_s2 = inlined_call_operand.hbm [shape: bf16[16,512], index: 2, kind: input, shape index: {}]   ;;  %s7240_s3 = inlined_call_operand.hbm [shape: bf16[4,128,128], index: 3, kind: input, shape index: {}]   ;;  %s7241_s4 = inlined_call_operand.hbm [shape: f32[16,128], index: 4, kind: input, shape index: {}]   ;;  %s7242_s5 = inlined_call_operand.hbm [shape: f32[16,128], index: 5, kind: input, shape index: {}]   ;;  %s7243_s6 = inlined_call_operand.hbm [shape: bf16[8,16,128], index: 6, kind: output, shape index: {0}]   ;;  %s7244_s7 = inlined_call_operand.hbm [shape: f32[16,128], index: 7, kind: output, shape index: {1}]   ;;  %s7245_s8 = inlined_call_operand.hbm [shape: f32[16,128], index: 8, kind: output, shape index: {2}]  }
   0x1   :  { %15 = vsyncpa [#allocation11], 0 }
   0x2   :  { %16 = vsyncpa [#allocation14], 0 }
   0x3   :  { %17 = vsyncpa [#allocation9], 0  ;;  %s37_s29 = sshll.u32 %s7238_s1, 4  ;;  %s38_s29 = int_to_ptr.hbm [resolvable:$true] %s37_s29 }
   0x4   :  { %18 = vsyncpa [#allocation17], 0  ;;  %s6249_s30 = smov [#allocation10]   ;;  %s23_s12 = sshll.u32 %s7237_s0, 4  ;;  %s24_s12 = int_to_ptr.hbm [resolvable:$true] %s23_s12 }
   0x5   :  { %s39_s9 = sshll.u32 %s6249_s30, 4  ;;  %s6250_s13 = smov [#allocation7]   ;;  %s40_s9 = int_to_ptr.vmem [resolvable:$true] %s39_s9 }
   0x6   :  { %42 = dma.hbm_to_vmem [thread:$0]  %s38_s29, 64, %s40_s9, [#allocation11]  }
   0x7   :  { %s25_s14 = sshll.u32 %s6250_s13, 4  ;;  %s6251_s15 = smov 64   ;;  %s26_s14 = int_to_ptr.vmem [resolvable:$true] %s25_s14 }
   0x8   :  { %s6252_s16 = smov 4   ;;  %s47_s18 = sshll.u32 %s7241_s4, 4  ;;  %s48_s18 = int_to_ptr.hbm [resolvable:$true] %s47_s18 }
   0x9   :  { %31 = dma.hbm_to_vmem [thread:$0]  %s24_s12, 1024, %s26_s14, [#allocation8], %s6251_s15, %s6251_s15, %s6252_s16  }
   0xa   :  { %s6253_s19 = smov [#allocation12]   ;;  %s60_s22 = sshll.u32 %s7242_s5, 4  ;;  %s61_s22 = int_to_ptr.hbm [resolvable:$true] %s60_s22 }
   0xb   :  { %s49_s20 = sshll.u32 %s6253_s19, 4  ;;  %s6254_s23 = smov 128   ;;  %s50_s20 = int_to_ptr.vmem [resolvable:$true] %s49_s20 }
   0xc   :  { %s6255_s24 = smov 8   ;;  %s6256_s25 = smov [#allocation13]  }
   0xd   :  { %55 = dma.hbm_to_vmem [thread:$0]  %s48_s18, 256, %s50_s20, [#allocation11], %s6254_s23, %s6254_s23, %s6255_s24  }
   0xe   :  { %s62_s26 = sshll.u32 %s6256_s25, 4  ;;  %s63_s26 = int_to_ptr.vmem [resolvable:$true] %s62_s26 }
   0xf   :  { %68 = dma.hbm_to_vmem [thread:$0]  %s61_s22, 256, %s63_s26, [#allocation14], %s6254_s23, %s6254_s23, %s6255_s24  }
  0x10   :  { %6235 = dma.done.wait [#allocation8], 1024  }
  0x11   :  { %6236 = vsyncadd [#allocation8], 4294966272 }
  0x12   :  { %6237 = dma.done.wait [#allocation11], 320  }
  0x13   :  { %6238 = vsyncadd [#allocation11], 4294966976 }
  0x14   :  { %6239 = dma.done.wait [#allocation14], 256  }
  0x15   :  { %6240 = vsyncadd [#allocation14], 4294967040 }
  0x16   :  { %s97_s27 = sshll.u32 %s7239_s2, 4  ;;  %s6257_s28 = smov [#allocation2]   ;;  %s98_s27 = int_to_ptr.hbm [resolvable:$true] %s97_s27 }
  0x17   :  { %s99_s29 = sshll.u32 %s6257_s28, 4  ;;  %s100_s29 = int_to_ptr.vmem [resolvable:$true] %s99_s29 }
  0x18   :  { %102 = dma.hbm_to_vmem [thread:$0]  %s98_s27, 512, %s100_s29, [#allocation19] }
  0x19   :  { %6241 = dma.done.wait [#allocation19], 512 }
  0x1a   :  { %6242 = vsyncadd [#allocation19], 4294966784 }
  0x1b   :  { %s114_s10 = sshll.u32 %s7240_s3, 4  ;;  %s6258_s11 = smov [#allocation3]   ;;  %s115_s10 = int_to_ptr.hbm [resolvable:$true] %s114_s10 }
  0x1c   :  { %s116_s12 = sshll.u32 %s6258_s11, 4  ;;  %s117_s12 = int_to_ptr.vmem [resolvable:$true] %s116_s12 }
  0x1d   :  { %119 = dma.hbm_to_vmem [thread:$0]  %s115_s10, 4096, %s117_s12, [#allocation24] }
  0x1e   :  { %6243 = dma.done.wait [#allocation24], 4096 }
  0x1f   :  { %6244 = vsyncadd [#allocation24], 4294963200  ;;  %v4309_v0 = vld [vmem:[#allocation2] sm:$0xf]  ;;  %v5441_v1 = vld [vmem:[#allocation2 + $0xc] sm:$0xf0] }
  0x20   :  { %v5439_v2 = vld [vmem:[#allocation2 + $0x4] sm:$0xf]  ;;  %v4310_v3 = vor.u32 %v5441_v1, %v4309_v0  ;;  %v4311_v4 = vld [vmem:[#allocation2 + $0x10] sm:$0xf0]  ;;  %v4317_v5 = vld [vmem:[#allocation2 + $0x8] sm:$0xf] }
  0x21   :  { %v5442_v6 = vld [vmem:[#allocation2 + $0x14] sm:$0xf0]  ;;  %v4314_v7 = vor.u32 %v5439_v2, %v4311_v4  ;;  %v5440_v9 = vld [vmem:[#allocation2 + $0xc] sm:$0xf]  ;;  %v4319_v10 = vld [vmem:[#allocation2 + $0x18] sm:$0xf0] }
  0x22   :  { %v4318_v8 = vor.u32 %v5442_v6, %v4317_v5  ;;  %v5431_v11 = vld [vmem:[#allocation7] sm:$0xff]  ;;  %247 = vmatpush.bf16.msra.mxu0 %v4310_v3  ;;  %v4322_v12 = vor.u32 %v5440_v9, %v4319_v10  ;;  %vm215_vm0 = vcmask 130048   ;;  %v5451_v13 = vld [vmem:[#allocation3 + $0x38] sm:$0xff]  ;;  %v5450_v17 = vld [vmem:[#allocation3 + $0x30] sm:$0xff]  ;;  %s6259_s2 = smov [#allocation15]   ;;  %s4218_s1 = sshll.u32 %s7243_s6, 4  ;;  %s4219_s1 = int_to_ptr.hbm [resolvable:$true] %s4218_s1 }
  0x23   :  { %v5459_v14 = vld [vmem:[#allocation3 + $0x78] sm:$0xff]  ;;  %296 = vmatpush.bf16.msra.mxu1 %v4314_v7  ;;  %v5458_v18 = vld [vmem:[#allocation3 + $0x70] sm:$0xff]  ;;  %v5449_v21 = vld [vmem:[#allocation3 + $0x28] sm:$0xff]  ;;  %s4216_s3 = sshll.u32 %s6259_s2, 4  ;;  %s6260_s17 = smov [#allocation16]   ;;  %s4217_s3 = int_to_ptr.vmem [resolvable:$true] %s4216_s3 }
  0x24   :  { %345 = vmatpush.bf16.msra.mxu2 %v4318_v8  ;;  %v5467_v15 = vld [vmem:[#allocation3 + $0xb8] sm:$0xff]  ;;  %394 = vmatpush.bf16.msra.mxu3 %v4322_v12  ;;  %v5466_v19 = vld [vmem:[#allocation3 + $0xb0] sm:$0xff]  ;;  %v5457_v22 = vld [vmem:[#allocation3 + $0x68] sm:$0xff]  ;;  %s4229_s18 = sshll.u32 %s6260_s17, 4  ;;  %s4231_s0 = sshll.u32 %s7244_s7, 4  ;;  %s4230_s18 = int_to_ptr.vmem [resolvable:$true] %s4229_s18  ;;  %s4232_s0 = int_to_ptr.hbm [resolvable:$true] %s4231_s0 }
  0x25   :  { %v5475_v16 = vld [vmem:[#allocation3 + $0xf8] sm:$0xff]  ;;  %4323 = vmatmul.msk.bf16.vlgmr.msra.gmra.mxu0 %vm215_vm0, %v5431_v11  ;;  %v5474_v20 = vld [vmem:[#allocation3 + $0xf0] sm:$0xff]  ;;  %v5465_v23 = vld [vmem:[#allocation3 + $0xa8] sm:$0xff]  ;;  %s6261_s21 = smov [#allocation18]   ;;  %s4244_s4 = sshll.u32 %s7245_s8, 4  ;;  %s4245_s4 = int_to_ptr.hbm [resolvable:$true] %s4244_s4 }
  0x26   :  { %592 = vmatpush.bf16.msrb.mxu0 %v5451_v13  ;;  %4331 = vmatmul.msk.bf16.vlgmr.msra.gmra.mxu1 %vm215_vm0, %v5431_v11  ;;  %v5473_v24 = vld [vmem:[#allocation3 + $0xe8] sm:$0xff]  ;;  %v5432_v25 = vld [vmem:[#allocation7 + $0x8] sm:$0xff]  ;;  %v5448_v26 = vld [vmem:[#allocation3 + $0x20] sm:$0xff]  ;;  %s4242_s22 = sshll.u32 %s6261_s21, 4  ;;  %s4243_s22 = int_to_ptr.vmem [resolvable:$true] %s4242_s22 }
  0x27   :  { %711 = vmatpush.bf16.msrb.mxu1 %v5459_v14  ;;  %4339 = vmatmul.msk.bf16.vlgmr.msra.gmra.mxu2 %vm215_vm0, %v5431_v11  ;;  %v5456_v27 = vld [vmem:[#allocation3 + $0x60] sm:$0xff]  ;;  %v5433_v30 = vld [vmem:[#allocation7 + $0x10] sm:$0xff]  ;;  %v5446_v36 = vld [vmem:[#allocation3 + $0x10] sm:$0xff] }
  0x28   :  { %4347 = vmatmul.msk.bf16.vlgmr.msra.gmra.mxu3 %vm215_vm0, %v5431_v11  ;;  %830 = vmatpush.bf16.msrb.mxu2 %v5467_v15  ;;  %v5472_v28 = vld [vmem:[#allocation3 + $0xe0] sm:$0xff]  ;;  %v5447_v31 = vld [vmem:[#allocation3 + $0x18] sm:$0xff]  ;;  %v5454_v37 = vld [vmem:[#allocation3 + $0x50] sm:$0xff] }
  0x29   :  { %913 = vmatpush.bf16.msrb.mxu3 %v5475_v16  ;;  %v5464_v29 = vld [vmem:[#allocation3 + $0xa0] sm:$0xff]  ;;  %v5455_v32 = vld [vmem:[#allocation3 + $0x58] sm:$0xff]  ;;  %v5470_v38 = vld [vmem:[#allocation3 + $0xd0] sm:$0xff] }
  0x2a   :  { %593 = vmatpush.bf16.msrb.mxu0 %v5450_v17  ;;  %v5471_v33 = vld [vmem:[#allocation3 + $0xd8] sm:$0xff]  ;;  %v5434_v35 = vld [vmem:[#allocation7 + $0x18] sm:$0xff]  ;;  %v5462_v39 = vld [vmem:[#allocation3 + $0x90] sm:$0xff] }
  0x2b   :  { %712 = vmatpush.bf16.msrb.mxu1 %v5458_v18  ;;  %v5463_v34 = vld [vmem:[#allocation3 + $0x98] sm:$0xff]  ;;  %v5435_v40 = vld [vmem:[#allocation7 + $0x20] sm:$0xff]  ;;  %v5436_v45 = vld [vmem:[#allocation7 + $0x28] sm:$0xff] }
  0x2c   :  { %831 = vmatpush.bf16.msrb.mxu2 %v5466_v19  ;;  %v5445_v41 = vld [vmem:[#allocation3 + $0x8] sm:$0xff]  ;;  %v5444_v46 = vld [vmem:[#allocation3] sm:$0xff]  ;;  %v504_v50 = vld [vmem:[#allocation12 + $0x8] sm:$0xff] }
  0x2d   :  { %914 = vmatpush.bf16.msrb.mxu3 %v5474_v20  ;;  %v5453_v42 = vld [vmem:[#allocation3 + $0x48] sm:$0xff]  ;;  %v5452_v47 = vld [vmem:[#allocation3 + $0x40] sm:$0xff]  ;;  %v5437_v52 = vld [vmem:[#allocation7 + $0x30] sm:$0xff] }
  0x2e   :  { %594 = vmatpush.bf16.msrb.mxu0 %v5449_v21  ;;  %v5469_v43 = vld [vmem:[#allocation3 + $0xc8] sm:$0xff]  ;;  %v5468_v48 = vld [vmem:[#allocation3 + $0xc0] sm:$0xff] }
  0x2f   :  { %713 = vmatpush.bf16.msrb.mxu1 %v5457_v22  ;;  %v5461_v44 = vld [vmem:[#allocation3 + $0x88] sm:$0xff]  ;;  %v5460_v53 = vld [vmem:[#allocation3 + $0x80] sm:$0xff] }
  0x30   :  { %832 = vmatpush.bf16.msrb.mxu2 %v5465_v23  ;;  %v503_v49 = vld [vmem:[#allocation12] sm:$0xff]  ;;  %v5438_v54 = vld [vmem:[#allocation7 + $0x38] sm:$0xff] }
  0x31   :  { %915 = vmatpush.bf16.msrb.mxu3 %v5473_v24  ;;  %v5703_v51 = vpack.c.bf16 %v504_v50, %v503_v49  ;;  %v145_v50 = vld [vmem:[#allocation10] sm:$0xf] }
  0x32   :  { %595 = vmatpush.bf16.msrb.mxu0 %v5448_v26 }
  0x33   :  { %714 = vmatpush.bf16.msrb.mxu1 %v5456_v27  ;;  %5704 = vst [vmem:[#allocation5] sm:$0xff] %v5703_v51  }
  0x34   :  { %833 = vmatpush.bf16.msrb.mxu2 %v5464_v29 }
  0x35   :  { %4324 = vmatmul.msk.bf16.gmra.mxu0 %vm215_vm0, %v5432_v25  ;;  %916 = vmatpush.bf16.msrb.mxu3 %v5472_v28 }
  0x36   :  { %4332 = vmatmul.msk.bf16.gmra.mxu1 %vm215_vm0, %v5432_v25  ;;  %596 = vmatpush.bf16.msrb.mxu0 %v5447_v31 }
  0x37   :  { %4340 = vmatmul.msk.bf16.gmra.mxu2 %vm215_vm0, %v5432_v25  ;;  %715 = vmatpush.bf16.msrb.mxu1 %v5455_v32 }
  0x38   :  { %4348 = vmatmul.msk.bf16.gmra.mxu3 %vm215_vm0, %v5432_v25  ;;  %834 = vmatpush.bf16.msrb.mxu2 %v5463_v34 }
  0x39   :  { %917 = vmatpush.bf16.msrb.mxu3 %v5471_v33 }
  0x3a   :  { %597 = vmatpush.bf16.msrb.mxu0 %v5446_v36  ;;  %v5443_v55 = vld [vmem:[#allocation5] sm:$0xff] }
  0x3b   :  { %716 = vmatpush.bf16.msrb.mxu1 %v5454_v37 }
  0x3c   :  { %835 = vmatpush.bf16.msrb.mxu2 %v5462_v39 }
  0x3d   :  { %918 = vmatpush.bf16.msrb.mxu3 %v5470_v38 }
  0x3e   :  { %598 = vmatpush.bf16.msrb.mxu0 %v5445_v41 }
  0x3f   :  { %717 = vmatpush.bf16.msrb.mxu1 %v5453_v42 }
  0x40   :  { %836 = vmatpush.bf16.msrb.mxu2 %v5461_v44 }
  0x41   :  { %919 = vmatpush.bf16.msrb.mxu3 %v5469_v43 }
  0x42   :  { %599 = vmatpush.bf16.msrb.mxu0 %v5444_v46 }
  0x43   :  { %718 = vmatpush.bf16.msrb.mxu1 %v5452_v47 }
  0x44   :  { %837 = vmatpush.bf16.msrb.mxu2 %v5460_v53 }
  0x45   :  { %4325 = vmatmul.msk.bf16.gmra.mxu0 %vm215_vm0, %v5433_v30  ;;  %920 = vmatpush.bf16.msrb.mxu3 %v5468_v48 }
  0x46   :  { %4333 = vmatmul.msk.bf16.gmra.mxu1 %vm215_vm0, %v5433_v30 }
  0x47   :  { %4341 = vmatmul.msk.bf16.gmra.mxu2 %vm215_vm0, %v5433_v30 }
  0x48   :  { %4349 = vmatmul.msk.bf16.gmra.mxu3 %vm215_vm0, %v5433_v30 }
  0x55   :  { %4326 = vmatmul.msk.bf16.gmra.mxu0 %vm215_vm0, %v5434_v35 }
  0x56   :  { %4334 = vmatmul.msk.bf16.gmra.mxu1 %vm215_vm0, %v5434_v35 }
  0x57   :  { %4342 = vmatmul.msk.bf16.gmra.mxu2 %vm215_vm0, %v5434_v35 }
  0x58   :  { %4350 = vmatmul.msk.bf16.gmra.mxu3 %vm215_vm0, %v5434_v35 }
  0x65   :  { %4327 = vmatmul.msk.bf16.gmra.mxu0 %vm215_vm0, %v5435_v40 }
  0x66   :  { %4335 = vmatmul.msk.bf16.gmra.mxu1 %vm215_vm0, %v5435_v40 }
  0x67   :  { %4343 = vmatmul.msk.bf16.gmra.mxu2 %vm215_vm0, %v5435_v40 }
  0x68   :  { %4351 = vmatmul.msk.bf16.gmra.mxu3 %vm215_vm0, %v5435_v40 }
  0x75   :  { %4328 = vmatmul.msk.bf16.gmra.mxu0 %vm215_vm0, %v5436_v45 }
  0x76   :  { %4336 = vmatmul.msk.bf16.gmra.mxu1 %vm215_vm0, %v5436_v45 }
  0x77   :  { %4344 = vmatmul.msk.bf16.gmra.mxu2 %vm215_vm0, %v5436_v45 }
  0x78   :  { %4352 = vmatmul.msk.bf16.gmra.mxu3 %vm215_vm0, %v5436_v45 }
  0x85   :  { %4329 = vmatmul.msk.bf16.gmra.mxu0 %vm215_vm0, %v5437_v52 }
  0x86   :  { %4337 = vmatmul.msk.bf16.gmra.mxu1 %vm215_vm0, %v5437_v52 }
  0x87   :  { %4345 = vmatmul.msk.bf16.gmra.mxu2 %vm215_vm0, %v5437_v52 }
  0x88   :  { %4353 = vmatmul.msk.bf16.gmra.mxu3 %vm215_vm0, %v5437_v52 }
  0x95   :  { %4330 = vmatmul.msk.bf16.gmra.mxu0 %vm215_vm0, %v5438_v54 }
  0x96   :  { %4338 = vmatmul.msk.bf16.gmra.mxu1 %vm215_vm0, %v5438_v54 }
  0x97   :  { %4346 = vmatmul.msk.bf16.gmra.mxu2 %vm215_vm0, %v5438_v54 }
  0x98   :  { %4354 = vmatmul.msk.bf16.gmra.mxu3 %vm215_vm0, %v5438_v54  ;;  %v6488_v54 = vperm.slane %v145_v50, 0 }
  0xa2   :  { %v6366_v56 = vpop.f32.mrf.mxu0 }
  0xa3   :  { %v6368_v57 = vpop.f32.mrf.mxu1 }
  0xa5   :  { %600 = vmatmul.bf16.vlgmr.msrb.gmra.mxu0 %v5443_v55 }
  0xa6   :  { %719 = vmatmul.bf16.vlgmr.msrb.gmra.mxu1 %v5443_v55 }
  0xa7   :  { %838 = vmatmul.bf16.vlgmr.msrb.gmra.mxu2 %v5443_v55 }
  0xa8   :  { %921 = vmatmul.bf16.vlgmr.msrb.gmra.mxu3 %v5443_v55  ;;  %v6490_v55 = vperm.slane %v145_v50, 1 }
  0xaa   :  { %v6370_v58 = vpop.f32.mrf.mxu2  ;;  %v6374_v60 = vpop.f32.mrf.mxu0 }
  0xab   :  { %v6372_v59 = vpop.f32.mrf.mxu3  ;;  %v6376_v61 = vpop.f32.mrf.mxu1 }
  0xb2   :  { %v6378_v62 = vpop.f32.mrf.mxu2  ;;  %v6382_v0 = vpop.f32.mrf.mxu0 }
  0xb3   :  { %v6380_v63 = vpop.f32.mrf.mxu3  ;;  %v6384_v1 = vpop.f32.mrf.mxu1 }
  0xba   :  { %v6386_v2 = vpop.f32.mrf.mxu2  ;;  %v6390_v4 = vpop.f32.mrf.mxu0 }
  0xbb   :  { %v6388_v3 = vpop.f32.mrf.mxu3  ;;  %v6392_v5 = vpop.f32.mrf.mxu1 }
  0xc2   :  { %v6394_v6 = vpop.f32.mrf.mxu2  ;;  %v6398_v8 = vpop.f32.mrf.mxu0 }
  0xc3   :  { %v6396_v7 = vpop.f32.mrf.mxu3  ;;  %v6400_v9 = vpop.f32.mrf.mxu1 }
  0xca   :  { %v6402_v10 = vpop.f32.mrf.mxu2  ;;  %v6406_v12 = vpop.f32.mrf.mxu0 }
  0xcb   :  { %v6404_v11 = vpop.f32.mrf.mxu3  ;;  %v6408_v13 = vpop.f32.mrf.mxu1 }
  0xd2   :  { %v6410_v14 = vpop.f32.mrf.mxu2  ;;  %v6414_v16 = vpop.f32.mrf.mxu0 }
  0xd3   :  { %v6412_v15 = vpop.f32.mrf.mxu3  ;;  %v6416_v17 = vpop.f32.mrf.mxu1 }
  0xda   :  { %v6418_v18 = vpop.f32.mrf.mxu2  ;;  %v6422_v20 = vpop.f32.mrf.mxu0 }
  0xdb   :  { %v6420_v19 = vpop.f32.mrf.mxu3  ;;  %v6424_v21 = vpop.f32.mrf.mxu1 }
  0xe2   :  { %v6426_v22 = vpop.f32.mrf.mxu2  ;;  %v6430_v24 = vpop.f32.mrf.mxu0 }
  0xe3   :  { %v6428_v23 = vpop.f32.mrf.mxu3  ;;  %v6432_v25 = vpop.f32.mrf.mxu1 }
  0xea   :  { %v6434_v26 = vpop.f32.mrf.mxu2  ;;  %v6438_v28 = vpop.f32.mrf.mxu0 }
  0xeb   :  { %7246 = vst [vmem:[#allocation34_spill] sm:$0xff] %v6434_v26  ;;  %v6436_v27 = vpop.f32.mrf.mxu3  ;;  %v6440_v29 = vpop.f32.mrf.mxu1 }
  0xf2   :  { %v6442_v30 = vpop.f32.mrf.mxu2  ;;  %v6446_v32 = vpop.f32.mrf.mxu0 }
  0xf3   :  { %7247 = vst [vmem:[#allocation35_spill] sm:$0xff] %v6442_v30  ;;  %v6444_v31 = vpop.f32.mrf.mxu3  ;;  %v6448_v33 = vpop.f32.mrf.mxu1 }
  0xf4   :  { %7248 = vst [vmem:[#allocation36_spill] sm:$0xff] %v6446_v32 }
  0xf5   :  { %7249 = vst [vmem:[#allocation37_spill] sm:$0xff] %v6448_v33 }
  0xfa   :  { %v6450_v34 = vpop.f32.mrf.mxu2  ;;  %v6454_v36 = vpop.f32.mrf.mxu0 }
  0xfb   :  { %7250 = vst [vmem:[#allocation38_spill] sm:$0xff] %v6450_v34  ;;  %v6452_v35 = vpop.f32.mrf.mxu3  ;;  %v6456_v37 = vpop.f32.mrf.mxu1  ;;  %v5498_v34 = vld [vmem:[#allocation3 + $0xb0] sm:$0xff] }
  0xfc   :  { %7251 = vst [vmem:[#allocation39_spill] sm:$0xff] %v6452_v35  ;;  %v6512_v35 = vperm.slane %v145_v50, 2 }
  0xfd   :  { %7252 = vst [vmem:[#allocation40_spill] sm:$0xff] %v6454_v36  ;;  %v5504_v36 = vld [vmem:[#allocation3 + $0xe0] sm:$0xff] }
  0xfe   :  { %7253 = vst [vmem:[#allocation41_spill] sm:$0xff] %v6456_v37  ;;  %v5506_v37 = vld [vmem:[#allocation3 + $0xf0] sm:$0xff] }
 0x102   :  { %v6458_v38 = vpop.f32.mrf.mxu2  ;;  %v6462_v40 = vpop.f32.mrf.mxu0 }
 0x103   :  { %7254 = vst [vmem:[#allocation42_spill] sm:$0xff] %v6458_v38  ;;  %v6460_v39 = vpop.f32.mrf.mxu3  ;;  %v6464_v41 = vpop.f32.mrf.mxu1  ;;  %v5490_v38 = vld [vmem:[#allocation3 + $0x70] sm:$0xff] }
 0x104   :  { %7255 = vst [vmem:[#allocation43_spill] sm:$0xff] %v6460_v39 }
 0x105   :  { %7256 = vst [vmem:[#allocation44_spill] sm:$0xff] %v6462_v40  ;;  %v5482_v40 = vld [vmem:[#allocation3 + $0x30] sm:$0xff] }
 0x106   :  { %7257 = vst [vmem:[#allocation45_spill] sm:$0xff] %v6464_v41 }
 0x10a   :  { %v6466_v42 = vpop.f32.mrf.mxu2  ;;  %v6470_v44 = vpop.f32.mrf.mxu0 }
 0x10b   :  { %7258 = vst [vmem:[#allocation46_spill] sm:$0xff] %v6466_v42  ;;  %v6468_v43 = vpop.f32.mrf.mxu3  ;;  %v6472_v45 = vpop.f32.mrf.mxu1 }
 0x10c   :  { %7259 = vst [vmem:[#allocation47_spill] sm:$0xff] %v6468_v43 }
 0x10d   :  { %7260 = vst [vmem:[#allocation48_spill] sm:$0xff] %v6470_v44  ;;  %v5507_v44 = vld [vmem:[#allocation3 + $0xf8] sm:$0xff] }
 0x10e   :  { %7261 = vst [vmem:[#allocation49_spill] sm:$0xff] %v6472_v45  ;;  %v5499_v45 = vld [vmem:[#allocation3 + $0xb8] sm:$0xff]  ;;  %1372 = vmatpush.bf16.msra.mxu3 %v5507_v44  ;;  %v252_v44 = vadd.f32 %v6374_v60, %v6488_v54  ;;  %v5480_v60 = vld [vmem:[#allocation3 + $0x20] sm:$0xff] }
 0x10f   :  { %1290 = vmatpush.bf16.msra.mxu2 %v5499_v45  ;;  %v5481_v45 = vld [vmem:[#allocation3 + $0x28] sm:$0xff] }
 0x112   :  { %v6476_v47 = vpop.f32.mrf.mxu0  ;;  %v6480_v49 = vpop.f32.mrf.mxu2  ;;  %1373 = vmatpush.bf16.msra.mxu3 %v5506_v37 }
 0x113   :  { %v6474_v46 = vpop.f32.mrf.mxu3  ;;  %7263 = vst [vmem:[#allocation51_spill] sm:$0xff] %v6476_v47  ;;  %v6478_v48 = vpop.f32.mrf.mxu1  ;;  %v250_v47 = vadd.f32 %v6366_v56, %v6488_v54  ;;  %1291 = vmatpush.bf16.msra.mxu2 %v5498_v34 }
 0x114   :  { %7262 = vst [vmem:[#allocation50_spill] sm:$0xff] %v6474_v46  ;;  %v5483_v46 = vld [vmem:[#allocation3 + $0x38] sm:$0xff] }
 0x115   :  { %7264 = vst [vmem:[#allocation52_spill] sm:$0xff] %v6478_v48  ;;  %v5491_v48 = vld [vmem:[#allocation3 + $0x78] sm:$0xff]  ;;  %1054 = vmatpush.bf16.msra.mxu0 %v5483_v46  ;;  %v5489_v46 = vld [vmem:[#allocation3 + $0x68] sm:$0xff] }
 0x116   :  { %7265 = vst [vmem:[#allocation53_spill] sm:$0xff] %v6480_v49  ;;  %v299_v49 = vadd.f32 %v6368_v57, %v6490_v55  ;;  %1172 = vmatpush.bf16.msra.mxu1 %v5491_v48 }
 0x119   :  { %1055 = vmatpush.bf16.msra.mxu0 %v5482_v40 }
 0x11a   :  { %v6484_v52 = vpop.f32.mrf.mxu0  ;;  %v6492_v42 = vpop.f32.mrf.mxu2  ;;  %1173 = vmatpush.bf16.msra.mxu1 %v5490_v38  ;;  %v5505_v38 = vld [vmem:[#allocation3 + $0xe8] sm:$0xff] }
 0x11b   :  { %v6482_v51 = vpop.f32.mrf.mxu3  ;;  %7267 = vst [vmem:[#allocation55_spill] sm:$0xff] %v6484_v52  ;;  %v6486_v53 = vpop.f32.mrf.mxu1  ;;  %1374 = vmatpush.bf16.msra.mxu3 %v5505_v38  ;;  %v348_v38 = vadd.f32 %v6370_v58, %v6512_v35 }
 0x11c   :  { %7266 = vst [vmem:[#allocation54_spill] sm:$0xff] %v6482_v51 }
 0x11d   :  { %7268 = vst [vmem:[#allocation56_spill] sm:$0xff] %v6486_v53  ;;  %1056 = vmatpush.bf16.msra.mxu0 %v5481_v45 }
 0x11e   :  { %7269 = vst [vmem:[#allocation57_spill] sm:$0xff] %v6492_v42  ;;  %v6500_v42 = vperm.slane %v145_v50, 3  ;;  %1174 = vmatpush.bf16.msra.mxu1 %v5489_v46  ;;  %v5479_v46 = vld [vmem:[#allocation3 + $0x18] sm:$0xff] }
 0x11f   :  { %1375 = vmatpush.bf16.msra.mxu3 %v5504_v36  ;;  %v5478_v36 = vld [vmem:[#allocation3 + $0x10] sm:$0xff] }
 0x120   :  { %v399_v45 = vadd.f32 %v6380_v63, %v6500_v42  ;;  %v5494_v63 = vld [vmem:[#allocation3 + $0x90] sm:$0xff] }
 0x121   :  { %1057 = vmatpush.bf16.msra.mxu0 %v5480_v60 }
 0x122   :  { %v601_v52 = vpop.f32.mrf.mxu0  ;;  %v6502_v57 = vpop.f32.mrf.mxu2 }
 0x123   :  { %v6498_v51 = vpop.f32.mrf.mxu3  ;;  %v602_v53 = vadd.f32 %v601_v52, %v250_v47  ;;  %v720_v43 = vpop.f32.mrf.mxu1  ;;  %7271 = vst [vmem:[#allocation59_spill] sm:$0xff] %v6502_v57  ;;  %v5497_v47 = vld [vmem:[#allocation3 + $0xa8] sm:$0xff] }
 0x124   :  { %7270 = vst [vmem:[#allocation58_spill] sm:$0xff] %v6498_v51  ;;  %v721_v41 = vadd.f32 %v720_v43, %v299_v49  ;;  %v397_v43 = vadd.f32 %v6372_v59, %v6500_v42  ;;  %1292 = vmatpush.bf16.msra.mxu2 %v5497_v47  ;;  %v5487_v47 = vld [vmem:[#allocation3 + $0x58] sm:$0xff] }
 0x125   :  { %v4391_v56 = vmul.f32 -1.442695, %v602_v53  ;;  %v5488_v53 = vld [vmem:[#allocation3 + $0x60] sm:$0xff]  ;;  %1058 = vmatpush.bf16.msra.mxu0 %v5479_v46  ;;  %v5493_v46 = vld [vmem:[#allocation3 + $0x88] sm:$0xff] }
 0x126   :  { %v4425_v39 = vmul.f32 -1.442695, %v721_v41  ;;  %v301_v41 = vadd.f32 %v6376_v61, %v6490_v55  ;;  %v5496_v61 = vld [vmem:[#allocation3 + $0xa0] sm:$0xff]  ;;  %1175 = vmatpush.bf16.msra.mxu1 %v5488_v53 }
 0x127   :  { %5763 = vpow2.f32 %v4391_v56 }
 0x128   :  { %5765 = vpow2.f32 %v4425_v39  ;;  %1293 = vmatpush.bf16.msra.mxu2 %v5496_v61  ;;  %v5485_v61 = vld [vmem:[#allocation3 + $0x48] sm:$0xff] }
 0x129   :  { %1059 = vmatpush.bf16.msra.mxu0 %v5478_v36 }
 0x12a   :  { %v603_v40 = vpop.f32.mrf.mxu0  ;;  %v839_v50 = vpop.f32.mrf.mxu2  ;;  %1176 = vmatpush.bf16.msra.mxu1 %v5487_v47  ;;  %v5501_v47 = vld [vmem:[#allocation3 + $0xc8] sm:$0xff] }
 0x12b   :  { %v922_v48 = vpop.f32.mrf.mxu3  ;;  %v604_v52 = vadd.f32 %v603_v40, %v252_v44  ;;  %v722_v39 = vpop.f32.mrf.mxu1  ;;  %v5503_v40 = vld [vmem:[#allocation3 + $0xd8] sm:$0xff] }
 0x12c   :  { %v923_v49 = vadd.f32 %v922_v48, %v397_v43  ;;  %v723_v34 = vadd.f32 %v722_v39, %v301_v41  ;;  %v5495_v41 = vld [vmem:[#allocation3 + $0x98] sm:$0xff]  ;;  %1376 = vmatpush.bf16.msra.mxu3 %v5503_v40  ;;  %v5502_v39 = vld [vmem:[#allocation3 + $0xd0] sm:$0xff] }
 0x12d   :  { %v5764_v59 = vpop.eup %5763  ;;  %v4392_v51 = vmul.f32 -1.442695, %v604_v52  ;;  %v5486_v52 = vld [vmem:[#allocation3 + $0x50] sm:$0xff]  ;;  %1294 = vmatpush.bf16.msra.mxu2 %v5495_v41 }
 0x12e   :  { %v4491_v37 = vmul.f32 -1.442695, %v923_v49  ;;  %v5766_v56 = vpop.eup %5765  ;;  %v6510_v57 = vadd.f32 1.0, %v5764_v59  ;;  %v4426_v44 = vmul.f32 -1.442695, %v723_v34  ;;  %v840_v59 = vadd.f32 %v839_v50, %v348_v38  ;;  %1177 = vmatpush.bf16.msra.mxu1 %v5486_v52 }
 0x12f   :  { %v6514_v43 = vadd.f32 1.0, %v5766_v56  ;;  %v5477_v56 = vld [vmem:[#allocation3 + $0x8] sm:$0xff] }
 0x130   :  { %5767 = vpow2.f32 %v4491_v37  ;;  %1377 = vmatpush.bf16.msra.mxu3 %v5502_v39  ;;  %v623_v38 = vand.u32 2147483647, %v6510_v57  ;;  %1060 = vmatpush.bf16.msra.mxu0 %v5477_v56  ;;  %v5484_v39 = vld [vmem:[#allocation3 + $0x40] sm:$0xff]  ;;  %vm619_vm3 = vweird.f32 %v6510_v57 }
 0x131   :  { %5769 = vrcp.f32 %v6510_v57  ;;  %1295 = vmatpush.bf16.msra.mxu2 %v5494_v63  ;;  %v744_v52 = vand.u32 2147483648, %v6514_v43  ;;  %v5476_v63 = vld [vmem:[#allocation3] sm:$0xff]  ;;  %vm738_vm4 = vweird.f32 %v6514_v43 }
 0x132   :  { %5771 = vrcp.f32 %v6514_v43  ;;  %1178 = vmatpush.bf16.msra.mxu1 %v5485_v61  ;;  %vm624_vm7 = vcmp.eq.f32.partialorder %v623_v38, 8.507059e+37 }
 0x133   :  { %5773 = vpow2.f32 %v4392_v51  ;;  %v924_v48 = vpop.f32.mrf.mxu3 }
 0x134   :  { %5775 = vpow2.f32 %v4426_v44  ;;  %v925_v49 = vadd.f32 %v924_v48, %v399_v45  ;;  %1378 = vmatpush.bf16.msra.mxu3 %v5501_v47  ;;  %v350_v47 = vadd.f32 %v6378_v62, %v6512_v35  ;;  %1061 = vmatpush.bf16.msra.mxu0 %v5476_v63 }
 0x135   :  { %1296 = vmatpush.bf16.msra.mxu2 %v5493_v46 }
 0x136   :  { %v5768_v34 = vpop.eup %5767  ;;  %v4492_v37 = vmul.f32 -1.442695, %v925_v49  ;;  %v625_v49 = vand.u32 2147483648, %v6510_v57  ;;  %1179 = vmatpush.bf16.msra.mxu1 %v5484_v39 }
 0x137   :  { %v5770_v60 = vpop.eup %5769  ;;  %v6522_v51 = vadd.f32 1.0, %v5768_v34 }
 0x138   :  { %v6524_v53 = vpop.eup %5771  ;;  %v615_v58 = vmul.f32 %v5770_v60, %v6510_v57  ;;  %5777 = vpow2.f32 %v4492_v37  ;;  %vm620_vm1 = vweird.f32 %v5770_v60  ;;  %v742_v37 = vand.u32 2147483647, %v6514_v43 }
 0x139   :  { %v5774_v44 = vpop.eup %5773  ;;  %v734_v45 = vmul.f32 %v6524_v53, %v6514_v43  ;;  %5779 = vrcp.f32 %v6522_v51  ;;  %vm739_vm2 = vweird.f32 %v6524_v53  ;;  %vm621_vm5 = vmor %vm619_vm3, %vm620_vm1  ;;  %v626_v61 = vor.u32 1.1754944e-38, %v625_v49 }
 0x13a   :  { %v5776_v41 = vpop.eup %5775  ;;  %v616_v50 = vsub.f32 1.0, %v615_v58  ;;  %5781 = vtanh.f32 %v840_v59  ;;  %v6530_v48 = vadd.f32 1.0, %v5774_v44  ;;  %v5492_v58 = vld [vmem:[#allocation3 + $0x80] sm:$0xff]  ;;  %vm740_vm6 = vmor %vm738_vm4, %vm739_vm2  ;;  %v745_v57 = vor.u32 1.1754944e-38, %v744_v52 }
 0x13b   :  { %v735_v40 = vsub.f32 1.0, %v734_v45  ;;  %v6534_v36 = vadd.f32 1.0, %v5776_v41  ;;  %v5500_v44 = vld [vmem:[#allocation3 + $0xc0] sm:$0xff]  ;;  %vm743_vm8 = vcmp.eq.f32.partialorder %v742_v37, 8.507059e+37  ;;  %1297 = vmatpush.bf16.msra.mxu2 %v5492_v58  ;;  %vm940_vm2 = vweird.f32 %v6522_v51 }
 0x13c   :  { %v617_v34 = vmul.f32 %v5770_v60, %v616_v50  ;;  %5783 = vrcp.f32 %v6530_v48  ;;  %1379 = vmatpush.bf16.msra.mxu3 %v5500_v44  ;;  %v640_v44 = vand.u32 2147483648, %v6530_v48  ;;  %vm634_vm11 = vweird.f32 %v6530_v48 }
 0x13d   :  { %v736_v59 = vmul.f32 %v6524_v53, %v735_v40  ;;  %5785 = vrcp.f32 %v6534_v36  ;;  %v841_v40 = vpop.f32.mrf.mxu2  ;;  %v759_v58 = vand.u32 2147483648, %v6534_v36  ;;  %vm753_vm12 = vweird.f32 %v6534_v36 }
 0x13e   :  { %v5778_v45 = vpop.eup %5777  ;;  %v618_v41 = vadd.f32 %v5770_v60, %v617_v34  ;;  %v509_v34 = vld [vmem:[#allocation13] sm:$0xff]  ;;  %v842_v26 = vadd.f32 %v841_v40, %v350_v47 }
 0x13f   :  { %v6543_v56 = vpop.eup %5779  ;;  %v737_v50 = vadd.f32 %v6524_v53, %v736_v59  ;;  %v6548_v33 = vadd.f32 1.0, %v5778_v45 }
 0x140   :  { %v5782_v46 = vpop.eup %5781  ;;  %v622_v32 = vsel %vm621_vm5, %v5770_v60, %v618_v41  ;;  %v936_v59 = vmul.f32 %v6543_v56, %v6522_v51  ;;  %vm941_vm14 = vweird.f32 %v6543_v56 }
 0x141   :  { %v627_v43 = vsel %vm624_vm7, %v626_v61, %v622_v32  ;;  %v741_v49 = vsel %vm740_vm6, %v6524_v53, %v737_v50  ;;  %5787 = vrcp.f32 %v6548_v33  ;;  %v638_v61 = vand.u32 2147483647, %v6530_v48  ;;  %vm942_vm3 = vmor %vm940_vm2, %vm941_vm14 }
 0x142   :  { %v5784_v45 = vpop.eup %5783  ;;  %v746_v62 = vsel %vm743_vm8, %v745_v57, %v741_v49  ;;  %v967_v30 = vmul.f32 %v5782_v46, %v627_v43  ;;  %v937_v53 = vsub.f32 1.0, %v936_v59  ;;  %5789 = vtanh.f32 %v842_v26  ;;  %v510_v49 = vld [vmem:[#allocation13 + $0x8] sm:$0xff] }
 0x143   :  { %v5786_v52 = vpop.eup %5785  ;;  %v965_v60 = vmul.f32 %v746_v62, %v509_v34  ;;  %v630_v38 = vmul.f32 %v5784_v45, %v6530_v48  ;;  %vm635_vm9 = vweird.f32 %v5784_v45  ;;  %v757_v46 = vand.u32 2147483647, %v6534_v36 }
 0x144   :  { %v749_v32 = vmul.f32 %v5786_v52, %v6534_v36  ;;  %vm754_vm10 = vweird.f32 %v5786_v52  ;;  %v760_v34 = vor.u32 1.1754944e-38, %v759_v58  ;;  %vm636_vm13 = vmor %vm634_vm11, %vm635_vm9  ;;  %v641_v26 = vor.u32 1.1754944e-38, %v640_v44 }
 0x145   :  { %v6560_v63 = vadd.f32 %v967_v30, %v965_v60  ;;  %v631_v39 = vsub.f32 1.0, %v630_v38  ;;  %v938_v30 = vmul.f32 %v6543_v56, %v937_v53  ;;  %vm755_vm15 = vmor %vm753_vm12, %vm754_vm10  ;;  %vm639_vm0 = vcmp.eq.f32.partialorder %v638_v61, 8.507059e+37 }
 0x146   :  { %v750_v37 = vsub.f32 1.0, %v749_v32  ;;  %vm758_vm1 = vcmp.eq.f32.partialorder %v757_v46, 8.507059e+37  ;;  %v961_v46 = vand.u32 2147483648, %v6548_v33  ;;  %vm955_vm5 = vweird.f32 %v6548_v33 }
 0x147   :  { %v632_v41 = vmul.f32 %v5784_v45, %v631_v39  ;;  %v5788_v50 = vpop.eup %5787  ;;  %5791 = vtanh.f32 %v6560_v63  ;;  %v939_v39 = vadd.f32 %v6543_v56, %v938_v30 }
 0x148   :  { %v751_v40 = vmul.f32 %v5786_v52, %v750_v37  ;;  %v951_v57 = vmul.f32 %v5788_v50, %v6548_v33  ;;  %v5790_v60 = vpop.eup %5789  ;;  %v946_v37 = vand.u32 2147483648, %v6522_v51  ;;  %vm956_vm4 = vweird.f32 %v5788_v50 }
 0x149   :  { %v633_v47 = vadd.f32 %v5784_v45, %v632_v41  ;;  %vm957_vm7 = vmor %vm955_vm5, %vm956_vm4 }
 0x14a   :  { %v752_v43 = vadd.f32 %v5786_v52, %v751_v40  ;;  %v952_v62 = vsub.f32 1.0, %v951_v57  ;;  %v947_v40 = vor.u32 1.1754944e-38, %v946_v37 }
 0x14b   :  { %v637_v59 = vsel %vm636_vm13, %v5784_v45, %v633_v47  ;;  %v944_v45 = vand.u32 2147483647, %v6522_v51  ;;  %v959_v51 = vand.u32 2147483647, %v6548_v33  ;;  %v5515_v33 = vld [vmem:[#allocation3 + $0x38] sm:$0xff] }
 0x14c   :  { %v642_v38 = vsel %vm639_vm0, %v641_v26, %v637_v59  ;;  %v756_v48 = vsel %vm755_vm15, %v5786_v52, %v752_v43  ;;  %v953_v36 = vmul.f32 %v5788_v50, %v952_v62  ;;  %v943_v52 = vsel %vm942_vm3, %v6543_v56, %v939_v39  ;;  %v5539_v39 = vld [vmem:[#allocation3 + $0xf8] sm:$0xff]  ;;  %1514 = vmatpush.bf16.msrb.mxu0 %v5515_v33  ;;  %v5520_v33 = vld [vmem:[#allocation3 + $0x60] sm:$0xff] }
 0x14d   :  { %v761_v32 = vsel %vm758_vm1, %v760_v34, %v756_v48  ;;  %v968_v53 = vmul.f32 %v5790_v60, %v642_v38  ;;  %v5792_v61 = vpop.eup %5791  ;;  %vm945_vm6 = vcmp.eq.f32.partialorder %v944_v45, 8.507059e+37  ;;  %v962_v34 = vor.u32 1.1754944e-38, %v961_v46  ;;  %1832 = vmatpush.bf16.msrb.mxu3 %v5539_v39 }
 0x14e   :  { %v966_v58 = vmul.f32 %v761_v32, %v510_v49  ;;  %v954_v41 = vadd.f32 %v5788_v50, %v953_v36  ;;  %v948_v30 = vsel %vm945_vm6, %v947_v40, %v943_v52  ;;  %vm960_vm8 = vcmp.eq.f32.partialorder %v959_v51, 8.507059e+37  ;;  %v5523_v32 = vld [vmem:[#allocation3 + $0x78] sm:$0xff]  ;;  %v5530_v40 = vld [vmem:[#allocation3 + $0xb0] sm:$0xff] }
 0x14f   :  { %v973_v57 = vmul.f32 %v5792_v61, %v948_v30  ;;  %v304_v36 = vadd.f32 %v6384_v1, %v6490_v55  ;;  %1632 = vmatpush.bf16.msrb.mxu1 %v5523_v32  ;;  %v5522_v61 = vld [vmem:[#allocation3 + $0x70] sm:$0xff]  ;;  %v5513_v1 = vld [vmem:[#allocation3 + $0x28] sm:$0xff]  ;;  %v5528_v32 = vld [vmem:[#allocation3 + $0xa0] sm:$0xff] }
 0x150   :  { %v6578_v44 = vadd.f32 %v968_v53, %v966_v58  ;;  %v958_v47 = vsel %vm957_vm7, %v5788_v50, %v954_v41  ;;  %v5531_v50 = vld [vmem:[#allocation3 + $0xb8] sm:$0xff]  ;;  %v255_v53 = vadd.f32 %v6382_v0, %v6488_v54  ;;  %v5514_v41 = vld [vmem:[#allocation3 + $0x30] sm:$0xff]  ;;  %v402_v0 = vadd.f32 %v6388_v3, %v6500_v42 }
 0x151   :  { %v963_v56 = vsel %vm960_vm8, %v962_v34, %v958_v47  ;;  %v975_v49 = vpack.c.bf16 %v973_v57, %v973_v57  ;;  %1750 = vmatpush.bf16.msrb.mxu2 %v5531_v50  ;;  %v5538_v30 = vld [vmem:[#allocation3 + $0xf0] sm:$0xff]  ;;  %1515 = vmatpush.bf16.msrb.mxu0 %v5514_v41  ;;  %v5521_v47 = vld [vmem:[#allocation3 + $0x68] sm:$0xff]  ;;  %v257_v34 = vadd.f32 %v6390_v4, %v6488_v54  ;;  %v5527_v41 = vld [vmem:[#allocation3 + $0x98] sm:$0xff] }
 0x152   :  { %5793 = vtanh.f32 %v6578_v44  ;;  %1833 = vmatpush.bf16.msrb.mxu3 %v5538_v30  ;;  %v5518_v30 = vld [vmem:[#allocation3 + $0x50] sm:$0xff] }
 0x153   :  { %v1002_v60 = vunpack.c.l.b16 %v975_v49  ;;  %1633 = vmatpush.bf16.msrb.mxu1 %v5522_v61  ;;  %v404_v61 = vadd.f32 %v6396_v7, %v6500_v42 }
 0x155   :  { %1751 = vmatpush.bf16.msrb.mxu2 %v5530_v40  ;;  %1516 = vmatpush.bf16.msrb.mxu0 %v5513_v1 }
 0x157   :  { %1634 = vmatpush.bf16.msrb.mxu1 %v5521_v47  ;;  %v5526_v47 = vld [vmem:[#allocation3 + $0x90] sm:$0xff] }
 0x158   :  { %v5794_v26 = vpop.eup %5793 }
 0x159   :  { %v974_v43 = vmul.f32 %v5794_v26, %v963_v56  ;;  %v306_v26 = vadd.f32 %v6392_v5, %v6490_v55 }
 0x15b   :  { %v976_v59 = vpack.c.bf16 %v974_v43, %v974_v43  ;;  %v5708_v62 = vpack.c.bf16 %v974_v43, %v973_v57  ;;  %v5529_v57 = vld [vmem:[#allocation3 + $0xa8] sm:$0xff]  ;;  %1635 = vmatpush.bf16.msrb.mxu1 %v5520_v33 }
 0x15c   :  { %v5537_v43 = vld [vmem:[#allocation3 + $0xe8] sm:$0xff]  ;;  %1752 = vmatpush.bf16.msrb.mxu2 %v5529_v57  ;;  %v5534_v57 = vld [vmem:[#allocation3 + $0xd0] sm:$0xff] }
 0x15d   :  { %5709 = vst [vmem:[#allocation15] sm:$0xff] %v5708_v62   ;;  %v1003_v38 = vunpack.c.l.b16 %v976_v59  ;;  %1834 = vmatpush.bf16.msrb.mxu3 %v5537_v43 }
 0x15f   :  { %v1004_v48 = vpack.c.b16 %v1003_v38, %v1002_v60 }
 0x160   :  { %1753 = vmatpush.bf16.msrb.mxu2 %v5528_v32 }
 0x161   :  { %1062 = vmatmul.bf16.vlgmr.msra.gmra.mxu0 %v1004_v48  ;;  %1180 = vmatmul.bf16.vlgmr.msra.gmra.mxu1 %v1004_v48 }
 0x162   :  { %1298 = vmatmul.bf16.vlgmr.msra.gmra.mxu2 %v1004_v48  ;;  %1380 = vmatmul.bf16.vlgmr.msra.gmra.mxu3 %v1004_v48  ;;  %v5512_v48 = vld [vmem:[#allocation3 + $0x20] sm:$0xff] }
 0x163   :  { %1517 = vmatpush.bf16.msrb.mxu0 %v5512_v48  ;;  %v5533_v48 = vld [vmem:[#allocation3 + $0xc8] sm:$0xff] }
 0x164   :  { %1754 = vmatpush.bf16.msrb.mxu2 %v5527_v41  ;;  %v5516_v41 = vld [vmem:[#allocation3 + $0x40] sm:$0xff] }
 0x168   :  { %1755 = vmatpush.bf16.msrb.mxu2 %v5526_v47 }
 0x1de   :  { %v1063_v37 = vpop.f32.mrf.mxu0  ;;  %v1181_v58 = vpop.f32.mrf.mxu1 }
 0x1df   :  { %v1064_v45 = vadd.f32 %v1063_v37, %v255_v53  ;;  %v1182_v52 = vadd.f32 %v1181_v58, %v304_v36  ;;  %v5536_v53 = vld [vmem:[#allocation3 + $0xe0] sm:$0xff] }
 0x1e0   :  { %1835 = vmatpush.bf16.msrb.mxu3 %v5536_v53 }
 0x1e1   :  { %v4525_v46 = vmul.f32 -1.442695, %v1064_v45  ;;  %v4559_v51 = vmul.f32 -1.442695, %v1182_v52  ;;  %v5511_v45 = vld [vmem:[#allocation3 + $0x18] sm:$0xff] }
 0x1e2   :  { %v5519_v52 = vld [vmem:[#allocation3 + $0x58] sm:$0xff]  ;;  %1518 = vmatpush.bf16.msrb.mxu0 %v5511_v45 }
 0x1e3   :  { %5795 = vpow2.f32 %v4525_v46  ;;  %v5535_v46 = vld [vmem:[#allocation3 + $0xd8] sm:$0xff]  ;;  %1636 = vmatpush.bf16.msrb.mxu1 %v5519_v52  ;;  %v5508_v52 = vld [vmem:[#allocation3] sm:$0xff] }
 0x1e4   :  { %5797 = vpow2.f32 %v4559_v51  ;;  %v5510_v51 = vld [vmem:[#allocation3 + $0x10] sm:$0xff]  ;;  %1836 = vmatpush.bf16.msrb.mxu3 %v5535_v46  ;;  %v5532_v46 = vld [vmem:[#allocation3 + $0xc0] sm:$0xff] }
 0x1e5   :  { %v1381_v56 = vpop.f32.mrf.mxu3  ;;  %v1299_v58 = vpop.f32.mrf.mxu2 }
 0x1e6   :  { %v1382_v49 = vadd.f32 %v1381_v56, %v402_v0  ;;  %v1065_v59 = vpop.f32.mrf.mxu0  ;;  %v1183_v62 = vpop.f32.mrf.mxu1  ;;  %v353_v0 = vadd.f32 %v6386_v2, %v6512_v35  ;;  %1519 = vmatpush.bf16.msrb.mxu0 %v5510_v51 }
 0x1e7   :  { %v1066_v60 = vadd.f32 %v1065_v59, %v257_v34  ;;  %v1184_v38 = vadd.f32 %v1183_v62, %v306_v26  ;;  %1637 = vmatpush.bf16.msrb.mxu1 %v5518_v30  ;;  %v5509_v62 = vld [vmem:[#allocation3 + $0x8] sm:$0xff] }
 0x1e8   :  { %v4625_v3 = vmul.f32 -1.442695, %v1382_v49  ;;  %v1300_v7 = vadd.f32 %v1299_v58, %v353_v0  ;;  %1837 = vmatpush.bf16.msrb.mxu3 %v5534_v57 }
 0x1e9   :  { %v5796_v50 = vpop.eup %5795  ;;  %v4526_v4 = vmul.f32 -1.442695, %v1066_v60  ;;  %v4560_v39 = vmul.f32 -1.442695, %v1184_v38  ;;  %v5517_v60 = vld [vmem:[#allocation3 + $0x48] sm:$0xff] }
 0x1ea   :  { %v5798_v36 = vpop.eup %5797  ;;  %v6595_v5 = vadd.f32 1.0, %v5796_v50  ;;  %5799 = vpow2.f32 %v4625_v3  ;;  %v5525_v3 = vld [vmem:[#allocation3 + $0x88] sm:$0xff]  ;;  %v355_v50 = vadd.f32 %v6394_v6, %v6512_v35  ;;  %1520 = vmatpush.bf16.msrb.mxu0 %v5509_v62  ;;  %v5524_v6 = vld [vmem:[#allocation3 + $0x80] sm:$0xff] }
 0x1eb   :  { %v6597_v37 = vadd.f32 1.0, %v5798_v36  ;;  %5801 = vpow2.f32 %v4526_v4  ;;  %1638 = vmatpush.bf16.msrb.mxu1 %v5517_v60  ;;  %1756 = vmatpush.bf16.msrb.mxu2 %v5525_v3 }
 0x1ec   :  { %5803 = vrcp.f32 %v6595_v5  ;;  %v1085_v58 = vand.u32 2147483647, %v6595_v5  ;;  %v1087_v45 = vand.u32 2147483648, %v6595_v5  ;;  %1838 = vmatpush.bf16.msrb.mxu3 %v5533_v48  ;;  %vm1081_vm11 = vweird.f32 %v6595_v5 }
 0x1ed   :  { %5805 = vrcp.f32 %v6597_v37  ;;  %v1383_v40 = vpop.f32.mrf.mxu3  ;;  %v1301_v36 = vpop.f32.mrf.mxu2  ;;  %v1203_v30 = vand.u32 2147483647, %v6597_v37  ;;  %vm1199_vm12 = vweird.f32 %v6597_v37 }
 0x1ee   :  { %5807 = vpow2.f32 %v4560_v39  ;;  %v1384_v1 = vadd.f32 %v1383_v40, %v404_v61  ;;  %v1205_v61 = vand.u32 2147483648, %v6597_v37  ;;  %v1302_v0 = vadd.f32 %v1301_v36, %v355_v50  ;;  %1521 = vmatpush.bf16.msrb.mxu0 %v5508_v52 }
 0x1ef   :  { %vm1086_vm14 = vcmp.eq.f32.partialorder %v1085_v58, 8.507059e+37  ;;  %1639 = vmatpush.bf16.msrb.mxu1 %v5516_v41  ;;  %1757 = vmatpush.bf16.msrb.mxu2 %v5524_v6  ;;  %vm1204_vm0 = vcmp.eq.f32.partialorder %v1203_v30, 8.507059e+37 }
 0x1f0   :  { %v5800_v34 = vpop.eup %5799  ;;  %v4626_v59 = vmul.f32 -1.442695, %v1384_v1  ;;  %v1206_v62 = vor.u32 1.1754944e-38, %v1205_v61  ;;  %1839 = vmatpush.bf16.msrb.mxu3 %v5532_v46 }
 0x1f1   :  { %v5802_v26 = vpop.eup %5801  ;;  %v6605_v56 = vadd.f32 1.0, %v5800_v34 }
 0x1f2   :  { %v6607_v43 = vpop.eup %5803  ;;  %v6609_v49 = vadd.f32 1.0, %v5802_v26  ;;  %v1088_v26 = vor.u32 1.1754944e-38, %v1087_v45 }
 0x1f3   :  { %v5806_v2 = vpop.eup %5805  ;;  %v1077_v38 = vmul.f32 %v6607_v43, %v6595_v5  ;;  %5809 = vrcp.f32 %v6605_v56  ;;  %vm1082_vm9 = vweird.f32 %v6607_v43 }
 0x1f4   :  { %v5808_v33 = vpop.eup %5807  ;;  %v1195_v32 = vmul.f32 %v5806_v2, %v6597_v37  ;;  %5811 = vrcp.f32 %v6609_v49  ;;  %vm1200_vm10 = vweird.f32 %v5806_v2  ;;  %vm6634_vm13 = vmor %vm1081_vm11, %vm1082_vm9  ;;  %v1100_v58 = vand.u32 2147483647, %v6609_v49 }
 0x1f5   :  { %v1078_v4 = vsub.f32 1.0, %v1077_v38  ;;  %5813 = vtanh.f32 %v1300_v7  ;;  %v6618_v53 = vadd.f32 1.0, %v5808_v33  ;;  %vm1201_vm15 = vmor %vm1199_vm12, %vm1200_vm10  ;;  %v1102_v45 = vand.u32 2147483648, %v6609_v49 }
 0x1f6   :  { %v1196_v39 = vsub.f32 1.0, %v1195_v32  ;;  %5815 = vpow2.f32 %v4626_v59  ;;  %vm1096_vm2 = vweird.f32 %v6609_v49  ;;  %vm1101_vm5 = vcmp.eq.f32.partialorder %v1100_v58, 8.507059e+37 }
 0x1f7   :  { %v1079_v40 = vmul.f32 %v6607_v43, %v1078_v4  ;;  %5817 = vrcp.f32 %v6618_v53  ;;  %v1103_v30 = vor.u32 1.1754944e-38, %v1102_v45  ;;  %vm1214_vm6 = vweird.f32 %v6618_v53 }
 0x1f8   :  { %v1197_v51 = vmul.f32 %v5806_v2, %v1196_v39  ;;  %5819 = vtanh.f32 %v1302_v0  ;;  %vm1399_vm10 = vweird.f32 %v6605_v56 }
 0x1f9   :  { %v6627_v1 = vpop.eup %5809  ;;  %v1080_v47 = vadd.f32 %v6607_v43, %v1079_v40  ;;  %v1220_v40 = vand.u32 2147483648, %v6618_v53 }
 0x1fa   :  { %v5812_v57 = vpop.eup %5811  ;;  %v1198_v7 = vadd.f32 %v5806_v2, %v1197_v51  ;;  %v1395_v37 = vmul.f32 %v6627_v1, %v6605_v56  ;;  %vm1400_vm9 = vweird.f32 %v6627_v1 }
 0x1fb   :  { %v5814_v59 = vpop.eup %5813  ;;  %v1084_v5 = vsel %vm6634_vm13, %v6607_v43, %v1080_v47  ;;  %v1092_v60 = vmul.f32 %v5812_v57, %v6609_v49  ;;  %vm1097_vm1 = vweird.f32 %v5812_v57  ;;  %vm1401_vm11 = vmor %vm1399_vm10, %vm1400_vm9 }
 0x1fc   :  { %v5816_v38 = vpop.eup %5815  ;;  %v1089_v3 = vsel %vm1086_vm14, %v1088_v26, %v1084_v5  ;;  %v1202_v48 = vsel %vm1201_vm15, %v5806_v2, %v1198_v7  ;;  %v1396_v52 = vsub.f32 1.0, %v1395_v37  ;;  %vm1098_vm4 = vmor %vm1096_vm2, %vm1097_vm1 }
 0x1fd   :  { %v5818_v33 = vpop.eup %5817  ;;  %v1207_v32 = vsel %vm1204_vm0, %v1206_v62, %v1202_v48  ;;  %v1426_v50 = vmul.f32 %v5814_v59, %v1089_v3  ;;  %v1093_v4 = vsub.f32 1.0, %v1092_v60  ;;  %v1393_v36 = vadd.f32 1.0, %v5816_v38 }
 0x1fe   :  { %v1424_v39 = vmul.f32 %v1207_v32, %v6560_v63  ;;  %v1210_v43 = vmul.f32 %v5818_v33, %v6618_v53  ;;  %v1218_v63 = vand.u32 2147483647, %v6618_v53  ;;  %v5820_v46 = vpop.eup %5819  ;;  %vm1215_vm3 = vweird.f32 %v5818_v33 }
 0x1ff   :  { %v1094_v41 = vmul.f32 %v5812_v57, %v1093_v4  ;;  %5821 = vrcp.f32 %v1393_v36  ;;  %v1397_v0 = vmul.f32 %v6627_v1, %v1396_v52  ;;  %vm1216_vm7 = vmor %vm1214_vm6, %vm1215_vm3  ;;  %v1221_v59 = vor.u32 1.1754944e-38, %v1220_v40 }
 0x200   :  { %v6649_v2 = vadd.f32 %v1426_v50, %v1424_v39  ;;  %v1211_v61 = vsub.f32 1.0, %v1210_v43  ;;  %vm1219_vm8 = vcmp.eq.f32.partialorder %v1218_v63, 8.507059e+37  ;;  %v1403_v3 = vand.u32 2147483647, %v6605_v56 }
 0x201   :  { %v1095_v6 = vadd.f32 %v5812_v57, %v1094_v41  ;;  %v1398_v60 = vadd.f32 %v6627_v1, %v1397_v0  ;;  %v1420_v39 = vand.u32 2147483648, %v1393_v36  ;;  %vm1414_vm13 = vweird.f32 %v1393_v36  ;;  %v5555_v0 = vld [vmem:[#allocation3 + $0x78] sm:$0xff] }
 0x202   :  { %v1212_v51 = vmul.f32 %v5818_v33, %v1211_v61  ;;  %5823 = vtanh.f32 %v6649_v2  ;;  %vm1404_vm14 = vcmp.eq.f32.partialorder %v1403_v3, 8.507059e+37  ;;  %2092 = vmatpush.bf16.msra.mxu1 %v5555_v0  ;;  %v5570_v3 = vld [vmem:[#allocation3 + $0xf0] sm:$0xff]  ;;  %v5551_v0 = vld [vmem:[#allocation3 + $0x58] sm:$0xff] }
 0x203   :  { %v1099_v47 = vsel %vm1098_vm4, %v5812_v57, %v1095_v6  ;;  %v1405_v57 = vand.u32 2147483648, %v6605_v56  ;;  %v1402_v32 = vsel %vm1401_vm11, %v6627_v1, %v1398_v60  ;;  %v1421_v52 = vor.u32 1.1754944e-38, %v1420_v39  ;;  %v5554_v60 = vld [vmem:[#allocation3 + $0x70] sm:$0xff] }
 0x204   :  { %v1104_v34 = vsel %vm1101_vm5, %v1103_v30, %v1099_v47  ;;  %v1213_v26 = vadd.f32 %v5818_v33, %v1212_v51  ;;  %v5563_v47 = vld [vmem:[#allocation3 + $0xb8] sm:$0xff] }
 0x205   :  { %v5822_v7 = vpop.eup %5821  ;;  %v1427_v62 = vmul.f32 %v5820_v46, %v1104_v34  ;;  %v1406_v4 = vor.u32 1.1754944e-38, %v1405_v57  ;;  %v260_v34 = vadd.f32 %v6398_v8, %v6488_v54  ;;  %2210 = vmatpush.bf16.msra.mxu2 %v5563_v47  ;;  %v5562_v57 = vld [vmem:[#allocation3 + $0xb0] sm:$0xff]  ;;  %v407_v8 = vadd.f32 %v6404_v11, %v6500_v42  ;;  %v5559_v47 = vld [vmem:[#allocation3 + $0x98] sm:$0xff] }
 0x206   :  { %v1217_v49 = vsel %vm1216_vm7, %v5818_v33, %v1213_v26  ;;  %v1410_v5 = vmul.f32 %v5822_v7, %v1393_v36  ;;  %vm1415_vm12 = vweird.f32 %v5822_v7  ;;  %v309_v26 = vadd.f32 %v6400_v9, %v6490_v55  ;;  %2093 = vmatpush.bf16.msra.mxu1 %v5554_v60  ;;  %v5545_v9 = vld [vmem:[#allocation3 + $0x28] sm:$0xff]  ;;  %v5566_v60 = vld [vmem:[#allocation3 + $0xd0] sm:$0xff] }
 0x207   :  { %v1222_v37 = vsel %vm1219_vm8, %v1221_v59, %v1217_v49  ;;  %vm1416_vm15 = vmor %vm1414_vm13, %vm1415_vm12  ;;  %v1407_v58 = vsel %vm1404_vm14, %v1406_v4, %v1402_v32  ;;  %v5561_v32 = vld [vmem:[#allocation3 + $0xa8] sm:$0xff]  ;;  %v311_v4 = vadd.f32 %v6408_v13, %v6490_v55 }
 0x208   :  { %v1425_v53 = vmul.f32 %v1222_v37, %v6578_v44  ;;  %v1411_v38 = vsub.f32 1.0, %v1410_v5  ;;  %v5824_v50 = vpop.eup %5823  ;;  %v1418_v44 = vand.u32 2147483647, %v1393_v36  ;;  %v5547_v36 = vld [vmem:[#allocation3 + $0x38] sm:$0xff]  ;;  %v5546_v37 = vld [vmem:[#allocation3 + $0x30] sm:$0xff] }
 0x209   :  { %v1432_v56 = vmul.f32 %v5824_v50, %v1407_v58  ;;  %1974 = vmatpush.bf16.msra.mxu0 %v5547_v36  ;;  %2211 = vmatpush.bf16.msra.mxu2 %v5562_v57  ;;  %v262_v50 = vadd.f32 %v6406_v12, %v6488_v54  ;;  %v5543_v36 = vld [vmem:[#allocation3 + $0x18] sm:$0xff] }
 0x20a   :  { %v6663_v48 = vadd.f32 %v1427_v62, %v1425_v53  ;;  %v1412_v33 = vmul.f32 %v5822_v7, %v1411_v38  ;;  %vm1419_vm0 = vcmp.eq.f32.partialorder %v1418_v44, 8.507059e+37 }
 0x20b   :  { %v1434_v6 = vpack.c.bf16 %v1432_v56, %v1432_v56 }
 0x20c   :  { %5825 = vtanh.f32 %v6663_v48  ;;  %v1413_v43 = vadd.f32 %v5822_v7, %v1412_v33  ;;  %v5553_v33 = vld [vmem:[#allocation3 + $0x68] sm:$0xff] }
 0x20d   :  { %v1462_v46 = vunpack.c.l.b16 %v1434_v6  ;;  %1975 = vmatpush.bf16.msra.mxu0 %v5546_v37  ;;  %2094 = vmatpush.bf16.msra.mxu1 %v5553_v33  ;;  %v5558_v37 = vld [vmem:[#allocation3 + $0x90] sm:$0xff]  ;;  %v5541_v33 = vld [vmem:[#allocation3 + $0x8] sm:$0xff] }
 0x20e   :  { %v1417_v45 = vsel %vm1416_vm15, %v5822_v7, %v1413_v43  ;;  %v5571_v7 = vld [vmem:[#allocation3 + $0xf8] sm:$0xff]  ;;  %v5569_v43 = vld [vmem:[#allocation3 + $0xe8] sm:$0xff]  ;;  %2212 = vmatpush.bf16.msra.mxu2 %v5561_v32 }
 0x20f   :  { %v1422_v61 = vsel %vm1419_vm0, %v1421_v52, %v1417_v45  ;;  %2292 = vmatpush.bf16.msra.mxu3 %v5571_v7  ;;  %v5567_v7 = vld [vmem:[#allocation3 + $0xd8] sm:$0xff]  ;;  %v5549_v32 = vld [vmem:[#allocation3 + $0x48] sm:$0xff] }
 0x211   :  { %1976 = vmatpush.bf16.msra.mxu0 %v5545_v9 }
 0x212   :  { %v5826_v41 = vpop.eup %5825 }
 0x213   :  { %v1433_v40 = vmul.f32 %v5826_v41, %v1422_v61  ;;  %2293 = vmatpush.bf16.msra.mxu3 %v5570_v3  ;;  %v5544_v41 = vld [vmem:[#allocation3 + $0x20] sm:$0xff] }
 0x214   :  { %v5552_v61 = vld [vmem:[#allocation3 + $0x60] sm:$0xff] }
 0x215   :  { %v1435_v1 = vpack.c.bf16 %v1433_v40, %v1433_v40  ;;  %v5713_v63 = vpack.c.bf16 %v1433_v40, %v1432_v56  ;;  %v5560_v40 = vld [vmem:[#allocation3 + $0xa0] sm:$0xff]  ;;  %1977 = vmatpush.bf16.msra.mxu0 %v5544_v41  ;;  %2095 = vmatpush.bf16.msra.mxu1 %v5552_v61 }
 0x216   :  { %2213 = vmatpush.bf16.msra.mxu2 %v5560_v40  ;;  %v5540_v40 = vld [vmem:[#allocation3] sm:$0xff] }
 0x217   :  { %5714 = vst [vmem:[#allocation15 + $0x8] sm:$0xff] %v5713_v63   ;;  %v1463_v51 = vunpack.c.l.b16 %v1435_v1  ;;  %2294 = vmatpush.bf16.msra.mxu3 %v5569_v43  ;;  %v5568_v1 = vld [vmem:[#allocation3 + $0xe0] sm:$0xff] }
 0x219   :  { %v1464_v30 = vpack.c.b16 %v1463_v51, %v1462_v46  ;;  %1978 = vmatpush.bf16.msra.mxu0 %v5543_v36  ;;  %2096 = vmatpush.bf16.msra.mxu1 %v5551_v0 }
 0x21a   :  { %2214 = vmatpush.bf16.msra.mxu2 %v5559_v47 }
 0x21b   :  { %1522 = vmatmul.bf16.vlgmr.msrb.gmra.mxu0 %v1464_v30  ;;  %1640 = vmatmul.bf16.vlgmr.msrb.gmra.mxu1 %v1464_v30 }
 0x21c   :  { %1758 = vmatmul.bf16.vlgmr.msrb.gmra.mxu2 %v1464_v30  ;;  %1840 = vmatmul.bf16.vlgmr.msrb.gmra.mxu3 %v1464_v30 }
 0x21d   :  { %2295 = vmatpush.bf16.msra.mxu3 %v5568_v1 }
 0x21e   :  { %2215 = vmatpush.bf16.msra.mxu2 %v5558_v37 }
 0x221   :  { %2296 = vmatpush.bf16.msra.mxu3 %v5567_v7 }
 0x225   :  { %2297 = vmatpush.bf16.msra.mxu3 %v5566_v60 }
 0x298   :  { %v1523_v59 = vpop.f32.mrf.mxu0  ;;  %v1641_v49 = vpop.f32.mrf.mxu1 }
 0x299   :  { %v1524_v62 = vadd.f32 %v1523_v59, %v260_v34  ;;  %v1642_v5 = vadd.f32 %v1641_v49, %v309_v26  ;;  %v409_v34 = vadd.f32 %v6412_v15, %v6500_v42  ;;  %v5542_v59 = vld [vmem:[#allocation3 + $0x10] sm:$0xff] }
 0x29a   :  { %v5550_v49 = vld [vmem:[#allocation3 + $0x50] sm:$0xff]  ;;  %1979 = vmatpush.bf16.msra.mxu0 %v5542_v59 }
 0x29b   :  { %v4659_v53 = vmul.f32 -1.442695, %v1524_v62  ;;  %v4693_v38 = vmul.f32 -1.442695, %v1642_v5  ;;  %v358_v62 = vadd.f32 %v6402_v10, %v6512_v35  ;;  %2097 = vmatpush.bf16.msra.mxu1 %v5550_v49 }
 0x29d   :  { %5827 = vpow2.f32 %v4659_v53 }
 0x29e   :  { %5829 = vpow2.f32 %v4693_v38  ;;  %1980 = vmatpush.bf16.msra.mxu0 %v5541_v33 }
 0x29f   :  { %v1841_v39 = vpop.f32.mrf.mxu3  ;;  %v1759_v30 = vpop.f32.mrf.mxu2  ;;  %2098 = vmatpush.bf16.msra.mxu1 %v5549_v32 }
 0x2a0   :  { %v1842_v44 = vadd.f32 %v1841_v39, %v407_v8  ;;  %v1525_v58 = vpop.f32.mrf.mxu0  ;;  %v1643_v45 = vpop.f32.mrf.mxu1  ;;  %v1760_v15 = vadd.f32 %v1759_v30, %v358_v62  ;;  %v5565_v39 = vld [vmem:[#allocation3 + $0xc8] sm:$0xff] }
 0x2a1   :  { %v1526_v56 = vadd.f32 %v1525_v58, %v262_v50  ;;  %v1644_v52 = vadd.f32 %v1643_v45, %v311_v4  ;;  %v5557_v4 = vld [vmem:[#allocation3 + $0x88] sm:$0xff]  ;;  %v360_v58 = vadd.f32 %v6410_v14, %v6512_v35  ;;  %2298 = vmatpush.bf16.msra.mxu3 %v5565_v39  ;;  %v5556_v14 = vld [vmem:[#allocation3 + $0x80] sm:$0xff] }
 0x2a2   :  { %v4759_v11 = vmul.f32 -1.442695, %v1842_v44  ;;  %2216 = vmatpush.bf16.msra.mxu2 %v5557_v4  ;;  %1981 = vmatpush.bf16.msra.mxu0 %v5540_v40 }
 0x2a3   :  { %v5828_v6 = vpop.eup %5827  ;;  %v4660_v12 = vmul.f32 -1.442695, %v1526_v56  ;;  %v4694_v46 = vmul.f32 -1.442695, %v1644_v52 }
 0x2a4   :  { %v5830_v63 = vpop.eup %5829  ;;  %v6677_v13 = vadd.f32 1.0, %v5828_v6  ;;  %5831 = vpow2.f32 %v4759_v11  ;;  %v5548_v6 = vld [vmem:[#allocation3 + $0x40] sm:$0xff] }
 0x2a5   :  { %v6679_v51 = vadd.f32 1.0, %v5830_v63  ;;  %5833 = vpow2.f32 %v4660_v12  ;;  %v5564_v63 = vld [vmem:[#allocation3 + $0xc0] sm:$0xff]  ;;  %2099 = vmatpush.bf16.msra.mxu1 %v5548_v6 }
 0x2a6   :  { %5835 = vrcp.f32 %v6677_v13  ;;  %v1545_v41 = vand.u32 2147483647, %v6677_v13  ;;  %v1547_v61 = vand.u32 2147483648, %v6677_v13  ;;  %vm1541_vm3 = vweird.f32 %v6677_v13  ;;  %2217 = vmatpush.bf16.msra.mxu2 %v5556_v14  ;;  %2299 = vmatpush.bf16.msra.mxu3 %v5564_v63 }
 0x2a7   :  { %5837 = vrcp.f32 %v6679_v51  ;;  %v1843_v26 = vpop.f32.mrf.mxu3  ;;  %v1761_v52 = vpop.f32.mrf.mxu2  ;;  %v1665_v12 = vand.u32 2147483648, %v6679_v51  ;;  %v1663_v30 = vand.u32 2147483647, %v6679_v51  ;;  %vm1659_vm4 = vweird.f32 %v6679_v51 }
 0x2a8   :  { %5839 = vpow2.f32 %v4694_v46  ;;  %v1844_v5 = vadd.f32 %v1843_v26, %v409_v34  ;;  %v1762_v36 = vadd.f32 %v1761_v52, %v360_v58  ;;  %vm1546_vm6 = vcmp.eq.f32.partialorder %v1545_v41, 8.507059e+37 }
 0x2a9   :  { %v1548_v7 = vor.u32 1.1754944e-38, %v1547_v61  ;;  %v1666_v62 = vor.u32 1.1754944e-38, %v1665_v12  ;;  %vm1664_vm8 = vcmp.eq.f32.partialorder %v1663_v30, 8.507059e+37 }
 0x2aa   :  { %v5832_v57 = vpop.eup %5831  ;;  %v4760_v9 = vmul.f32 -1.442695, %v1844_v5 }
 0x2ab   :  { %v5834_v53 = vpop.eup %5833  ;;  %v6687_v38 = vadd.f32 1.0, %v5832_v57 }
 0x2ac   :  { %v6689_v3 = vpop.eup %5835  ;;  %v6691_v8 = vadd.f32 1.0, %v5834_v53 }
 0x2ad   :  { %v5838_v10 = vpop.eup %5837  ;;  %v1537_v50 = vmul.f32 %v6689_v3, %v6677_v13  ;;  %5841 = vrcp.f32 %v6687_v38  ;;  %vm1542_vm1 = vweird.f32 %v6689_v3 }
 0x2ae   :  { %v5840_v43 = vpop.eup %5839  ;;  %v1655_v44 = vmul.f32 %v5838_v10, %v6679_v51  ;;  %5843 = vrcp.f32 %v6691_v8  ;;  %vm1660_vm2 = vweird.f32 %v5838_v10  ;;  %vm6716_vm5 = vmor %vm1541_vm3, %vm1542_vm1  ;;  %v1560_v4 = vand.u32 2147483647, %v6691_v8 }
 0x2af   :  { %v1538_v45 = vsub.f32 1.0, %v1537_v50  ;;  %5845 = vtanh.f32 %v1760_v15  ;;  %v6700_v56 = vadd.f32 1.0, %v5840_v43  ;;  %vm1661_vm7 = vmor %vm1659_vm4, %vm1660_vm2  ;;  %v1562_v39 = vand.u32 2147483648, %v6691_v8 }
 0x2b0   :  { %v1656_v11 = vsub.f32 1.0, %v1655_v44  ;;  %5847 = vpow2.f32 %v4760_v9  ;;  %vm1556_vm10 = vweird.f32 %v6691_v8  ;;  %vm1561_vm13 = vcmp.eq.f32.partialorder %v1560_v4, 8.507059e+37 }
 0x2b1   :  { %v1539_v1 = vmul.f32 %v6689_v3, %v1538_v45  ;;  %5849 = vrcp.f32 %v6700_v56  ;;  %v1680_v45 = vand.u32 2147483648, %v6700_v56  ;;  %v1563_v61 = vor.u32 1.1754944e-38, %v1562_v39 }
 0x2b2   :  { %v1657_v46 = vmul.f32 %v5838_v10, %v1656_v11  ;;  %5851 = vtanh.f32 %v1762_v36  ;;  %vm1674_vm14 = vweird.f32 %v6700_v56  ;;  %vm1859_vm2 = vweird.f32 %v6687_v38 }
 0x2b3   :  { %v6709_v0 = vpop.eup %5841  ;;  %v1540_v47 = vadd.f32 %v6689_v3, %v1539_v1  ;;  %v1681_v63 = vor.u32 1.1754944e-38, %v1680_v45 }
 0x2b4   :  { %v5844_v34 = vpop.eup %5843  ;;  %v1658_v59 = vadd.f32 %v5838_v10, %v1657_v46  ;;  %v1855_v51 = vmul.f32 %v6709_v0, %v6687_v38  ;;  %vm1860_vm1 = vweird.f32 %v6709_v0 }
 0x2b5   :  { %v5846_v49 = vpop.eup %5845  ;;  %v1544_v13 = vsel %vm6716_vm5, %v6689_v3, %v1540_v47  ;;  %v1552_v5 = vmul.f32 %v5844_v34, %v6691_v8  ;;  %vm1557_vm9 = vweird.f32 %v5844_v34  ;;  %vm1861_vm3 = vmor %vm1859_vm2, %vm1860_vm1 }
 0x2b6   :  { %v5848_v37 = vpop.eup %5847  ;;  %v1549_v60 = vsel %vm1546_vm6, %v1548_v7, %v1544_v13  ;;  %v1662_v57 = vsel %vm1661_vm7, %v5838_v10, %v1658_v59  ;;  %v1856_v43 = vsub.f32 1.0, %v1855_v51  ;;  %vm1558_vm12 = vmor %vm1556_vm10, %vm1557_vm9  ;;  %v1863_v7 = vand.u32 2147483647, %v6687_v38 }
 0x2b7   :  { %v5850_v53 = vpop.eup %5849  ;;  %v1667_v15 = vsel %vm1664_vm8, %v1666_v62, %v1662_v57  ;;  %v1886_v9 = vmul.f32 %v5846_v49, %v1549_v60  ;;  %v1553_v33 = vsub.f32 1.0, %v1552_v5  ;;  %v1853_v32 = vadd.f32 1.0, %v5848_v37 }
 0x2b8   :  { %v1884_v50 = vmul.f32 %v1667_v15, %v6649_v2  ;;  %v1670_v3 = vmul.f32 %v5850_v53, %v6700_v56  ;;  %v1678_v2 = vand.u32 2147483647, %v6700_v56  ;;  %v5852_v11 = vpop.eup %5851  ;;  %vm1675_vm11 = vweird.f32 %v5850_v53 }
 0x2b9   :  { %v1554_v44 = vmul.f32 %v5844_v34, %v1553_v33  ;;  %5853 = vrcp.f32 %v1853_v32  ;;  %v1857_v40 = vmul.f32 %v6709_v0, %v1856_v43  ;;  %vm1676_vm15 = vmor %vm1674_vm14, %vm1675_vm11  ;;  %v1880_v5 = vand.u32 2147483648, %v1853_v32 }
 0x2ba   :  { %v6731_v10 = vadd.f32 %v1886_v9, %v1884_v50  ;;  %v1671_v58 = vsub.f32 1.0, %v1670_v3  ;;  %vm1679_vm0 = vcmp.eq.f32.partialorder %v1678_v2, 8.507059e+37  ;;  %vm1874_vm5 = vweird.f32 %v1853_v32 }
 0x2bb   :  { %v1555_v52 = vadd.f32 %v5844_v34, %v1554_v44  ;;  %v1858_v47 = vadd.f32 %v6709_v0, %v1857_v40  ;;  %vm1864_vm6 = vcmp.eq.f32.partialorder %v1863_v7, 8.507059e+37  ;;  %v314_v44 = vadd.f32 %v6416_v17, %v6490_v55  ;;  %v5578_v17 = vld [vmem:[#allocation3 + $0x30] sm:$0xff]  ;;  %v5577_v7 = vld [vmem:[#allocation3 + $0x28] sm:$0xff] }
 0x2bc   :  { %v1672_v41 = vmul.f32 %v5850_v53, %v1671_v58  ;;  %5855 = vtanh.f32 %v6731_v10 }
 0x2bd   :  { %v1559_v6 = vsel %vm1558_vm12, %v5844_v34, %v1555_v52  ;;  %v1865_v34 = vand.u32 2147483648, %v6687_v38  ;;  %v1862_v62 = vsel %vm1861_vm3, %v6709_v0, %v1858_v47 }
 0x2be   :  { %v1564_v12 = vsel %vm1561_vm13, %v1563_v61, %v1559_v6  ;;  %v1673_v1 = vadd.f32 %v5850_v53, %v1672_v41  ;;  %v5587_v41 = vld [vmem:[#allocation3 + $0x78] sm:$0xff] }
 0x2bf   :  { %v5854_v14 = vpop.eup %5853  ;;  %v1887_v46 = vmul.f32 %v5852_v11, %v1564_v12  ;;  %v1866_v51 = vor.u32 1.1754944e-38, %v1865_v34  ;;  %v5579_v11 = vld [vmem:[#allocation3 + $0x38] sm:$0xff]  ;;  %2552 = vmatpush.bf16.msrb.mxu1 %v5587_v41 }
 0x2c0   :  { %v1677_v8 = vsel %vm1676_vm15, %v5850_v53, %v1673_v1  ;;  %v1870_v30 = vmul.f32 %v5854_v14, %v1853_v32  ;;  %vm1875_vm4 = vweird.f32 %v5854_v14  ;;  %v1881_v53 = vor.u32 1.1754944e-38, %v1880_v5  ;;  %v5595_v61 = vld [vmem:[#allocation3 + $0xb8] sm:$0xff]  ;;  %2434 = vmatpush.bf16.msrb.mxu0 %v5579_v11  ;;  %v5586_v1 = vld [vmem:[#allocation3 + $0x70] sm:$0xff] }
 0x2c1   :  { %v1682_v36 = vsel %vm1679_vm0, %v1681_v63, %v1677_v8  ;;  %vm1876_vm7 = vmor %vm1874_vm5, %vm1875_vm4  ;;  %v1867_v60 = vsel %vm1864_vm6, %v1866_v51, %v1862_v62  ;;  %v5603_v12 = vld [vmem:[#allocation3 + $0xf8] sm:$0xff]  ;;  %2670 = vmatpush.bf16.msrb.mxu2 %v5595_v61  ;;  %v267_v63 = vadd.f32 %v6422_v20, %v6488_v54  ;;  %v316_v8 = vadd.f32 %v6424_v21, %v6490_v55  ;;  %v5593_v62 = vld [vmem:[#allocation3 + $0xa8] sm:$0xff] }
 0x2c2   :  { %v1885_v56 = vmul.f32 %v1682_v36, %v6663_v48  ;;  %v1871_v26 = vsub.f32 1.0, %v1870_v30  ;;  %v5856_v13 = vpop.eup %5855  ;;  %v1878_v48 = vand.u32 2147483647, %v1853_v32  ;;  %v265_v32 = vadd.f32 %v6414_v16, %v6488_v54  ;;  %2752 = vmatpush.bf16.msrb.mxu3 %v5603_v12  ;;  %v5602_v30 = vld [vmem:[#allocation3 + $0xf0] sm:$0xff]  ;;  %v5601_v51 = vld [vmem:[#allocation3 + $0xe8] sm:$0xff] }
 0x2c3   :  { %v1892_v38 = vmul.f32 %v5856_v13, %v1867_v60  ;;  %v412_v16 = vadd.f32 %v6420_v19, %v6500_v42  ;;  %2553 = vmatpush.bf16.msrb.mxu1 %v5586_v1  ;;  %v5576_v60 = vld [vmem:[#allocation3 + $0x20] sm:$0xff]  ;;  %v5582_v11 = vld [vmem:[#allocation3 + $0x50] sm:$0xff] }
 0x2c4   :  { %v6745_v59 = vadd.f32 %v1887_v46, %v1885_v56  ;;  %v1872_v49 = vmul.f32 %v5854_v14, %v1871_v26  ;;  %vm1879_vm8 = vcmp.eq.f32.partialorder %v1878_v48, 8.507059e+37  ;;  %2435 = vmatpush.bf16.msrb.mxu0 %v5578_v17  ;;  %v5590_v61 = vld [vmem:[#allocation3 + $0x90] sm:$0xff] }
 0x2c5   :  { %v1894_v50 = vpack.c.bf16 %v1892_v38, %v1892_v38 }
 0x2c6   :  { %5857 = vtanh.f32 %v6745_v59  ;;  %v1873_v37 = vadd.f32 %v5854_v14, %v1872_v49  ;;  %2753 = vmatpush.bf16.msrb.mxu3 %v5602_v30  ;;  %v5585_v49 = vld [vmem:[#allocation3 + $0x68] sm:$0xff] }
 0x2c7   :  { %v1922_v4 = vunpack.c.l.b16 %v1894_v50  ;;  %2554 = vmatpush.bf16.msrb.mxu1 %v5585_v49  ;;  %v5581_v30 = vld [vmem:[#allocation3 + $0x48] sm:$0xff] }
 0x2c8   :  { %v1877_v57 = vsel %vm1876_vm7, %v5854_v14, %v1873_v37  ;;  %v5594_v14 = vld [vmem:[#allocation3 + $0xb0] sm:$0xff]  ;;  %2436 = vmatpush.bf16.msrb.mxu0 %v5577_v7 }
 0x2c9   :  { %v1882_v9 = vsel %vm1879_vm8, %v1881_v53, %v1877_v57  ;;  %2671 = vmatpush.bf16.msrb.mxu2 %v5594_v14  ;;  %v5584_v57 = vld [vmem:[#allocation3 + $0x60] sm:$0xff] }
 0x2ca   :  { %2754 = vmatpush.bf16.msrb.mxu3 %v5601_v51  ;;  %v5600_v53 = vld [vmem:[#allocation3 + $0xe0] sm:$0xff] }
 0x2cb   :  { %2555 = vmatpush.bf16.msrb.mxu1 %v5584_v57 }
 0x2cc   :  { %v5858_v15 = vpop.eup %5857  ;;  %2437 = vmatpush.bf16.msrb.mxu0 %v5576_v60 }
 0x2cd   :  { %v1893_v33 = vmul.f32 %v5858_v15, %v1882_v9  ;;  %2672 = vmatpush.bf16.msrb.mxu2 %v5593_v62  ;;  %v365_v62 = vadd.f32 %v6426_v22, %v6512_v35 }
 0x2ce   :  { %2755 = vmatpush.bf16.msrb.mxu3 %v5600_v53 }
 0x2cf   :  { %v1895_v0 = vpack.c.bf16 %v1893_v33, %v1893_v33  ;;  %v5718_v3 = vpack.c.bf16 %v1893_v33, %v1892_v38  ;;  %v5592_v38 = vld [vmem:[#allocation3 + $0xa0] sm:$0xff]  ;;  %v414_v33 = vadd.f32 %v6428_v23, %v6500_v42  ;;  %v5574_v23 = vld [vmem:[#allocation3 + $0x10] sm:$0xff] }
 0x2d1   :  { %5719 = vst [vmem:[#allocation15 + $0x10] sm:$0xff] %v5718_v3   ;;  %v1923_v39 = vunpack.c.l.b16 %v1895_v0  ;;  %2673 = vmatpush.bf16.msrb.mxu2 %v5592_v38  ;;  %v363_v0 = vadd.f32 %v6418_v18, %v6512_v35  ;;  %v5575_v3 = vld [vmem:[#allocation3 + $0x18] sm:$0xff] }
 0x2d2   :  { %2438 = vmatpush.bf16.msrb.mxu0 %v5575_v3 }
 0x2d3   :  { %v1924_v43 = vpack.c.b16 %v1923_v39, %v1922_v4  ;;  %v5583_v4 = vld [vmem:[#allocation3 + $0x58] sm:$0xff] }
 0x2d4   :  { %v5591_v39 = vld [vmem:[#allocation3 + $0x98] sm:$0xff]  ;;  %2556 = vmatpush.bf16.msrb.mxu1 %v5583_v4 }
 0x2d5   :  { %1982 = vmatmul.bf16.vlgmr.msra.gmra.mxu0 %v1924_v43  ;;  %2100 = vmatmul.bf16.vlgmr.msra.gmra.mxu1 %v1924_v43 }
 0x2d6   :  { %2218 = vmatmul.bf16.vlgmr.msra.gmra.mxu2 %v1924_v43  ;;  %2300 = vmatmul.bf16.vlgmr.msra.gmra.mxu3 %v1924_v43 }
 0x2d7   :  { %2674 = vmatpush.bf16.msrb.mxu2 %v5591_v39  ;;  %2439 = vmatpush.bf16.msrb.mxu0 %v5574_v23 }
 0x2d8   :  { %2557 = vmatpush.bf16.msrb.mxu1 %v5582_v11 }
 0x2db   :  { %2675 = vmatpush.bf16.msrb.mxu2 %v5590_v61 }
 0x2dc   :  { %2558 = vmatpush.bf16.msrb.mxu1 %v5581_v30 }
 0x352   :  { %v1983_v58 = vpop.f32.mrf.mxu0  ;;  %v2101_v45 = vpop.f32.mrf.mxu1 }
 0x353   :  { %v1984_v52 = vadd.f32 %v1983_v58, %v265_v32  ;;  %v2102_v2 = vadd.f32 %v2101_v45, %v314_v44  ;;  %v5599_v58 = vld [vmem:[#allocation3 + $0xd8] sm:$0xff] }
 0x354   :  { %2756 = vmatpush.bf16.msrb.mxu3 %v5599_v58 }
 0x355   :  { %v4793_v40 = vmul.f32 -1.442695, %v1984_v52  ;;  %v4827_v6 = vmul.f32 -1.442695, %v2102_v2 }
 0x357   :  { %5859 = vpow2.f32 %v4793_v40  ;;  %v5598_v40 = vld [vmem:[#allocation3 + $0xd0] sm:$0xff] }
 0x358   :  { %5861 = vpow2.f32 %v4827_v6  ;;  %2757 = vmatpush.bf16.msrb.mxu3 %v5598_v40 }
 0x359   :  { %v2301_v46 = vpop.f32.mrf.mxu3  ;;  %v2219_v15 = vpop.f32.mrf.mxu2 }
 0x35a   :  { %v2302_v36 = vadd.f32 %v2301_v46, %v412_v16  ;;  %v1985_v47 = vpop.f32.mrf.mxu0  ;;  %v2103_v34 = vpop.f32.mrf.mxu1  ;;  %v2220_v52 = vadd.f32 %v2219_v15, %v363_v0  ;;  %v5573_v46 = vld [vmem:[#allocation3 + $0x8] sm:$0xff] }
 0x35b   :  { %v1986_v56 = vadd.f32 %v1985_v47, %v267_v63  ;;  %v2104_v26 = vadd.f32 %v2103_v34, %v316_v8  ;;  %v5589_v34 = vld [vmem:[#allocation3 + $0x88] sm:$0xff]  ;;  %2440 = vmatpush.bf16.msrb.mxu0 %v5573_v46 }
 0x35c   :  { %v4893_v19 = vmul.f32 -1.442695, %v2302_v36  ;;  %2676 = vmatpush.bf16.msrb.mxu2 %v5589_v34 }
 0x35d   :  { %v5860_v13 = vpop.eup %5859  ;;  %v4794_v20 = vmul.f32 -1.442695, %v1986_v56  ;;  %v4828_v37 = vmul.f32 -1.442695, %v2104_v26  ;;  %v5597_v56 = vld [vmem:[#allocation3 + $0xc8] sm:$0xff] }
 0x35e   :  { %v5862_v5 = vpop.eup %5861  ;;  %v6759_v21 = vadd.f32 1.0, %v5860_v13  ;;  %5863 = vpow2.f32 %v4893_v19  ;;  %2758 = vmatpush.bf16.msrb.mxu3 %v5597_v56 }
 0x35f   :  { %v6761_v48 = vadd.f32 1.0, %v5862_v5  ;;  %5865 = vpow2.f32 %v4794_v20 }
 0x360   :  { %5867 = vrcp.f32 %v6759_v21  ;;  %v2005_v63 = vand.u32 2147483647, %v6759_v21  ;;  %v2007_v8 = vand.u32 2147483648, %v6759_v21  ;;  %vm2001_vm11 = vweird.f32 %v6759_v21 }
 0x361   :  { %5869 = vrcp.f32 %v6761_v48  ;;  %v2303_v9 = vpop.f32.mrf.mxu3  ;;  %v2125_v36 = vand.u32 2147483648, %v6761_v48  ;;  %v2123_v19 = vand.u32 2147483647, %v6761_v48  ;;  %v2221_v7 = vpop.f32.mrf.mxu2  ;;  %vm2119_vm12 = vweird.f32 %v6761_v48 }
 0x362   :  { %5871 = vpow2.f32 %v4828_v37  ;;  %v2304_v44 = vadd.f32 %v2303_v9, %v414_v33  ;;  %vm6807_vm14 = vcmp.eq.f32.partialorder %v2005_v63, 8.507059e+37  ;;  %v2008_v5 = vor.u32 1.1754944e-38, %v2007_v8  ;;  %v5572_v37 = vld [vmem:[#allocation3] sm:$0xff] }
 0x363   :  { %v2126_v57 = vor.u32 1.1754944e-38, %v2125_v36  ;;  %v2222_v15 = vadd.f32 %v2221_v7, %v365_v62  ;;  %v5588_v9 = vld [vmem:[#allocation3 + $0x80] sm:$0xff]  ;;  %vm2124_vm0 = vcmp.eq.f32.partialorder %v2123_v19, 8.507059e+37  ;;  %2441 = vmatpush.bf16.msrb.mxu0 %v5572_v37 }
 0x364   :  { %v5864_v50 = vpop.eup %5863  ;;  %v4894_v1 = vmul.f32 -1.442695, %v2304_v44  ;;  %v5596_v33 = vld [vmem:[#allocation3 + $0xc0] sm:$0xff]  ;;  %2677 = vmatpush.bf16.msrb.mxu2 %v5588_v9 }
 0x365   :  { %v5866_v43 = vpop.eup %5865  ;;  %v6769_v32 = vadd.f32 1.0, %v5864_v50  ;;  %2759 = vmatpush.bf16.msrb.mxu3 %v5596_v33 }
 0x366   :  { %v6771_v45 = vpop.eup %5867  ;;  %v6773_v2 = vadd.f32 1.0, %v5866_v43 }
 0x367   :  { %v6775_v41 = vpop.eup %5869  ;;  %v1997_v18 = vmul.f32 %v6771_v45, %v6759_v21  ;;  %5873 = vrcp.f32 %v6769_v32  ;;  %vm2002_vm9 = vweird.f32 %v6771_v45  ;;  %v5580_v21 = vld [vmem:[#allocation3 + $0x40] sm:$0xff]  ;;  %v2325_v62 = vand.u32 2147483648, %v6769_v32 }
 0x368   :  { %v5872_v6 = vpop.eup %5871  ;;  %v2115_v12 = vmul.f32 %v6775_v41, %v6761_v48  ;;  %5875 = vrcp.f32 %v6773_v2  ;;  %vm2120_vm10 = vweird.f32 %v6775_v41  ;;  %vm6803_vm13 = vmor %vm2001_vm11, %vm2002_vm9  ;;  %2559 = vmatpush.bf16.msrb.mxu1 %v5580_v21  ;;  %v2022_v61 = vand.u32 2147483648, %v6773_v2 }
 0x369   :  { %v1998_v16 = vsub.f32 1.0, %v1997_v18  ;;  %v6783_v17 = vadd.f32 1.0, %v5872_v6  ;;  %5877 = vtanh.f32 %v2220_v52  ;;  %vm6814_vm15 = vmor %vm2119_vm12, %vm2120_vm10  ;;  %v2020_v18 = vand.u32 2147483647, %v6773_v2 }
 0x36a   :  { %v2116_v14 = vsub.f32 1.0, %v2115_v12  ;;  %vm2016_vm2 = vweird.f32 %v6773_v2  ;;  %v2023_v63 = vor.u32 1.1754944e-38, %v2022_v61  ;;  %vm2319_vm10 = vweird.f32 %v6769_v32  ;;  %v5619_v61 = vld [vmem:[#allocation3 + $0x78] sm:$0xff] }
 0x36b   :  { %v1999_v47 = vmul.f32 %v6771_v45, %v1998_v16  ;;  %5879 = vrcp.f32 %v6783_v17  ;;  %vm2134_vm4 = vweird.f32 %v6783_v17  ;;  %vm2021_vm6 = vcmp.eq.f32.partialorder %v2020_v18, 8.507059e+37  ;;  %v5611_v18 = vld [vmem:[#allocation3 + $0x38] sm:$0xff] }
 0x36c   :  { %v2117_v26 = vmul.f32 %v6775_v41, %v2116_v14  ;;  %5881 = vpow2.f32 %v4894_v1  ;;  %v2138_v14 = vand.u32 2147483647, %v6783_v17  ;;  %v2326_v21 = vor.u32 1.1754944e-38, %v2325_v62  ;;  %2894 = vmatpush.bf16.msra.mxu0 %v5611_v18  ;;  %3012 = vmatpush.bf16.msra.mxu1 %v5619_v61 }
 0x36d   :  { %v6794_v49 = vpop.eup %5873  ;;  %v2000_v13 = vadd.f32 %v6771_v45, %v1999_v47  ;;  %5883 = vtanh.f32 %v2222_v15 }
 0x36e   :  { %v2118_v22 = vadd.f32 %v6775_v41, %v2117_v26  ;;  %v5876_v60 = vpop.eup %5875  ;;  %v2315_v53 = vmul.f32 %v6794_v49, %v6769_v32  ;;  %vm2139_vm8 = vcmp.eq.f32.partialorder %v2138_v14, 8.507059e+37  ;;  %vm2320_vm9 = vweird.f32 %v6794_v49 }
 0x36f   :  { %v2004_v38 = vsel %vm6803_vm13, %v6771_v45, %v2000_v13  ;;  %v5878_v50 = vpop.eup %5877  ;;  %v2012_v4 = vmul.f32 %v5876_v60, %v6773_v2  ;;  %vm2017_vm1 = vweird.f32 %v5876_v60  ;;  %v2323_v13 = vand.u32 2147483647, %v6769_v32  ;;  %vm2321_vm11 = vmor %vm2319_vm10, %vm2320_vm9 }
 0x370   :  { %v2009_v0 = vsel %vm6807_vm14, %v2008_v5, %v2004_v38  ;;  %v2122_v3 = vsel %vm6814_vm15, %v6775_v41, %v2118_v22  ;;  %v2316_v11 = vsub.f32 1.0, %v2315_v53  ;;  %vm2018_vm5 = vmor %vm2016_vm2, %vm2017_vm1  ;;  %v272_v14 = vadd.f32 %v6438_v28, %v6488_v54 }
 0x371   :  { %v5880_v39 = vpop.eup %5879  ;;  %v2127_v43 = vsel %vm2124_vm0, %v2126_v57, %v2122_v3  ;;  %v2346_v44 = vmul.f32 %v5878_v50, %v2009_v0  ;;  %v2013_v45 = vsub.f32 1.0, %v2012_v4  ;;  %vm2324_vm12 = vcmp.eq.f32.partialorder %v2323_v13, 8.507059e+37 }
 0x372   :  { %v2344_v58 = vmul.f32 %v2127_v43, %v6731_v10  ;;  %v2130_v52 = vmul.f32 %v5880_v39, %v6783_v17  ;;  %v5882_v23 = vpop.eup %5881  ;;  %v2140_v10 = vand.u32 2147483648, %v6783_v17  ;;  %vm2135_vm3 = vweird.f32 %v5880_v39 }
 0x373   :  { %v2014_v6 = vmul.f32 %v5876_v60, %v2013_v45  ;;  %v2313_v12 = vadd.f32 1.0, %v5882_v23  ;;  %v2317_v8 = vmul.f32 %v6794_v49, %v2316_v11  ;;  %v5884_v36 = vpop.eup %5883  ;;  %vm2136_vm7 = vmor %vm2134_vm4, %vm2135_vm3 }
 0x374   :  { %v6833_v41 = vadd.f32 %v2346_v44, %v2344_v58  ;;  %v2131_v40 = vsub.f32 1.0, %v2130_v52  ;;  %v2141_v47 = vor.u32 1.1754944e-38, %v2140_v10  ;;  %v270_v44 = vadd.f32 %v6430_v24, %v6488_v54 }
 0x375   :  { %v2015_v1 = vadd.f32 %v5876_v60, %v2014_v6  ;;  %5885 = vrcp.f32 %v2313_v12  ;;  %v2318_v17 = vadd.f32 %v6794_v49, %v2317_v8  ;;  %v2338_v48 = vand.u32 2147483647, %v2313_v12 }
 0x376   :  { %v2132_v16 = vmul.f32 %v5880_v39, %v2131_v40  ;;  %5887 = vtanh.f32 %v6833_v41  ;;  %vm2334_vm14 = vweird.f32 %v2313_v12  ;;  %v319_v58 = vadd.f32 %v6432_v25, %v6490_v55  ;;  %v5627_v40 = vld [vmem:[#allocation3 + $0xb8] sm:$0xff]  ;;  %v5610_v25 = vld [vmem:[#allocation3 + $0x30] sm:$0xff] }
 0x377   :  { %v2019_v46 = vsel %vm2018_vm5, %v5876_v60, %v2015_v1  ;;  %v2322_v5 = vsel %vm2321_vm11, %v6794_v49, %v2318_v17  ;;  %v2340_v60 = vand.u32 2147483648, %v2313_v12  ;;  %vm2339_vm0 = vcmp.eq.f32.partialorder %v2338_v48, 8.507059e+37  ;;  %3130 = vmatpush.bf16.msra.mxu2 %v5627_v40  ;;  %v5626_v1 = vld [vmem:[#allocation3 + $0xb0] sm:$0xff]  ;;  %2895 = vmatpush.bf16.msra.mxu0 %v5610_v25  ;;  %v5625_v17 = vld [vmem:[#allocation3 + $0xa8] sm:$0xff] }
 0x378   :  { %v2133_v30 = vadd.f32 %v5880_v39, %v2132_v16  ;;  %v2024_v2 = vsel %vm2021_vm6, %v2023_v63, %v2019_v46  ;;  %v2327_v57 = vsel %vm2324_vm12, %v2326_v21, %v2322_v5  ;;  %v417_v24 = vadd.f32 %v6436_v27, %v6500_v42  ;;  %v5618_v16 = vld [vmem:[#allocation3 + $0x70] sm:$0xff]  ;;  %v5608_v5 = vld [vmem:[#allocation3 + $0x20] sm:$0xff]  ;;  %v5613_v25 = vld [vmem:[#allocation3 + $0x48] sm:$0xff] }
 0x379   :  { %v2347_v56 = vmul.f32 %v5884_v36, %v2024_v2  ;;  %v2341_v53 = vor.u32 1.1754944e-38, %v2340_v60  ;;  %v321_v63 = vadd.f32 %v6440_v29, %v6490_v55  ;;  %v5634_v46 = vld [vmem:[#allocation3 + $0xf0] sm:$0xff]  ;;  %3013 = vmatpush.bf16.msra.mxu1 %v5618_v16  ;;  %v5632_v21 = vld [vmem:[#allocation3 + $0xe0] sm:$0xff]  ;;  %v419_v48 = vadd.f32 %v6444_v31, %v6500_v42 }
 0x37a   :  { %v2137_v34 = vsel %vm2136_vm7, %v5880_v39, %v2133_v30  ;;  %v5606_v31 = vld [vmem:[#allocation3 + $0x10] sm:$0xff] }
 0x37b   :  { %v2142_v26 = vsel %vm2139_vm8, %v2141_v47, %v2137_v34  ;;  %v5886_v7 = vpop.eup %5885  ;;  %3131 = vmatpush.bf16.msra.mxu2 %v5626_v1 }
 0x37c   :  { %v2345_v19 = vmul.f32 %v2142_v26, %v6745_v59  ;;  %v2330_v51 = vmul.f32 %v5886_v7, %v2313_v12  ;;  %v5888_v37 = vpop.eup %5887  ;;  %vm2335_vm13 = vweird.f32 %v5886_v7  ;;  %v5635_v12 = vld [vmem:[#allocation3 + $0xf8] sm:$0xff]  ;;  %v5617_v26 = vld [vmem:[#allocation3 + $0x68] sm:$0xff] }
 0x37d   :  { %v2352_v32 = vmul.f32 %v5888_v37, %v2327_v57  ;;  %vm2336_vm15 = vmor %vm2334_vm14, %vm2335_vm13  ;;  %3212 = vmatpush.bf16.msra.mxu3 %v5635_v12  ;;  %3014 = vmatpush.bf16.msra.mxu1 %v5617_v26  ;;  %v5624_v37 = vld [vmem:[#allocation3 + $0xa0] sm:$0xff] }
 0x37e   :  { %v6847_v20 = vadd.f32 %v2347_v56, %v2345_v19  ;;  %v2331_v22 = vsub.f32 1.0, %v2330_v51  ;;  %v5609_v56 = vld [vmem:[#allocation3 + $0x28] sm:$0xff] }
 0x37f   :  { %v2354_v50 = vpack.c.bf16 %v2352_v32, %v2352_v32  ;;  %2896 = vmatpush.bf16.msra.mxu0 %v5609_v56  ;;  %3132 = vmatpush.bf16.msra.mxu2 %v5625_v17 }
 0x380   :  { %5889 = vtanh.f32 %v6847_v20  ;;  %v2332_v59 = vmul.f32 %v5886_v7, %v2331_v22  ;;  %v5616_v22 = vld [vmem:[#allocation3 + $0x60] sm:$0xff] }
 0x381   :  { %v2382_v4 = vunpack.c.l.b16 %v2354_v50  ;;  %3213 = vmatpush.bf16.msra.mxu3 %v5634_v46  ;;  %3015 = vmatpush.bf16.msra.mxu1 %v5616_v22  ;;  %v5620_v22 = vld [vmem:[#allocation3 + $0x80] sm:$0xff] }
 0x382   :  { %v2333_v38 = vadd.f32 %v5886_v7, %v2332_v59 }
 0x383   :  { %2897 = vmatpush.bf16.msra.mxu0 %v5608_v5  ;;  %3133 = vmatpush.bf16.msra.mxu2 %v5624_v37  ;;  %v5628_v37 = vld [vmem:[#allocation3 + $0xc0] sm:$0xff] }
 0x384   :  { %v2337_v9 = vsel %vm2336_vm15, %v5886_v7, %v2333_v38  ;;  %v5633_v7 = vld [vmem:[#allocation3 + $0xe8] sm:$0xff] }
 0x385   :  { %v2342_v49 = vsel %vm2339_vm0, %v2341_v53, %v2337_v9  ;;  %3214 = vmatpush.bf16.msra.mxu3 %v5633_v7  ;;  %v7282_v38 = vld [vmem:[#allocation34_spill] sm:$0xff]  ;;  %v5607_v53 = vld [vmem:[#allocation3 + $0x18] sm:$0xff] }
 0x386   :  { %v5890_v15 = vpop.eup %5889  ;;  %v5623_v9 = vld [vmem:[#allocation3 + $0x98] sm:$0xff] }
 0x387   :  { %v2353_v33 = vmul.f32 %v5890_v15, %v2342_v49  ;;  %v5615_v15 = vld [vmem:[#allocation3 + $0x58] sm:$0xff]  ;;  %2898 = vmatpush.bf16.msra.mxu0 %v5607_v53  ;;  %3134 = vmatpush.bf16.msra.mxu2 %v5623_v9 }
 0x388   :  { %3016 = vmatpush.bf16.msra.mxu1 %v5615_v15 }
 0x389   :  { %v2355_v0 = vpack.c.bf16 %v2353_v33, %v2353_v33  ;;  %v5723_v3 = vpack.c.bf16 %v2353_v33, %v2352_v32  ;;  %3215 = vmatpush.bf16.msra.mxu3 %v5632_v21  ;;  %v368_v32 = vadd.f32 %v7282_v38, %v6512_v35 }
 0x38b   :  { %5724 = vst [vmem:[#allocation15 + $0x18] sm:$0xff] %v5723_v3   ;;  %v2383_v39 = vunpack.c.l.b16 %v2355_v0  ;;  %v5631_v0 = vld [vmem:[#allocation3 + $0xd8] sm:$0xff]  ;;  %2899 = vmatpush.bf16.msra.mxu0 %v5606_v31 }
 0x38d   :  { %v2384_v43 = vpack.c.b16 %v2383_v39, %v2382_v4  ;;  %3216 = vmatpush.bf16.msra.mxu3 %v5631_v0 }
 0x38f   :  { %2442 = vmatmul.bf16.vlgmr.msrb.gmra.mxu0 %v2384_v43  ;;  %2560 = vmatmul.bf16.vlgmr.msrb.gmra.mxu1 %v2384_v43 }
 0x390   :  { %2678 = vmatmul.bf16.vlgmr.msrb.gmra.mxu2 %v2384_v43  ;;  %2760 = vmatmul.bf16.vlgmr.msrb.gmra.mxu3 %v2384_v43  ;;  %v5614_v43 = vld [vmem:[#allocation3 + $0x50] sm:$0xff] }
 0x391   :  { %3017 = vmatpush.bf16.msra.mxu1 %v5614_v43 }
 0x395   :  { %3018 = vmatpush.bf16.msra.mxu1 %v5613_v25 }
 0x40c   :  { %v2443_v45 = vpop.f32.mrf.mxu0  ;;  %v2561_v52 = vpop.f32.mrf.mxu1 }
 0x40d   :  { %v2444_v23 = vadd.f32 %v2443_v45, %v270_v44  ;;  %v2562_v11 = vadd.f32 %v2561_v52, %v319_v58  ;;  %v5622_v45 = vld [vmem:[#allocation3 + $0x90] sm:$0xff] }
 0x40e   :  { %v5630_v52 = vld [vmem:[#allocation3 + $0xd0] sm:$0xff]  ;;  %3135 = vmatpush.bf16.msra.mxu2 %v5622_v45 }
 0x40f   :  { %v4927_v6 = vmul.f32 -1.442695, %v2444_v23  ;;  %v4961_v10 = vmul.f32 -1.442695, %v2562_v11  ;;  %3217 = vmatpush.bf16.msra.mxu3 %v5630_v52 }
 0x411   :  { %5891 = vpow2.f32 %v4927_v6 }
 0x412   :  { %5893 = vpow2.f32 %v4961_v10 }
 0x413   :  { %v2761_v8 = vpop.f32.mrf.mxu3  ;;  %v2679_v60 = vpop.f32.mrf.mxu2 }
 0x414   :  { %v2762_v30 = vadd.f32 %v2761_v8, %v417_v24  ;;  %v2445_v36 = vpop.f32.mrf.mxu0  ;;  %v2563_v47 = vpop.f32.mrf.mxu1  ;;  %v2680_v4 = vadd.f32 %v2679_v60, %v368_v32  ;;  %v5605_v24 = vld [vmem:[#allocation3 + $0x8] sm:$0xff] }
 0x415   :  { %v2446_v2 = vadd.f32 %v2445_v36, %v272_v14  ;;  %v2564_v34 = vadd.f32 %v2563_v47, %v321_v63  ;;  %v5621_v14 = vld [vmem:[#allocation3 + $0x88] sm:$0xff]  ;;  %v7283_v47 = vld [vmem:[#allocation35_spill] sm:$0xff]  ;;  %2900 = vmatpush.bf16.msra.mxu0 %v5605_v24 }
 0x416   :  { %v5027_v27 = vmul.f32 -1.442695, %v2762_v30  ;;  %v5629_v63 = vld [vmem:[#allocation3 + $0xc8] sm:$0xff]  ;;  %3136 = vmatpush.bf16.msra.mxu2 %v5621_v14 }
 0x417   :  { %v5892_v19 = vpop.eup %5891  ;;  %v4928_v28 = vmul.f32 -1.442695, %v2446_v2  ;;  %v4962_v13 = vmul.f32 -1.442695, %v2564_v34  ;;  %v370_v2 = vadd.f32 %v7283_v47, %v6512_v35  ;;  %3218 = vmatpush.bf16.msra.mxu3 %v5629_v63 }
 0x418   :  { %v5894_v62 = vpop.eup %5893  ;;  %v6861_v29 = vadd.f32 1.0, %v5892_v19  ;;  %5895 = vpow2.f32 %v5027_v27  ;;  %v5604_v19 = vld [vmem:[#allocation3] sm:$0xff] }
 0x419   :  { %v6863_v51 = vadd.f32 1.0, %v5894_v62  ;;  %5897 = vpow2.f32 %v4928_v28  ;;  %v5612_v28 = vld [vmem:[#allocation3 + $0x40] sm:$0xff]  ;;  %2901 = vmatpush.bf16.msra.mxu0 %v5604_v19 }
 0x41a   :  { %5899 = vrcp.f32 %v6861_v29  ;;  %v2465_v10 = vand.u32 2147483647, %v6861_v29  ;;  %v2467_v12 = vand.u32 2147483648, %v6861_v29  ;;  %vm2461_vm3 = vweird.f32 %v6861_v29  ;;  %3019 = vmatpush.bf16.msra.mxu1 %v5612_v28  ;;  %3137 = vmatpush.bf16.msra.mxu2 %v5620_v22 }
 0x41b   :  { %5901 = vrcp.f32 %v6863_v51  ;;  %v2763_v59 = vpop.f32.mrf.mxu3  ;;  %v2585_v16 = vand.u32 2147483648, %v6863_v51  ;;  %v2583_v46 = vand.u32 2147483647, %v6863_v51  ;;  %v2681_v30 = vpop.f32.mrf.mxu2  ;;  %vm2579_vm4 = vweird.f32 %v6863_v51  ;;  %3219 = vmatpush.bf16.msra.mxu3 %v5628_v37 }
 0x41c   :  { %5903 = vpow2.f32 %v4962_v13  ;;  %v2764_v50 = vadd.f32 %v2763_v59, %v419_v48  ;;  %vm6909_vm6 = vcmp.eq.f32.partialorder %v2465_v10, 8.507059e+37  ;;  %v2468_v26 = vor.u32 1.1754944e-38, %v2467_v12 }
 0x41d   :  { %v2682_v5 = vadd.f32 %v2681_v30, %v370_v2  ;;  %vm2584_vm8 = vcmp.eq.f32.partialorder %v2583_v46, 8.507059e+37 }
 0x41e   :  { %v5896_v57 = vpop.eup %5895  ;;  %v5028_v40 = vmul.f32 -1.442695, %v2764_v50 }
 0x41f   :  { %v5898_v49 = vpop.eup %5897  ;;  %v6871_v33 = vadd.f32 1.0, %v5896_v57 }
 0x420   :  { %v6873_v3 = vpop.eup %5899  ;;  %v6875_v39 = vadd.f32 1.0, %v5898_v49 }
 0x421   :  { %v6877_v44 = vpop.eup %5901  ;;  %v2457_v58 = vmul.f32 %v6873_v3, %v6861_v29  ;;  %5905 = vrcp.f32 %v6871_v33  ;;  %vm2462_vm1 = vweird.f32 %v6873_v3  ;;  %v2586_v29 = vor.u32 1.1754944e-38, %v2585_v16 }
 0x422   :  { %v5904_v23 = vpop.eup %5903  ;;  %v2575_v11 = vmul.f32 %v6877_v44, %v6863_v51  ;;  %5907 = vrcp.f32 %v6875_v39  ;;  %vm2580_vm2 = vweird.f32 %v6877_v44  ;;  %vm6905_vm5 = vmor %vm2461_vm3, %vm2462_vm1  ;;  %v2480_v0 = vand.u32 2147483647, %v6875_v39 }
 0x423   :  { %v2458_v18 = vsub.f32 1.0, %v2457_v58  ;;  %v6885_v61 = vadd.f32 1.0, %v5904_v23  ;;  %5909 = vtanh.f32 %v2680_v4  ;;  %vm6916_vm7 = vmor %vm2579_vm4, %vm2580_vm2  ;;  %vm2476_vm10 = vweird.f32 %v6875_v39 }
 0x424   :  { %v2576_v6 = vsub.f32 1.0, %v2575_v11  ;;  %vm2481_vm14 = vcmp.eq.f32.partialorder %v2480_v0, 8.507059e+37  ;;  %v2785_v14 = vand.u32 2147483648, %v6871_v33  ;;  %vm2779_vm2 = vweird.f32 %v6871_v33 }
 0x425   :  { %v2459_v1 = vmul.f32 %v6873_v3, %v2458_v18  ;;  %5911 = vrcp.f32 %v6885_v61  ;;  %v2598_v52 = vand.u32 2147483647, %v6885_v61  ;;  %vm2594_vm12 = vweird.f32 %v6885_v61 }
 0x426   :  { %v2577_v8 = vmul.f32 %v6877_v44, %v2576_v6  ;;  %5913 = vpow2.f32 %v5028_v40  ;;  %v2783_v63 = vand.u32 2147483647, %v6871_v33 }
 0x427   :  { %v6896_v36 = vpop.eup %5905  ;;  %v2460_v34 = vadd.f32 %v6873_v3, %v2459_v1  ;;  %5915 = vtanh.f32 %v2682_v5  ;;  %vm2599_vm0 = vcmp.eq.f32.partialorder %v2598_v52, 8.507059e+37 }
 0x428   :  { %v2578_v17 = vadd.f32 %v6877_v44, %v2577_v8  ;;  %v5908_v7 = vpop.eup %5907  ;;  %v2775_v51 = vmul.f32 %v6896_v36, %v6871_v33  ;;  %vm2780_vm1 = vweird.f32 %v6896_v36  ;;  %vm2784_vm4 = vcmp.eq.f32.partialorder %v2783_v63, 8.507059e+37 }
 0x429   :  { %v2464_v13 = vsel %vm6905_vm5, %v6873_v3, %v2460_v34  ;;  %v5910_v21 = vpop.eup %5909  ;;  %v2472_v48 = vmul.f32 %v5908_v7, %v6875_v39  ;;  %v2482_v3 = vand.u32 2147483648, %v6875_v39  ;;  %vm2477_vm9 = vweird.f32 %v5908_v7  ;;  %vm2781_vm3 = vmor %vm2779_vm2, %vm2780_vm1 }
 0x42a   :  { %v2469_v60 = vsel %vm6909_vm6, %v2468_v26, %v2464_v13  ;;  %v2582_v59 = vsel %vm6916_vm7, %v6877_v44, %v2578_v17  ;;  %v2776_v50 = vsub.f32 1.0, %v2775_v51  ;;  %vm2478_vm13 = vmor %vm2476_vm10, %vm2477_vm9  ;;  %v2786_v34 = vor.u32 1.1754944e-38, %v2785_v14 }
 0x42b   :  { %v5912_v57 = vpop.eup %5911  ;;  %v2587_v38 = vsel %vm2584_vm8, %v2586_v29, %v2582_v59  ;;  %v2806_v32 = vmul.f32 %v5910_v21, %v2469_v60  ;;  %v2473_v15 = vsub.f32 1.0, %v2472_v48  ;;  %v2483_v23 = vor.u32 1.1754944e-38, %v2482_v3  ;;  %v7290_v21 = vld [vmem:[#allocation36_spill] sm:$0xff]  ;;  %v7291_v59 = vld [vmem:[#allocation37_spill] sm:$0xff] }
 0x42c   :  { %v2804_v53 = vmul.f32 %v2587_v38, %v6833_v41  ;;  %v2590_v9 = vmul.f32 %v5912_v57, %v6885_v61  ;;  %v5914_v49 = vpop.eup %5913  ;;  %v2600_v41 = vand.u32 2147483648, %v6885_v61  ;;  %vm2595_vm11 = vweird.f32 %v5912_v57  ;;  %v5667_v3 = vld [vmem:[#allocation3 + $0xf8] sm:$0xff] }
 0x42d   :  { %v2474_v43 = vmul.f32 %v5908_v7, %v2473_v15  ;;  %v2773_v44 = vadd.f32 1.0, %v5914_v49  ;;  %v2777_v11 = vmul.f32 %v6896_v36, %v2776_v50  ;;  %v5916_v6 = vpop.eup %5915  ;;  %vm2596_vm15 = vmor %vm2594_vm12, %vm2595_vm11  ;;  %v275_v60 = vadd.f32 %v7290_v21, %v6488_v54  ;;  %v5643_v15 = vld [vmem:[#allocation3 + $0x38] sm:$0xff]  ;;  %3672 = vmatpush.bf16.msrb.mxu3 %v5667_v3 }
 0x42e   :  { %v6935_v4 = vadd.f32 %v2806_v32, %v2804_v53  ;;  %v2591_v31 = vsub.f32 1.0, %v2590_v9  ;;  %v2601_v10 = vor.u32 1.1754944e-38, %v2600_v41  ;;  %v324_v48 = vadd.f32 %v7291_v59, %v6490_v55  ;;  %v5651_v9 = vld [vmem:[#allocation3 + $0x78] sm:$0xff]  ;;  %3354 = vmatpush.bf16.msrb.mxu0 %v5643_v15  ;;  %v5642_v41 = vld [vmem:[#allocation3 + $0x30] sm:$0xff] }
 0x42f   :  { %v2475_v45 = vadd.f32 %v5908_v7, %v2474_v43  ;;  %5917 = vrcp.f32 %v2773_v44  ;;  %v2778_v61 = vadd.f32 %v6896_v36, %v2777_v11  ;;  %v2800_v27 = vand.u32 2147483648, %v2773_v44  ;;  %v5659_v49 = vld [vmem:[#allocation3 + $0xb8] sm:$0xff]  ;;  %3472 = vmatpush.bf16.msrb.mxu1 %v5651_v9  ;;  %v5654_v15 = vld [vmem:[#allocation3 + $0x90] sm:$0xff] }
 0x430   :  { %v2592_v58 = vmul.f32 %v5912_v57, %v2591_v31  ;;  %5919 = vtanh.f32 %v6935_v4  ;;  %v2798_v56 = vand.u32 2147483647, %v2773_v44  ;;  %vm2794_vm6 = vweird.f32 %v2773_v44  ;;  %3590 = vmatpush.bf16.msrb.mxu2 %v5659_v49  ;;  %v7292_v31 = vld [vmem:[#allocation39_spill] sm:$0xff] }
 0x431   :  { %v2479_v18 = vsel %vm2478_vm13, %v5908_v7, %v2475_v45  ;;  %v2782_v30 = vsel %vm2781_vm3, %v6896_v36, %v2778_v61  ;;  %v2801_v19 = vor.u32 1.1754944e-38, %v2800_v27  ;;  %v422_v43 = vadd.f32 %v7292_v31, %v6500_v42  ;;  %v7293_v45 = vld [vmem:[#allocation40_spill] sm:$0xff]  ;;  %v5641_v61 = vld [vmem:[#allocation3 + $0x28] sm:$0xff]  ;;  %v5662_v9 = vld [vmem:[#allocation3 + $0xd0] sm:$0xff] }
 0x432   :  { %v2593_v40 = vadd.f32 %v5912_v57, %v2592_v58  ;;  %v2484_v39 = vsel %vm2481_vm14, %v2483_v23, %v2479_v18  ;;  %v2787_v26 = vsel %vm2784_vm4, %v2786_v34, %v2782_v30  ;;  %vm2799_vm8 = vcmp.eq.f32.partialorder %v2798_v56, 8.507059e+37  ;;  %v5658_v58 = vld [vmem:[#allocation3 + $0xb0] sm:$0xff]  ;;  %v7294_v23 = vld [vmem:[#allocation41_spill] sm:$0xff]  ;;  %3355 = vmatpush.bf16.msrb.mxu0 %v5642_v41  ;;  %v5663_v21 = vld [vmem:[#allocation3 + $0xd8] sm:$0xff] }
 0x433   :  { %v2807_v24 = vmul.f32 %v5916_v6, %v2484_v39  ;;  %v277_v52 = vadd.f32 %v7293_v45, %v6488_v54  ;;  %v326_v11 = vadd.f32 %v7294_v23, %v6490_v55  ;;  %v5640_v27 = vld [vmem:[#allocation3 + $0x20] sm:$0xff]  ;;  %v5645_v45 = vld [vmem:[#allocation3 + $0x48] sm:$0xff] }
 0x434   :  { %v2597_v12 = vsel %vm2596_vm15, %v5912_v57, %v2593_v40  ;;  %v5666_v40 = vld [vmem:[#allocation3 + $0xf0] sm:$0xff]  ;;  %3591 = vmatpush.bf16.msrb.mxu2 %v5658_v58  ;;  %v5656_v56 = vld [vmem:[#allocation3 + $0xa0] sm:$0xff]  ;;  %v5637_v58 = vld [vmem:[#allocation3 + $0x8] sm:$0xff] }
 0x435   :  { %v2602_v25 = vsel %vm2599_vm0, %v2601_v10, %v2597_v12  ;;  %v5918_v1 = vpop.eup %5917  ;;  %3673 = vmatpush.bf16.msrb.mxu3 %v5666_v40 }
 0x436   :  { %v2805_v16 = vmul.f32 %v2602_v25, %v6847_v20  ;;  %v2790_v46 = vmul.f32 %v5918_v1, %v2773_v44  ;;  %v5920_v2 = vpop.eup %5919  ;;  %vm2795_vm5 = vweird.f32 %v5918_v1  ;;  %v5650_v44 = vld [vmem:[#allocation3 + $0x70] sm:$0xff]  ;;  %3356 = vmatpush.bf16.msrb.mxu0 %v5641_v61 }
 0x437   :  { %v2812_v33 = vmul.f32 %v5920_v2, %v2787_v26  ;;  %vm2796_vm7 = vmor %vm2794_vm6, %vm2795_vm5  ;;  %3473 = vmatpush.bf16.msrb.mxu1 %v5650_v44  ;;  %v5664_v26 = vld [vmem:[#allocation3 + $0xe0] sm:$0xff] }
 0x438   :  { %v6949_v8 = vadd.f32 %v2807_v24, %v2805_v16  ;;  %v2791_v47 = vsub.f32 1.0, %v2790_v46  ;;  %v5649_v16 = vld [vmem:[#allocation3 + $0x68] sm:$0xff] }
 0x439   :  { %v2814_v29 = vpack.c.bf16 %v2812_v33, %v2812_v33  ;;  %v5665_v46 = vld [vmem:[#allocation3 + $0xe8] sm:$0xff] }
 0x43a   :  { %5921 = vtanh.f32 %v6949_v8  ;;  %v2792_v20 = vmul.f32 %v5918_v1, %v2791_v47  ;;  %3674 = vmatpush.bf16.msrb.mxu3 %v5665_v46  ;;  %3357 = vmatpush.bf16.msrb.mxu0 %v5640_v27  ;;  %v5644_v46 = vld [vmem:[#allocation3 + $0x40] sm:$0xff] }
 0x43b   :  { %v2842_v5 = vunpack.c.l.b16 %v2814_v29  ;;  %3474 = vmatpush.bf16.msrb.mxu1 %v5649_v16  ;;  %v5639_v29 = vld [vmem:[#allocation3 + $0x18] sm:$0xff] }
 0x43c   :  { %v2793_v17 = vadd.f32 %v5918_v1, %v2792_v20  ;;  %v5648_v20 = vld [vmem:[#allocation3 + $0x60] sm:$0xff] }
 0x43e   :  { %v2797_v7 = vsel %vm2796_vm7, %v5918_v1, %v2793_v17  ;;  %v5657_v1 = vld [vmem:[#allocation3 + $0xa8] sm:$0xff]  ;;  %3675 = vmatpush.bf16.msrb.mxu3 %v5664_v26  ;;  %3358 = vmatpush.bf16.msrb.mxu0 %v5639_v29  ;;  %v5660_v26 = vld [vmem:[#allocation3 + $0xc0] sm:$0xff] }
 0x43f   :  { %v2802_v36 = vsel %vm2799_vm8, %v2801_v19, %v2797_v7  ;;  %3592 = vmatpush.bf16.msrb.mxu2 %v5657_v1  ;;  %3475 = vmatpush.bf16.msrb.mxu1 %v5648_v20  ;;  %v7295_v19 = vld [vmem:[#allocation43_spill] sm:$0xff] }
 0x440   :  { %v5922_v28 = vpop.eup %5921 }
 0x441   :  { %v2813_v62 = vmul.f32 %v5922_v28, %v2802_v36  ;;  %v424_v28 = vadd.f32 %v7295_v19, %v6500_v42  ;;  %v7296_v36 = vld [vmem:[#allocation38_spill] sm:$0xff] }
 0x442   :  { %3676 = vmatpush.bf16.msrb.mxu3 %v5663_v21 }
 0x443   :  { %v2815_v13 = vpack.c.bf16 %v2813_v62, %v2813_v62  ;;  %v5728_v51 = vpack.c.bf16 %v2813_v62, %v2812_v33  ;;  %3593 = vmatpush.bf16.msrb.mxu2 %v5656_v56  ;;  %v373_v62 = vadd.f32 %v7296_v36, %v6512_v35  ;;  %v5652_v56 = vld [vmem:[#allocation3 + $0x80] sm:$0xff] }
 0x445   :  { %5729 = vst [vmem:[#allocation15 + $0x20] sm:$0xff] %v5728_v51   ;;  %v2843_v22 = vunpack.c.l.b16 %v2815_v13  ;;  %v5647_v13 = vld [vmem:[#allocation3 + $0x58] sm:$0xff] }
 0x446   :  { %v5655_v51 = vld [vmem:[#allocation3 + $0x98] sm:$0xff]  ;;  %3476 = vmatpush.bf16.msrb.mxu1 %v5647_v13  ;;  %3677 = vmatpush.bf16.msrb.mxu3 %v5662_v9 }
 0x447   :  { %v2844_v37 = vpack.c.b16 %v2843_v22, %v2842_v5  ;;  %3594 = vmatpush.bf16.msrb.mxu2 %v5655_v51 }
 0x449   :  { %2902 = vmatmul.bf16.vlgmr.msra.gmra.mxu0 %v2844_v37  ;;  %3020 = vmatmul.bf16.vlgmr.msra.gmra.mxu1 %v2844_v37 }
 0x44a   :  { %3138 = vmatmul.bf16.vlgmr.msra.gmra.mxu2 %v2844_v37  ;;  %3220 = vmatmul.bf16.vlgmr.msra.gmra.mxu3 %v2844_v37 }
 0x44b   :  { %3595 = vmatpush.bf16.msrb.mxu2 %v5654_v15 }
 0x4c6   :  { %v2903_v57 = vpop.f32.mrf.mxu0  ;;  %v3021_v38 = vpop.f32.mrf.mxu1 }
 0x4c7   :  { %v2904_v32 = vadd.f32 %v2903_v57, %v275_v60  ;;  %v3022_v53 = vadd.f32 %v3021_v38, %v324_v48  ;;  %v5638_v57 = vld [vmem:[#allocation3 + $0x10] sm:$0xff] }
 0x4c8   :  { %v5646_v38 = vld [vmem:[#allocation3 + $0x50] sm:$0xff]  ;;  %3359 = vmatpush.bf16.msrb.mxu0 %v5638_v57 }
 0x4c9   :  { %v5061_v50 = vmul.f32 -1.442695, %v2904_v32  ;;  %v5095_v0 = vmul.f32 -1.442695, %v3022_v53  ;;  %3477 = vmatpush.bf16.msrb.mxu1 %v5646_v38 }
 0x4cb   :  { %5923 = vpow2.f32 %v5061_v50 }
 0x4cc   :  { %5925 = vpow2.f32 %v5095_v0  ;;  %3360 = vmatpush.bf16.msrb.mxu0 %v5637_v58 }
 0x4cd   :  { %v3221_v18 = vpop.f32.mrf.mxu3  ;;  %v3139_v17 = vpop.f32.mrf.mxu2  ;;  %3478 = vmatpush.bf16.msrb.mxu1 %v5645_v45 }
 0x4ce   :  { %v3222_v6 = vadd.f32 %v3221_v18, %v422_v43  ;;  %v2905_v10 = vpop.f32.mrf.mxu0  ;;  %v3023_v39 = vpop.f32.mrf.mxu1  ;;  %v3140_v59 = vadd.f32 %v3139_v17, %v373_v62  ;;  %v5661_v18 = vld [vmem:[#allocation3 + $0xc8] sm:$0xff] }
 0x4cf   :  { %v2906_v12 = vadd.f32 %v2905_v10, %v277_v52  ;;  %v3024_v24 = vadd.f32 %v3023_v39, %v326_v11  ;;  %v5653_v11 = vld [vmem:[#allocation3 + $0x88] sm:$0xff]  ;;  %3678 = vmatpush.bf16.msrb.mxu3 %v5661_v18 }
 0x4d0   :  { %v5161_v25 = vmul.f32 -1.442695, %v3222_v6  ;;  %3596 = vmatpush.bf16.msrb.mxu2 %v5653_v11 }
 0x4d1   :  { %v5924_v14 = vpop.eup %5923  ;;  %v5062_v63 = vmul.f32 -1.442695, %v2906_v12  ;;  %v5096_v2 = vmul.f32 -1.442695, %v3024_v24  ;;  %v7297_v12 = vld [vmem:[#allocation42_spill] sm:$0xff]  ;;  %3479 = vmatpush.bf16.msrb.mxu1 %v5644_v46 }
 0x4d2   :  { %v5926_v30 = vpop.eup %5925  ;;  %v6963_v47 = vadd.f32 1.0, %v5924_v14  ;;  %5927 = vpow2.f32 %v5161_v25  ;;  %v375_v24 = vadd.f32 %v7297_v12, %v6512_v35 }
 0x4d3   :  { %v6965_v34 = vadd.f32 1.0, %v5926_v30  ;;  %5929 = vpow2.f32 %v5062_v63  ;;  %v5636_v63 = vld [vmem:[#allocation3] sm:$0xff]  ;;  %3679 = vmatpush.bf16.msrb.mxu3 %v5660_v26 }
 0x4d4   :  { %5931 = vrcp.f32 %v6963_v47  ;;  %v2925_v41 = vand.u32 2147483647, %v6963_v47  ;;  %v2927_v44 = vand.u32 2147483648, %v6963_v47  ;;  %vm2921_vm11 = vweird.f32 %v6963_v47  ;;  %3361 = vmatpush.bf16.msrb.mxu0 %v5636_v63  ;;  %3597 = vmatpush.bf16.msrb.mxu2 %v5652_v56 }
 0x4d5   :  { %5933 = vrcp.f32 %v6965_v34  ;;  %v3223_v33 = vpop.f32.mrf.mxu3  ;;  %v3045_v52 = vand.u32 2147483648, %v6965_v34  ;;  %v3043_v6 = vand.u32 2147483647, %v6965_v34  ;;  %v3141_v10 = vpop.f32.mrf.mxu2  ;;  %vm3039_vm12 = vweird.f32 %v6965_v34 }
 0x4d6   :  { %5935 = vpow2.f32 %v5096_v2  ;;  %v3224_v37 = vadd.f32 %v3223_v33, %v424_v28  ;;  %vm7011_vm14 = vcmp.eq.f32.partialorder %v2925_v41, 8.507059e+37  ;;  %v2928_v1 = vor.u32 1.1754944e-38, %v2927_v44 }
 0x4d7   :  { %v3046_v2 = vor.u32 1.1754944e-38, %v3045_v52  ;;  %v3142_v20 = vadd.f32 %v3141_v10, %v375_v24  ;;  %vm3044_vm0 = vcmp.eq.f32.partialorder %v3043_v6, 8.507059e+37 }
 0x4d8   :  { %v5928_v7 = vpop.eup %5927  ;;  %v5162_v31 = vmul.f32 -1.442695, %v3224_v37 }
 0x4d9   :  { %v5930_v5 = vpop.eup %5929  ;;  %v6973_v22 = vadd.f32 1.0, %v5928_v7 }
 0x4da   :  { %v6975_v60 = vpop.eup %5931  ;;  %v6977_v48 = vadd.f32 1.0, %v5930_v5 }
 0x4db   :  { %v6979_v32 = vpop.eup %5933  ;;  %v2917_v53 = vmul.f32 %v6975_v60, %v6963_v47  ;;  %5937 = vrcp.f32 %v6973_v22  ;;  %vm2922_vm9 = vweird.f32 %v6975_v60  ;;  %v3245_v11 = vand.u32 2147483648, %v6973_v22 }
 0x4dc   :  { %v5936_v49 = vpop.eup %5935  ;;  %v3035_v50 = vmul.f32 %v6979_v32, %v6965_v34  ;;  %5939 = vrcp.f32 %v6977_v48  ;;  %vm3040_vm10 = vweird.f32 %v6979_v32  ;;  %vm7007_vm13 = vmor %vm2921_vm11, %vm2922_vm9  ;;  %v2940_v21 = vand.u32 2147483647, %v6977_v48 }
 0x4dd   :  { %v2918_v0 = vsub.f32 1.0, %v2917_v53  ;;  %v6987_v3 = vadd.f32 1.0, %v5936_v49  ;;  %5941 = vtanh.f32 %v3140_v59  ;;  %vm7018_vm15 = vmor %vm3039_vm12, %vm3040_vm10  ;;  %vm2936_vm2 = vweird.f32 %v6977_v48 }
 0x4de   :  { %v3036_v43 = vsub.f32 1.0, %v3035_v50  ;;  %vm2941_vm6 = vcmp.eq.f32.partialorder %v2940_v21, 8.507059e+37  ;;  %vm3239_vm10 = vweird.f32 %v6973_v22  ;;  %v3243_v18 = vand.u32 2147483647, %v6973_v22 }
 0x4df   :  { %v2919_v23 = vmul.f32 %v6975_v60, %v2918_v0  ;;  %5943 = vrcp.f32 %v6987_v3  ;;  %v3058_v9 = vand.u32 2147483647, %v6987_v3  ;;  %vm3054_vm4 = vweird.f32 %v6987_v3 }
 0x4e0   :  { %v3037_v40 = vmul.f32 %v6979_v32, %v3036_v43  ;;  %5945 = vpow2.f32 %v5162_v31  ;;  %vm3244_vm12 = vcmp.eq.f32.partialorder %v3243_v18, 8.507059e+37 }
 0x4e1   :  { %v6998_v39 = vpop.eup %5937  ;;  %v2920_v25 = vadd.f32 %v6975_v60, %v2919_v23  ;;  %5947 = vtanh.f32 %v3142_v20  ;;  %vm3059_vm8 = vcmp.eq.f32.partialorder %v3058_v9, 8.507059e+37 }
 0x4e2   :  { %v3038_v14 = vadd.f32 %v6979_v32, %v3037_v40  ;;  %v5940_v30 = vpop.eup %5939  ;;  %v3235_v27 = vmul.f32 %v6998_v39, %v6973_v22  ;;  %vm3240_vm9 = vweird.f32 %v6998_v39 }
 0x4e3   :  { %v2924_v34 = vsel %vm7007_vm13, %v6975_v60, %v2920_v25  ;;  %v5942_v17 = vpop.eup %5941  ;;  %v2932_v28 = vmul.f32 %v5940_v30, %v6977_v48  ;;  %v2942_v60 = vand.u32 2147483648, %v6977_v48  ;;  %vm2937_vm1 = vweird.f32 %v5940_v30  ;;  %vm3241_vm11 = vmor %vm3239_vm10, %vm3240_vm9 }
 0x4e4   :  { %v2929_v33 = vsel %vm7011_vm14, %v2928_v1, %v2924_v34  ;;  %v3042_v19 = vsel %vm7018_vm15, %v6979_v32, %v3038_v14  ;;  %v3236_v37 = vsub.f32 1.0, %v3235_v27  ;;  %vm2938_vm5 = vmor %vm2936_vm2, %vm2937_vm1  ;;  %v3246_v25 = vor.u32 1.1754944e-38, %v3245_v11 }
 0x4e5   :  { %v5944_v7 = vpop.eup %5943  ;;  %v3047_v36 = vsel %vm3044_vm0, %v3046_v2, %v3042_v19  ;;  %v3266_v62 = vmul.f32 %v5942_v17, %v2929_v33  ;;  %v2933_v13 = vsub.f32 1.0, %v2932_v28  ;;  %v2943_v49 = vor.u32 1.1754944e-38, %v2942_v60  ;;  %v7304_v17 = vld [vmem:[#allocation44_spill] sm:$0xff]  ;;  %v7305_v19 = vld [vmem:[#allocation45_spill] sm:$0xff] }
 0x4e6   :  { %v3264_v29 = vmul.f32 %v3047_v36, %v6935_v4  ;;  %v3050_v51 = vmul.f32 %v5944_v7, %v6987_v3  ;;  %v5946_v5 = vpop.eup %5945  ;;  %v3060_v4 = vand.u32 2147483648, %v6987_v3  ;;  %vm3055_vm3 = vweird.f32 %v5944_v7  ;;  %v5699_v60 = vld [vmem:[#allocation3 + $0xf8] sm:$0xff] }
 0x4e7   :  { %v2934_v38 = vmul.f32 %v5940_v30, %v2933_v13  ;;  %v3233_v32 = vadd.f32 1.0, %v5946_v5  ;;  %v3237_v50 = vmul.f32 %v6998_v39, %v3236_v37  ;;  %v5948_v43 = vpop.eup %5947  ;;  %vm3056_vm7 = vmor %vm3054_vm4, %vm3055_vm3  ;;  %v280_v33 = vadd.f32 %v7304_v17, %v6488_v54  ;;  %v5675_v13 = vld [vmem:[#allocation3 + $0x38] sm:$0xff]  ;;  %4132 = vmatpush.bf16.msra.mxu3 %v5699_v60 }
 0x4e8   :  { %v7037_v59 = vadd.f32 %v3266_v62, %v3264_v29  ;;  %v3051_v57 = vsub.f32 1.0, %v3050_v51  ;;  %v3061_v41 = vor.u32 1.1754944e-38, %v3060_v4  ;;  %v329_v28 = vadd.f32 %v7305_v19, %v6490_v55  ;;  %v5683_v51 = vld [vmem:[#allocation3 + $0x78] sm:$0xff]  ;;  %3814 = vmatpush.bf16.msra.mxu0 %v5675_v13  ;;  %v5674_v4 = vld [vmem:[#allocation3 + $0x30] sm:$0xff] }
 0x4e9   :  { %v2935_v15 = vadd.f32 %v5940_v30, %v2934_v38  ;;  %5949 = vrcp.f32 %v3233_v32  ;;  %v3238_v3 = vadd.f32 %v6998_v39, %v3237_v50  ;;  %v3260_v61 = vand.u32 2147483648, %v3233_v32  ;;  %v5691_v5 = vld [vmem:[#allocation3 + $0xb8] sm:$0xff]  ;;  %3932 = vmatpush.bf16.msra.mxu1 %v5683_v51  ;;  %v5686_v13 = vld [vmem:[#allocation3 + $0x90] sm:$0xff] }
 0x4ea   :  { %v3052_v53 = vmul.f32 %v5944_v7, %v3051_v57  ;;  %5951 = vtanh.f32 %v7037_v59  ;;  %v3258_v16 = vand.u32 2147483647, %v3233_v32  ;;  %vm3254_vm14 = vweird.f32 %v3233_v32  ;;  %4050 = vmatpush.bf16.msra.mxu2 %v5691_v5  ;;  %v7306_v57 = vld [vmem:[#allocation47_spill] sm:$0xff] }
 0x4eb   :  { %v2939_v0 = vsel %vm2938_vm5, %v5940_v30, %v2935_v15  ;;  %v3242_v10 = vsel %vm3241_vm11, %v6998_v39, %v3238_v3  ;;  %v3261_v63 = vor.u32 1.1754944e-38, %v3260_v61  ;;  %v427_v38 = vadd.f32 %v7306_v57, %v6500_v42  ;;  %v7307_v15 = vld [vmem:[#allocation48_spill] sm:$0xff]  ;;  %v5673_v3 = vld [vmem:[#allocation3 + $0x28] sm:$0xff]  ;;  %v5694_v51 = vld [vmem:[#allocation3 + $0xd0] sm:$0xff] }
 0x4ec   :  { %v3053_v31 = vadd.f32 %v5944_v7, %v3052_v53  ;;  %v2944_v48 = vsel %vm2941_vm6, %v2943_v49, %v2939_v0  ;;  %v3247_v1 = vsel %vm3244_vm12, %v3246_v25, %v3242_v10  ;;  %vm3259_vm0 = vcmp.eq.f32.partialorder %v3258_v16, 8.507059e+37  ;;  %v5690_v53 = vld [vmem:[#allocation3 + $0xb0] sm:$0xff]  ;;  %v7308_v49 = vld [vmem:[#allocation49_spill] sm:$0xff]  ;;  %3815 = vmatpush.bf16.msra.mxu0 %v5674_v4  ;;  %v5695_v17 = vld [vmem:[#allocation3 + $0xd8] sm:$0xff] }
 0x4ed   :  { %v3267_v58 = vmul.f32 %v5948_v43, %v2944_v48  ;;  %v282_v9 = vadd.f32 %v7307_v15, %v6488_v54  ;;  %v331_v50 = vadd.f32 %v7308_v49, %v6490_v55  ;;  %v5672_v61 = vld [vmem:[#allocation3 + $0x20] sm:$0xff]  ;;  %v5677_v15 = vld [vmem:[#allocation3 + $0x48] sm:$0xff] }
 0x4ee   :  { %v3057_v44 = vsel %vm3056_vm7, %v5944_v7, %v3053_v31  ;;  %v5698_v31 = vld [vmem:[#allocation3 + $0xf0] sm:$0xff]  ;;  %4051 = vmatpush.bf16.msra.mxu2 %v5690_v53  ;;  %v5688_v16 = vld [vmem:[#allocation3 + $0xa0] sm:$0xff]  ;;  %v5669_v53 = vld [vmem:[#allocation3 + $0x8] sm:$0xff] }
 0x4ef   :  { %v3062_v45 = vsel %vm3059_vm8, %v3061_v41, %v3057_v44  ;;  %v5950_v23 = vpop.eup %5949  ;;  %4133 = vmatpush.bf16.msra.mxu3 %v5698_v31 }
 0x4f0   :  { %v3265_v52 = vmul.f32 %v3062_v45, %v6949_v8  ;;  %v3250_v6 = vmul.f32 %v5950_v23, %v3233_v32  ;;  %v5952_v24 = vpop.eup %5951  ;;  %vm3255_vm13 = vweird.f32 %v5950_v23  ;;  %v5682_v32 = vld [vmem:[#allocation3 + $0x70] sm:$0xff]  ;;  %3816 = vmatpush.bf16.msra.mxu0 %v5673_v3 }
 0x4f1   :  { %v3272_v22 = vmul.f32 %v5952_v24, %v3247_v1  ;;  %vm3256_vm15 = vmor %vm3254_vm14, %vm3255_vm13  ;;  %3933 = vmatpush.bf16.msra.mxu1 %v5682_v32  ;;  %v5696_v1 = vld [vmem:[#allocation3 + $0xe0] sm:$0xff] }
 0x4f2   :  { %v7051_v40 = vadd.f32 %v3267_v58, %v3265_v52  ;;  %v3251_v12 = vsub.f32 1.0, %v3250_v6  ;;  %v5681_v52 = vld [vmem:[#allocation3 + $0x68] sm:$0xff] }
 0x4f3   :  { %v3274_v2 = vpack.c.bf16 %v3272_v22, %v3272_v22  ;;  %v5697_v6 = vld [vmem:[#allocation3 + $0xe8] sm:$0xff] }
 0x4f4   :  { %5953 = vtanh.f32 %v7051_v40  ;;  %v3252_v8 = vmul.f32 %v5950_v23, %v3251_v12  ;;  %4134 = vmatpush.bf16.msra.mxu3 %v5697_v6  ;;  %3817 = vmatpush.bf16.msra.mxu0 %v5672_v61  ;;  %v5676_v6 = vld [vmem:[#allocation3 + $0x40] sm:$0xff] }
 0x4f5   :  { %v3302_v20 = vunpack.c.l.b16 %v3274_v2  ;;  %3934 = vmatpush.bf16.msra.mxu1 %v5681_v52  ;;  %v5671_v2 = vld [vmem:[#allocation3 + $0x18] sm:$0xff] }
 0x4f6   :  { %v3253_v14 = vadd.f32 %v5950_v23, %v3252_v8  ;;  %v5680_v8 = vld [vmem:[#allocation3 + $0x60] sm:$0xff] }
 0x4f8   :  { %v3257_v30 = vsel %vm3256_vm15, %v5950_v23, %v3253_v14  ;;  %v5689_v23 = vld [vmem:[#allocation3 + $0xa8] sm:$0xff]  ;;  %4135 = vmatpush.bf16.msra.mxu3 %v5696_v1  ;;  %3818 = vmatpush.bf16.msra.mxu0 %v5671_v2  ;;  %v5692_v1 = vld [vmem:[#allocation3 + $0xc0] sm:$0xff] }
 0x4f9   :  { %v3262_v39 = vsel %vm3259_vm0, %v3261_v63, %v3257_v30  ;;  %4052 = vmatpush.bf16.msra.mxu2 %v5689_v23  ;;  %3935 = vmatpush.bf16.msra.mxu1 %v5680_v8  ;;  %v7309_v63 = vld [vmem:[#allocation50_spill] sm:$0xff] }
 0x4fa   :  { %v5954_v46 = vpop.eup %5953 }
 0x4fb   :  { %v3273_v47 = vmul.f32 %v5954_v46, %v3262_v39  ;;  %v429_v46 = vadd.f32 %v7309_v63, %v6500_v42  ;;  %v7310_v39 = vld [vmem:[#allocation46_spill] sm:$0xff] }
 0x4fc   :  { %4136 = vmatpush.bf16.msra.mxu3 %v5695_v17 }
 0x4fd   :  { %v3275_v34 = vpack.c.bf16 %v3273_v47, %v3273_v47  ;;  %v5733_v27 = vpack.c.bf16 %v3273_v47, %v3272_v22  ;;  %4053 = vmatpush.bf16.msra.mxu2 %v5688_v16  ;;  %v378_v47 = vadd.f32 %v7310_v39, %v6512_v35  ;;  %v5684_v16 = vld [vmem:[#allocation3 + $0x80] sm:$0xff] }
 0x4ff   :  { %5734 = vst [vmem:[#allocation15 + $0x28] sm:$0xff] %v5733_v27   ;;  %v3303_v56 = vunpack.c.l.b16 %v3275_v34  ;;  %v5679_v34 = vld [vmem:[#allocation3 + $0x58] sm:$0xff] }
 0x500   :  { %v5687_v27 = vld [vmem:[#allocation3 + $0x98] sm:$0xff]  ;;  %3936 = vmatpush.bf16.msra.mxu1 %v5679_v34  ;;  %4137 = vmatpush.bf16.msra.mxu3 %v5694_v51 }
 0x501   :  { %v3304_v26 = vpack.c.b16 %v3303_v56, %v3302_v20  ;;  %4054 = vmatpush.bf16.msra.mxu2 %v5687_v27 }
 0x503   :  { %3362 = vmatmul.bf16.vlgmr.msrb.gmra.mxu0 %v3304_v26  ;;  %3480 = vmatmul.bf16.vlgmr.msrb.gmra.mxu1 %v3304_v26 }
 0x504   :  { %3598 = vmatmul.bf16.vlgmr.msrb.gmra.mxu2 %v3304_v26  ;;  %3680 = vmatmul.bf16.vlgmr.msrb.gmra.mxu3 %v3304_v26 }
 0x505   :  { %4055 = vmatpush.bf16.msra.mxu2 %v5686_v13 }
 0x580   :  { %v3363_v7 = vpop.f32.mrf.mxu0  ;;  %v3481_v36 = vpop.f32.mrf.mxu1 }
 0x581   :  { %v3364_v62 = vadd.f32 %v3363_v7, %v280_v33  ;;  %v3482_v29 = vadd.f32 %v3481_v36, %v329_v28  ;;  %v5670_v7 = vld [vmem:[#allocation3 + $0x10] sm:$0xff] }
 0x582   :  { %v5678_v36 = vld [vmem:[#allocation3 + $0x50] sm:$0xff]  ;;  %3819 = vmatpush.bf16.msra.mxu0 %v5670_v7 }
 0x583   :  { %v5195_v37 = vmul.f32 -1.442695, %v3364_v62  ;;  %v5229_v21 = vmul.f32 -1.442695, %v3482_v29  ;;  %3937 = vmatpush.bf16.msra.mxu1 %v5678_v36 }
 0x585   :  { %5955 = vpow2.f32 %v5195_v37 }
 0x586   :  { %5957 = vpow2.f32 %v5229_v21  ;;  %3820 = vmatpush.bf16.msra.mxu0 %v5669_v53 }
 0x587   :  { %v3681_v0 = vpop.f32.mrf.mxu3  ;;  %v3599_v14 = vpop.f32.mrf.mxu2  ;;  %3938 = vmatpush.bf16.msra.mxu1 %v5677_v15 }
 0x588   :  { %v3682_v43 = vadd.f32 %v3681_v0, %v427_v38  ;;  %v3365_v41 = vpop.f32.mrf.mxu0  ;;  %v3483_v48 = vpop.f32.mrf.mxu1  ;;  %v3600_v19 = vadd.f32 %v3599_v14, %v378_v47  ;;  %v5693_v0 = vld [vmem:[#allocation3 + $0xc8] sm:$0xff] }
 0x589   :  { %v3366_v44 = vadd.f32 %v3365_v41, %v282_v9  ;;  %v3484_v58 = vadd.f32 %v3483_v48, %v331_v50  ;;  %v5685_v50 = vld [vmem:[#allocation3 + $0x88] sm:$0xff]  ;;  %4138 = vmatpush.bf16.msra.mxu3 %v5693_v0 }
 0x58a   :  { %v5295_v45 = vmul.f32 -1.442695, %v3682_v43  ;;  %4056 = vmatpush.bf16.msra.mxu2 %v5685_v50 }
 0x58b   :  { %v5956_v11 = vpop.eup %5955  ;;  %v5196_v18 = vmul.f32 -1.442695, %v3366_v44  ;;  %v5230_v24 = vmul.f32 -1.442695, %v3484_v58  ;;  %v7311_v44 = vld [vmem:[#allocation53_spill] sm:$0xff]  ;;  %3939 = vmatpush.bf16.msra.mxu1 %v5676_v6 }
 0x58c   :  { %v5958_v10 = vpop.eup %5957  ;;  %v7065_v12 = vadd.f32 1.0, %v5956_v11  ;;  %5959 = vpow2.f32 %v5295_v45  ;;  %v380_v58 = vadd.f32 %v7311_v44, %v6512_v35 }
 0x58d   :  { %v7067_v25 = vadd.f32 1.0, %v5958_v10  ;;  %5961 = vpow2.f32 %v5196_v18  ;;  %v5668_v18 = vld [vmem:[#allocation3] sm:$0xff]  ;;  %4139 = vmatpush.bf16.msra.mxu3 %v5692_v1 }
 0x58e   :  { %5963 = vrcp.f32 %v7065_v12  ;;  %v3385_v4 = vand.u32 2147483647, %v7065_v12  ;;  %v3387_v32 = vand.u32 2147483648, %v7065_v12  ;;  %vm3381_vm3 = vweird.f32 %v7065_v12  ;;  %3821 = vmatpush.bf16.msra.mxu0 %v5668_v18  ;;  %4057 = vmatpush.bf16.msra.mxu2 %v5684_v16 }
 0x58f   :  { %5965 = vrcp.f32 %v7067_v25  ;;  %v3683_v22 = vpop.f32.mrf.mxu3  ;;  %v3505_v9 = vand.u32 2147483648, %v7067_v25  ;;  %v3503_v43 = vand.u32 2147483647, %v7067_v25  ;;  %v3601_v41 = vpop.f32.mrf.mxu2  ;;  %vm3499_vm4 = vweird.f32 %v7067_v25 }
 0x590   :  { %5967 = vpow2.f32 %v5230_v24  ;;  %v3684_v26 = vadd.f32 %v3683_v22, %v429_v46  ;;  %vm7113_vm6 = vcmp.eq.f32.partialorder %v3385_v4, 8.507059e+37  ;;  %v3388_v23 = vor.u32 1.1754944e-38, %v3387_v32 }
 0x591   :  { %v3506_v24 = vor.u32 1.1754944e-38, %v3505_v9  ;;  %v3602_v8 = vadd.f32 %v3601_v41, %v380_v58  ;;  %vm3504_vm8 = vcmp.eq.f32.partialorder %v3503_v43, 8.507059e+37 }
 0x592   :  { %v5960_v30 = vpop.eup %5959  ;;  %v5296_v57 = vmul.f32 -1.442695, %v3684_v26 }
 0x593   :  { %v5962_v20 = vpop.eup %5961  ;;  %v7075_v56 = vadd.f32 1.0, %v5960_v30 }
 0x594   :  { %v7077_v33 = vpop.eup %5963  ;;  %v7079_v28 = vadd.f32 1.0, %v5962_v20 }
 0x595   :  { %v7081_v62 = vpop.eup %5965  ;;  %v3377_v29 = vmul.f32 %v7077_v33, %v7065_v12  ;;  %5969 = vrcp.f32 %v7075_v56  ;;  %vm3382_vm1 = vweird.f32 %v7077_v33  ;;  %v3705_v50 = vand.u32 2147483648, %v7075_v56 }
 0x596   :  { %v5968_v5 = vpop.eup %5967  ;;  %v3495_v37 = vmul.f32 %v7081_v62, %v7067_v25  ;;  %5971 = vrcp.f32 %v7079_v28  ;;  %vm3500_vm2 = vweird.f32 %v7081_v62  ;;  %vm7109_vm5 = vmor %vm3381_vm3, %vm3382_vm1  ;;  %v3400_v17 = vand.u32 2147483647, %v7079_v28 }
 0x597   :  { %v3378_v21 = vsub.f32 1.0, %v3377_v29  ;;  %v7089_v60 = vadd.f32 1.0, %v5968_v5  ;;  %5973 = vtanh.f32 %v3600_v19  ;;  %vm7120_vm7 = vmor %vm3499_vm4, %vm3500_vm2  ;;  %vm3396_vm10 = vweird.f32 %v7079_v28 }
 0x598   :  { %v3496_v38 = vsub.f32 1.0, %v3495_v37  ;;  %vm3401_vm14 = vcmp.eq.f32.partialorder %v3400_v17, 8.507059e+37  ;;  %vm3699_vm2 = vweird.f32 %v7075_v56  ;;  %v3703_v0 = vand.u32 2147483647, %v7075_v56  ;;  %v7321_v17 = vld [vmem:[#allocation55_spill] sm:$0xff] }
 0x599   :  { %v3379_v49 = vmul.f32 %v7077_v33, %v3378_v21  ;;  %5975 = vrcp.f32 %v7089_v60  ;;  %v3518_v51 = vand.u32 2147483647, %v7089_v60  ;;  %vm3514_vm12 = vweird.f32 %v7089_v60 }
 0x59a   :  { %v3497_v31 = vmul.f32 %v7081_v62, %v3496_v38  ;;  %5977 = vpow2.f32 %v5296_v57  ;;  %vm3704_vm4 = vcmp.eq.f32.partialorder %v3703_v0, 8.507059e+37 }
 0x59b   :  { %v7100_v48 = vpop.eup %5969  ;;  %v3380_v45 = vadd.f32 %v7077_v33, %v3379_v49  ;;  %5979 = vtanh.f32 %v3602_v8  ;;  %vm3519_vm0 = vcmp.eq.f32.partialorder %v3518_v51, 8.507059e+37 }
 0x59c   :  { %v3498_v11 = vadd.f32 %v7081_v62, %v3497_v31  ;;  %v5972_v10 = vpop.eup %5971  ;;  %v3695_v61 = vmul.f32 %v7100_v48, %v7075_v56  ;;  %vm3700_vm1 = vweird.f32 %v7100_v48 }
 0x59d   :  { %v3384_v25 = vsel %vm7109_vm5, %v7077_v33, %v3380_v45  ;;  %v5974_v14 = vpop.eup %5973  ;;  %v3392_v46 = vmul.f32 %v5972_v10, %v7079_v28  ;;  %v3402_v33 = vand.u32 2147483648, %v7079_v28  ;;  %vm3397_vm9 = vweird.f32 %v5972_v10  ;;  %vm3701_vm3 = vmor %vm3699_vm2, %vm3700_vm1 }
 0x59e   :  { %v3389_v22 = vsel %vm7113_vm6, %v3388_v23, %v3384_v25  ;;  %v3502_v63 = vsel %vm7120_vm7, %v7081_v62, %v3498_v11  ;;  %v3696_v26 = vsub.f32 1.0, %v3695_v61  ;;  %vm3398_vm13 = vmor %vm3396_vm10, %vm3397_vm9  ;;  %v3706_v45 = vor.u32 1.1754944e-38, %v3705_v50 }
 0x59f   :  { %v5976_v30 = vpop.eup %5975  ;;  %v3507_v39 = vsel %vm3504_vm8, %v3506_v24, %v3502_v63  ;;  %v3726_v47 = vmul.f32 %v5974_v14, %v3389_v22  ;;  %v3393_v34 = vsub.f32 1.0, %v3392_v46  ;;  %v3403_v5 = vor.u32 1.1754944e-38, %v3402_v33  ;;  %v7318_v14 = vld [vmem:[#allocation51_spill] sm:$0xff]  ;;  %v7319_v63 = vld [vmem:[#allocation52_spill] sm:$0xff] }
 0x5a0   :  { %v3724_v2 = vmul.f32 %v3507_v39, %v7037_v59  ;;  %v3510_v27 = vmul.f32 %v5976_v30, %v7089_v60  ;;  %v5978_v20 = vpop.eup %5977  ;;  %v3520_v59 = vand.u32 2147483648, %v7089_v60  ;;  %vm3515_vm11 = vweird.f32 %v5976_v30 }
 0x5a1   :  { %v3394_v36 = vmul.f32 %v5972_v10, %v3393_v34  ;;  %v3693_v62 = vadd.f32 1.0, %v5978_v20  ;;  %v3697_v37 = vmul.f32 %v7100_v48, %v3696_v26  ;;  %v5980_v38 = vpop.eup %5979  ;;  %vm3516_vm15 = vmor %vm3514_vm12, %vm3515_vm11  ;;  %v285_v22 = vadd.f32 %v7318_v14, %v6488_v54  ;;  %v7320_v20 = vld [vmem:[#allocation54_spill] sm:$0xff] }
 0x5a2   :  { %v7139_v19 = vadd.f32 %v3726_v47, %v3724_v2  ;;  %v3511_v7 = vsub.f32 1.0, %v3510_v27  ;;  %v3521_v4 = vor.u32 1.1754944e-38, %v3520_v59  ;;  %v334_v46 = vadd.f32 %v7319_v63, %v6490_v55 }
 0x5a3   :  { %v3395_v13 = vadd.f32 %v5972_v10, %v3394_v36  ;;  %5981 = vrcp.f32 %v3693_v62  ;;  %v3698_v60 = vadd.f32 %v7100_v48, %v3697_v37  ;;  %v3720_v3 = vand.u32 2147483648, %v3693_v62 }
 0x5a4   :  { %v3512_v29 = vmul.f32 %v5976_v30, %v3511_v7  ;;  %5983 = vtanh.f32 %v7139_v19  ;;  %v3718_v52 = vand.u32 2147483647, %v3693_v62  ;;  %vm3714_vm6 = vweird.f32 %v3693_v62  ;;  %v7322_v7 = vld [vmem:[#allocation56_spill] sm:$0xff] }
 0x5a5   :  { %v3399_v21 = vsel %vm3398_vm13, %v5972_v10, %v3395_v13  ;;  %v3702_v41 = vsel %vm3701_vm3, %v7100_v48, %v3698_v60  ;;  %v3721_v18 = vor.u32 1.1754944e-38, %v3720_v3  ;;  %v432_v26 = vadd.f32 %v7320_v20, %v6500_v42 }
 0x5a6   :  { %v3513_v57 = vadd.f32 %v5976_v30, %v3512_v29  ;;  %v3404_v28 = vsel %vm3401_vm14, %v3403_v5, %v3399_v21  ;;  %v3707_v23 = vsel %vm3704_vm4, %v3706_v45, %v3702_v41  ;;  %vm3719_vm8 = vcmp.eq.f32.partialorder %v3718_v52, 8.507059e+37 }
 0x5a7   :  { %v3727_v53 = vmul.f32 %v5980_v38, %v3404_v28  ;;  %v287_v33 = vadd.f32 %v7321_v17, %v6488_v54  ;;  %v336_v36 = vadd.f32 %v7322_v7, %v6490_v55  ;;  %v7323_v54 = vld [vmem:[#allocation57_spill] sm:$0xff]  ;;  %v7324_v55 = vld [vmem:[#allocation58_spill] sm:$0xff] }
 0x5a8   :  { %v3517_v32 = vsel %vm3516_vm15, %v5976_v30, %v3513_v57  ;;  %v434_v60 = vadd.f32 %v7324_v55, %v6500_v42  ;;  %v7325_v42 = vld [vmem:[#allocation59_spill] sm:$0xff] }
 0x5a9   :  { %v3522_v15 = vsel %vm3519_vm0, %v3521_v4, %v3517_v32  ;;  %v5982_v49 = vpop.eup %5981 }
 0x5aa   :  { %v3725_v9 = vmul.f32 %v3522_v15, %v7051_v40  ;;  %v3710_v43 = vmul.f32 %v5982_v49, %v3693_v62  ;;  %v5984_v58 = vpop.eup %5983  ;;  %vm3715_vm5 = vweird.f32 %v5982_v49  ;;  %v383_v15 = vadd.f32 %v7323_v54, %v6512_v35 }
 0x5ab   :  { %v3732_v56 = vmul.f32 %v5984_v58, %v3707_v23  ;;  %vm3716_vm7 = vmor %vm3714_vm6, %vm3715_vm5  ;;  %v385_v23 = vadd.f32 %v7325_v42, %v6512_v35 }
 0x5ac   :  { %v7153_v31 = vadd.f32 %v3727_v53, %v3725_v9  ;;  %v3711_v44 = vsub.f32 1.0, %v3710_v43 }
 0x5ad   :  { %v3734_v24 = vpack.c.bf16 %v3732_v56, %v3732_v56 }
 0x5ae   :  { %5985 = vtanh.f32 %v7153_v31  ;;  %v3712_v40 = vmul.f32 %v5982_v49, %v3711_v44 }
 0x5af   :  { %v3762_v8 = vunpack.c.l.b16 %v3734_v24 }
 0x5b0   :  { %v3713_v11 = vadd.f32 %v5982_v49, %v3712_v40 }
 0x5b2   :  { %v3717_v10 = vsel %vm3716_vm7, %v5982_v49, %v3713_v11 }
 0x5b3   :  { %v3722_v48 = vsel %vm3719_vm8, %v3721_v18, %v3717_v10 }
 0x5b4   :  { %v5986_v6 = vpop.eup %5985 }
 0x5b5   :  { %v3733_v12 = vmul.f32 %v5986_v6, %v3722_v48 }
 0x5b7   :  { %v3735_v25 = vpack.c.bf16 %v3733_v12, %v3733_v12  ;;  %v5738_v61 = vpack.c.bf16 %v3733_v12, %v3732_v56 }
 0x5b9   :  { %5739 = vst [vmem:[#allocation15 + $0x30] sm:$0xff] %v5738_v61   ;;  %v3763_v16 = vunpack.c.l.b16 %v3735_v25 }
 0x5bb   :  { %v3764_v1 = vpack.c.b16 %v3763_v16, %v3762_v8 }
 0x5bd   :  { %3822 = vmatmul.bf16.vlgmr.msra.gmra.mxu0 %v3764_v1  ;;  %3940 = vmatmul.bf16.vlgmr.msra.gmra.mxu1 %v3764_v1 }
 0x5be   :  { %4058 = vmatmul.bf16.vlgmr.msra.gmra.mxu2 %v3764_v1  ;;  %4140 = vmatmul.bf16.vlgmr.msra.gmra.mxu3 %v3764_v1 }
 0x63a   :  { %v3823_v30 = vpop.f32.mrf.mxu0  ;;  %v3941_v39 = vpop.f32.mrf.mxu1 }
 0x63b   :  { %v3824_v47 = vadd.f32 %v3823_v30, %v285_v22  ;;  %v3942_v2 = vadd.f32 %v3941_v39, %v334_v46 }
 0x63d   :  { %v5329_v34 = vmul.f32 -1.442695, %v3824_v47  ;;  %v5363_v27 = vmul.f32 -1.442695, %v3942_v2 }
 0x63f   :  { %5987 = vpow2.f32 %v5329_v34 }
 0x640   :  { %5989 = vpow2.f32 %v5363_v27 }
 0x641   :  { %v4141_v59 = vpop.f32.mrf.mxu3  ;;  %v4059_v28 = vpop.f32.mrf.mxu2 }
 0x642   :  { %v4142_v62 = vadd.f32 %v4141_v59, %v432_v26  ;;  %v3825_v29 = vpop.f32.mrf.mxu0  ;;  %v3943_v13 = vpop.f32.mrf.mxu1  ;;  %v4060_v49 = vadd.f32 %v4059_v28, %v383_v15 }
 0x643   :  { %v3826_v51 = vadd.f32 %v3825_v29, %v287_v33  ;;  %v3944_v5 = vadd.f32 %v3943_v13, %v336_v36 }
 0x644   :  { %v5429_v37 = vmul.f32 -1.442695, %v4142_v62 }
 0x645   :  { %v5988_v21 = vpop.eup %5987  ;;  %v5330_v57 = vmul.f32 -1.442695, %v3826_v51  ;;  %v5364_v32 = vmul.f32 -1.442695, %v3944_v5 }
 0x646   :  { %v5990_v38 = vpop.eup %5989  ;;  %v3834_v4 = vadd.f32 1.0, %v5988_v21  ;;  %5991 = vpow2.f32 %v5429_v37 }
 0x647   :  { %v3952_v53 = vadd.f32 1.0, %v5990_v38  ;;  %5993 = vpow2.f32 %v5330_v57 }
 0x648   :  { %5995 = vrcp.f32 %v3834_v4  ;;  %v3845_v6 = vand.u32 2147483647, %v3834_v4  ;;  %v3847_v10 = vand.u32 2147483648, %v3834_v4  ;;  %vm3841_vm12 = vweird.f32 %v3834_v4 }
 0x649   :  { %5997 = vrcp.f32 %v3952_v53  ;;  %v4143_v9 = vpop.f32.mrf.mxu3  ;;  %v4061_v56 = vpop.f32.mrf.mxu2  ;;  %v3965_v24 = vand.u32 2147483648, %v3952_v53  ;;  %v3963_v25 = vand.u32 2147483647, %v3952_v53  ;;  %vm3959_vm11 = vweird.f32 %v3952_v53 }
 0x64a   :  { %5999 = vpow2.f32 %v5364_v32  ;;  %v4144_v50 = vadd.f32 %v4143_v9, %v434_v60  ;;  %v4062_v8 = vadd.f32 %v4061_v56, %v385_v23  ;;  %vm3846_vm13 = vcmp.eq.f32.partialorder %v3845_v6, 8.507059e+37 }
 0x64b   :  { %6001 = vtanh.f32 %v4060_v49  ;;  %v3966_v63 = vor.u32 1.1754944e-38, %v3965_v24  ;;  %v3848_v46 = vor.u32 1.1754944e-38, %v3847_v10  ;;  %vm3964_vm0 = vcmp.eq.f32.partialorder %v3963_v25, 8.507059e+37 }
 0x64c   :  { %v5992_v0 = vpop.eup %5991  ;;  %v5430_v45 = vmul.f32 -1.442695, %v4144_v50 }
 0x64d   :  { %v5994_v43 = vpop.eup %5993  ;;  %v7171_v41 = vadd.f32 1.0, %v5992_v0 }
 0x64e   :  { %v5996_v44 = vpop.eup %5995  ;;  %v7173_v58 = vadd.f32 1.0, %v5994_v43 }
 0x64f   :  { %v5998_v3 = vpop.eup %5997  ;;  %v3837_v40 = vmul.f32 %v5996_v44, %v3834_v4  ;;  %6003 = vrcp.f32 %v7171_v41  ;;  %vm3842_vm9 = vweird.f32 %v5996_v44  ;;  %v4165_v4 = vand.u32 2147483648, %v7171_v41 }
 0x650   :  { %v6000_v52 = vpop.eup %5999  ;;  %v3955_v11 = vmul.f32 %v5998_v3, %v3952_v53  ;;  %6005 = vrcp.f32 %v7173_v58  ;;  %vm3960_vm10 = vweird.f32 %v5998_v3  ;;  %vm3843_vm14 = vmor %vm3841_vm12, %vm3842_vm9  ;;  %v3862_v17 = vand.u32 2147483648, %v7173_v58 }
 0x651   :  { %v3838_v18 = vsub.f32 1.0, %v3837_v40  ;;  %v7179_v48 = vadd.f32 1.0, %v6000_v52  ;;  %6007 = vpow2.f32 %v5430_v45  ;;  %v6002_v16 = vpop.eup %6001  ;;  %vm3961_vm15 = vmor %vm3959_vm11, %vm3960_vm10  ;;  %vm3856_vm1 = vweird.f32 %v7173_v58 }
 0x652   :  { %v3956_v12 = vsub.f32 1.0, %v3955_v11  ;;  %v3860_v37 = vand.u32 2147483647, %v7173_v58  ;;  %v3863_v32 = vor.u32 1.1754944e-38, %v3862_v17  ;;  %vm4159_vm7 = vweird.f32 %v7171_v41 }
 0x653   :  { %v3839_v61 = vmul.f32 %v5996_v44, %v3838_v18  ;;  %6009 = vrcp.f32 %v7179_v48  ;;  %v3980_v38 = vand.u32 2147483648, %v7179_v48  ;;  %v3978_v15 = vand.u32 2147483647, %v7179_v48 }
 0x654   :  { %v3957_v35 = vmul.f32 %v5998_v3, %v3956_v12  ;;  %6011 = vtanh.f32 %v4062_v8  ;;  %vm3861_vm6 = vcmp.eq.f32.partialorder %v3860_v37, 8.507059e+37  ;;  %v4163_v60 = vand.u32 2147483647, %v7171_v41 }
 0x655   :  { %v7182_v1 = vpop.eup %6003  ;;  %v3840_v14 = vadd.f32 %v5996_v44, %v3839_v61  ;;  %vm3974_vm8 = vweird.f32 %v7179_v48  ;;  %v3981_v43 = vor.u32 1.1754944e-38, %v3980_v38  ;;  %vm3979_vm11 = vcmp.eq.f32.partialorder %v3978_v15, 8.507059e+37 }
 0x656   :  { %v6006_v22 = vpop.eup %6005  ;;  %v3958_v30 = vadd.f32 %v5998_v3, %v3957_v35  ;;  %v4155_v39 = vmul.f32 %v7182_v1, %v7171_v41  ;;  %vm4160_vm3 = vweird.f32 %v7182_v1  ;;  %vm4164_vm12 = vcmp.eq.f32.partialorder %v4163_v60, 8.507059e+37 }
 0x657   :  { %v3844_v47 = vsel %vm3843_vm14, %v5996_v44, %v3840_v14  ;;  %v3852_v2 = vmul.f32 %v6006_v22, %v7173_v58  ;;  %v6008_v34 = vpop.eup %6007  ;;  %vm3857_vm2 = vweird.f32 %v6006_v22  ;;  %vm7207_vm9 = vmor %vm4159_vm7, %vm4160_vm3 }
 0x658   :  { %v3849_v27 = vsel %vm3846_vm13, %v3848_v46, %v3844_v47  ;;  %v3962_v20 = vsel %vm3961_vm15, %v5998_v3, %v3958_v30  ;;  %v4156_v26 = vsub.f32 1.0, %v4155_v39  ;;  %v7188_v62 = vadd.f32 1.0, %v6008_v34  ;;  %vm3858_vm5 = vmor %vm3856_vm1, %vm3857_vm2 }
 0x659   :  { %v6010_v33 = vpop.eup %6009  ;;  %v3967_v7 = vsel %vm3964_vm0, %v3966_v63, %v3962_v20  ;;  %v4186_v36 = vmul.f32 %v6002_v16, %v3849_v27  ;;  %v3853_v59 = vsub.f32 1.0, %v3852_v2  ;;  %v4166_v3 = vor.u32 1.1754944e-38, %v4165_v4 }
 0x65a   :  { %v4184_v29 = vmul.f32 %v3967_v7, %v7139_v19  ;;  %v3970_v13 = vmul.f32 %v6010_v33, %v7179_v48  ;;  %v4157_v51 = vmul.f32 %v7182_v1, %v4156_v26  ;;  %6013 = vrcp.f32 %v7188_v62  ;;  %v6012_v28 = vpop.eup %6011 }
 0x65b   :  { %v3854_v5 = vmul.f32 %v6006_v22, %v3853_v59  ;;  %vm3975_vm4 = vweird.f32 %v6010_v33  ;;  %v4180_v12 = vand.u32 2147483648, %v7188_v62  ;;  %vm4174_vm14 = vweird.f32 %v7188_v62 }
 0x65c   :  { %v4188_v21 = vadd.f32 %v4186_v36, %v4184_v29  ;;  %v3971_v57 = vsub.f32 1.0, %v3970_v13  ;;  %v4158_v53 = vadd.f32 %v7182_v1, %v4157_v51  ;;  %vm3976_vm10 = vmor %vm3974_vm8, %vm3975_vm4  ;;  %v4178_v24 = vand.u32 2147483647, %v7188_v62 }
 0x65d   :  { %v3855_v19 = vadd.f32 %v6006_v22, %v3854_v5 }
 0x65e   :  { %6015 = vtanh.f32 %v4188_v21  ;;  %4210 = vst [vmem:[#allocation18] sm:$0xff] %v4188_v21  ;;  %v3972_v54 = vmul.f32 %v6010_v33, %v3971_v57  ;;  %v4162_v58 = vsel %vm7207_vm9, %v7182_v1, %v4158_v53  ;;  %vm4179_vm0 = vcmp.eq.f32.partialorder %v4178_v24, 8.507059e+37 }
 0x65f   :  { %v3859_v55 = vsel %vm3858_vm5, %v6006_v22, %v3855_v19  ;;  %v4167_v11 = vsel %vm4164_vm12, %v4166_v3, %v4162_v58 }
 0x660   :  { %v3864_v9 = vsel %vm3861_vm6, %v3863_v32, %v3859_v55  ;;  %v3973_v49 = vadd.f32 %v6010_v33, %v3972_v54  ;;  %v6014_v0 = vpop.eup %6013 }
 0x661   :  { %v4187_v44 = vmul.f32 %v6012_v28, %v3864_v9  ;;  %v4170_v41 = vmul.f32 %v6014_v0, %v7188_v62  ;;  %vm4175_vm13 = vweird.f32 %v6014_v0 }
 0x662   :  { %v3977_v45 = vsel %vm3976_vm10, %v6010_v33, %v3973_v49  ;;  %vm4176_vm15 = vmor %vm4174_vm14, %vm4175_vm13 }
 0x663   :  { %v3982_v40 = vsel %vm3979_vm11, %v3981_v43, %v3977_v45  ;;  %v4171_v23 = vsub.f32 1.0, %v4170_v41 }
 0x664   :  { %v6016_v52 = vpop.eup %6015  ;;  %v4185_v42 = vmul.f32 %v3982_v40, %v7153_v31  ;;  %v4181_v31 = vor.u32 1.1754944e-38, %v4180_v12 }
 0x665   :  { %v4192_v56 = vmul.f32 %v6016_v52, %v4167_v11  ;;  %v4172_v6 = vmul.f32 %v6014_v0, %v4171_v23 }
 0x666   :  { %v4189_v18 = vadd.f32 %v4187_v44, %v4185_v42 }
 0x667   :  { %v4194_v10 = vpack.c.bf16 %v4192_v56, %v4192_v56  ;;  %v4173_v48 = vadd.f32 %v6014_v0, %v4172_v6 }
 0x668   :  { %6017 = vtanh.f32 %v4189_v18  ;;  %4211 = vst [vmem:[#allocation18 + $0x8] sm:$0xff] %v4189_v18 }
 0x669   :  { %v4206_v25 = vunpack.c.l.bf16 %v4194_v10  ;;  %v4177_v61 = vsel %vm4176_vm15, %v6014_v0, %v4173_v48 }
 0x66a   :  { %v4182_v16 = vsel %vm4179_vm0, %v4181_v31, %v4177_v61 }
 0x66b   :  { %4208 = vst [vmem:[#allocation16] sm:$0xff] %v4206_v25 }
 0x66e   :  { %v6018_v8 = vpop.eup %6017 }
 0x66f   :  { %v4193_v35 = vmul.f32 %v6018_v8, %v4182_v16 }
 0x671   :  { %v4195_v1 = vpack.c.bf16 %v4193_v35, %v4193_v35  ;;  %v5743_v14 = vpack.c.bf16 %v4193_v35, %v4192_v56 }
 0x673   :  { %5744 = vst [vmem:[#allocation15 + $0x38] sm:$0xff] %v5743_v14   ;;  %v4207_v22 = vunpack.c.l.bf16 %v4195_v1 }
 0x674   :  { %5749 = vst [vmem:[#allocation5] sm:$0xff] %v5743_v14   ;;  %4224 = dma.vmem_to_hbm [thread:$0]  %s4217_s3, 1024, %s4219_s1, [#allocation9], %s6251_s15, %s6251_s15, %s6252_s16  }
 0x675   :  { %4209 = vst [vmem:[#allocation16 + $0x8] sm:$0xff] %v4207_v22 }
 0x676   :  { %4237 = dma.vmem_to_hbm [thread:$0]  %s4230_s18, 256, %s4232_s0, [#allocation17], %s6254_s23, %s6254_s23, %s6255_s24  }
 0x677   :  { %4250 = dma.vmem_to_hbm [thread:$0]  %s4243_s22, 256, %s4245_s4, [#allocation17], %s6254_s23, %s6254_s23, %s6255_s24  }
 0x678   :  { %6245 = dma.done.wait [#allocation9], 1024  }
 0x679   :  { %6246 = vsyncadd [#allocation9], 4294966272 }
 0x67a   :  { %6247 = dma.done.wait [#allocation17], 512  }
 0x67b   :  { %6248 = vsyncadd [#allocation17], 4294966784 }
 0x67c   :  { %4263 = vsyncpa [#allocation8], 1 }
 0x67d   :  { %4264 = vsyncpa [#allocation11], 1 }
 0x67e   :  { %4265 = vsyncpa [#allocation14], 1 }
 0x67f   :  { %4266 = vsyncpa [#allocation9], 1 }
 0x680   :  { %4267 = vsyncpa [#allocation17], 1 }

</bundles_post_ra>
